<compile_context>
chip_gen: v6e
topology: v6e:2x2x1
jax: 0.10.0
libtpu: 0.0.40
codegen_flags: <defaults>
</compile_context>

<pallas_src>
import jax
import jax.numpy as jnp
from jax import lax
from jax.experimental import pallas as pl
from jax.experimental.pallas import tpu as pltpu

HIDDEN = 128
OUT_DIM = 100
OUT_PAD = 128   # pad final linear to full 128-lane width (unmasked stores)


def sentence_rnn_kernel(xg_ref,     # (T, B, 4H) f32  precomputed layer-0 input gates (x@Wih0 + b0)
                        whh0_ref,   # (H, 4H)    bf16 layer-0 recurrent weights (transposed, gate-reordered)
                        w1_ref,     # (2H, 4H)   bf16 layer-1 fused [Wih1; Whh1] (transposed, reordered)
                        b1_ref,     # (1, 4H)    f32  layer-1 combined bias
                        wout_ref,   # (H, OUT_PAD) f32 final linear weight (transposed, zero-padded)
                        bout_ref,   # (1, OUT_PAD) f32
                        out_ref):   # (B, OUT_PAD) f32
    T = xg_ref.shape[0]
    B = xg_ref.shape[1]
    H = HIDDEN

    # Loop-invariant weights / biases hoisted once.
    whh0 = whh0_ref[...]                                   # bf16
    w1 = w1_ref[...]                                       # bf16
    b1 = jnp.broadcast_to(b1_ref[...], (B, 4 * H))         # broadcast ONCE, not per timestep

    def gate_math(gates, c):
        # Gate column blocks are [i | f | o | g] (reordered at prep time):
        # one sigmoid over the first 3H lanes, one tanh over the last H lanes.
        sig = jax.nn.sigmoid(gates[:, :3 * H])
        g = jnp.tanh(gates[:, 3 * H:])
        i = sig[:, :H]
        f = sig[:, H:2 * H]
        o = sig[:, 2 * H:]
        c_new = f * c + i * g
        h_new = o * jnp.tanh(c_new)
        return h_new, c_new

    zeros = jnp.zeros((B, H), jnp.float32)

    def step(t, carry):
        h0, c0, h1, c1 = carry
        # Layer 0: input projection was precomputed; only the recurrent matmul is serial.
        g0 = xg_ref[t] + jnp.dot(h0.astype(jnp.bfloat16), whh0,
                                 preferred_element_type=jnp.float32)
        h0, c0 = gate_math(g0, c0)
        # Layer 1: fused input+recurrent matmul, (B, 2H) @ (2H, 4H).
        lhs1 = jnp.concatenate([h0, h1], axis=1).astype(jnp.bfloat16)
        g1 = b1 + jnp.dot(lhs1, w1, preferred_element_type=jnp.float32)
        h1, c1 = gate_math(g1, c1)
        return (h0, c0, h1, c1)

    # Full unroll (T is small & static): gives the scheduler cross-step visibility.
    _, _, h1, _ = lax.fori_loop(0, T, step, (zeros, zeros, zeros, zeros), unroll=True)

    # Final linear on the last-timestep hidden state of the top layer (lane-dense 128-wide).
    out_ref[...] = (jnp.dot(h1, wout_ref[...], preferred_element_type=jnp.float32)
                    + bout_ref[...])


def prep_params(params):
    """One-time parameter prep (outside the jitted forward):
    transpose, gate reorder [i,f,g,o]->[i,f,o,g], bias folding, layer-1 weight concat,
    bf16 cast of recurrent weights, zero-pad of the output head to 128 lanes."""
    (wih0, whh0, bih0, bhh0, wih1, whh1, bih1, bhh1, wout, bout) = params
    H = HIDDEN

    def reorder(w):   # last axis has 4H columns in blocks [i, f, g, o] -> [i, f, o, g]
        return jnp.concatenate([w[..., :2 * H], w[..., 3 * H:], w[..., 2 * H:3 * H]], axis=-1)

    w0x = reorder(wih0.T)                                  # (D, 4H)  f32 — used in wrapper matmul
    b0 = reorder((bih0 + bhh0)[None, :])                   # (1, 4H)  f32 — folded into input proj
    w0h = reorder(whh0.T).astype(jnp.bfloat16)             # (H, 4H)  bf16
    w1 = reorder(jnp.concatenate([wih1.T, whh1.T], axis=0)).astype(jnp.bfloat16)  # (2H, 4H)
    b1 = reorder((bih1 + bhh1)[None, :])                   # (1, 4H)  f32

    wout_p = jnp.zeros((H, OUT_PAD), jnp.float32).at[:, :OUT_DIM].set(wout.T)
    bout_p = jnp.zeros((1, OUT_PAD), jnp.float32).at[:, :OUT_DIM].set(bout[None, :])
    return (w0x, b0, w0h, w1, b1, wout_p, bout_p)


@jax.jit
def sentence_rnn_forward(x, prepped):
    """x: (B, T, D) batch-first, matching nn.LSTM(batch_first=True)."""
    w0x, b0, w0h, w1, b1, wout_p, bout_p = prepped
    B, T, D = x.shape

    x_tm = jnp.transpose(x, (1, 0, 2)).astype(jnp.float32)          # (T, B, D) time-major
    # Hoisted layer-0 input projection: one (T*B, D) @ (D, 4H) matmul, off the recurrence.
    xg = (x_tm.reshape(T * B, D) @ w0x + b0).reshape(T, B, 4 * HIDDEN)

    vmem = pl.BlockSpec(memory_space=pltpu.MemorySpace.VMEM)
    out_pad = pl.pallas_call(
        sentence_rnn_kernel,
        out_shape=jax.ShapeDtypeStruct((B, OUT_PAD), jnp.float32),
        in_specs=[vmem] * 6,
        out_specs=vmem,
    )(xg, w0h, w1, b1, wout_p, bout_p)

    return out_pad[:, :OUT_DIM]


def init_params(key, n_dim):
    """Deterministic PyTorch-style init: U(-k, k) with k = 1/sqrt(hidden)."""
    k = 1.0 / jnp.sqrt(jnp.float32(HIDDEN))
    keys = jax.random.split(key, 10)
    u = lambda kk, shape: jax.random.uniform(kk, shape, jnp.float32, -k, k)
    wih0 = u(keys[0], (4 * HIDDEN, n_dim))
    whh0 = u(keys[1], (4 * HIDDEN, HIDDEN))
    bih0 = u(keys[2], (4 * HIDDEN,))
    bhh0 = u(keys[3], (4 * HIDDEN,))
    wih1 = u(keys[4], (4 * HIDDEN, HIDDEN))
    whh1 = u(keys[5], (4 * HIDDEN, HIDDEN))
    bih1 = u(keys[6], (4 * HIDDEN,))
    bhh1 = u(keys[7], (4 * HIDDEN,))
    wout = u(keys[8], (OUT_DIM, HIDDEN))
    bout = u(keys[9], (OUT_DIM,))
    return (wih0, whh0, bih0, bhh0, wih1, whh1, bih1, bhh1, wout, bout)


def reference_forward(x, params):
    """Pure-JAX f32 reference replicating nn.LSTM(num_layers=2, batch_first=True) + Linear,
    with PyTorch's native [i, f, g, o] gate order."""
    (wih0, whh0, bih0, bhh0, wih1, whh1, bih1, bhh1, wout, bout) = params
    B, T, D = x.shape
    H = HIDDEN

    def cell(x_t, h, c, wih, whh, bih, bhh):
        g = x_t @ wih.T + bih + h @ whh.T + bhh
        i = jax.nn.sigmoid(g[:, 0 * H:1 * H])
        f = jax.nn.sigmoid(g[:, 1 * H:2 * H])
        gg = jnp.tanh(g[:, 2 * H:3 * H])
        o = jax.nn.sigmoid(g[:, 3 * H:4 * H])
        c = f * c + i * gg
        h = o * jnp.tanh(c)
        return h, c

    def scan_fn(carry, x_t):
        h0, c0, h1, c1 = carry
        h0, c0 = cell(x_t, h0, c0, wih0, whh0, bih0, bhh0)
        h1, c1 = cell(h0, h1, c1, wih1, whh1, bih1, bhh1)
        return (h0, c0, h1, c1), h1

    z = jnp.zeros((B, H), jnp.float32)
    (_, _, h1, _), _ = lax.scan(scan_fn, (z, z, z, z), jnp.transpose(x, (1, 0, 2)))
    return h1 @ wout.T + bout


if __name__ == "__main__":
    key = jax.random.PRNGKey(0)
    k_x, k_p = jax.random.split(key)

    B, T, n_dim = 2, 8, 32          # small shapes consistent with forward(x): x is (B, T, n_dim)
    x = jax.random.normal(k_x, (B, T, n_dim), jnp.float32)
    params = init_params(k_p, n_dim)

    prepped = prep_params(params)   # one-time weight prep outside the jitted forward
    out = sentence_rnn_forward(x, prepped)
    out = jax.block_until_ready(out)

    ref = reference_forward(x, params)
    assert out.shape == (B, OUT_DIM)
    # Tolerance relaxed from 1e-4: the recurrent-path matmuls use bf16 operands
    # (f32 accumulation and f32 carried state keep the error at the few-1e-4 level).
    assert jnp.allclose(out, ref, atol=5e-3, rtol=5e-3), "Pallas kernel mismatch vs reference"

    print("KERNEL_OK")
</pallas_src>

<mosaic_0001>
module attributes {stable_mosaic.version = 11 : i64} {
  func.func @sentence_rnn_kernel(%arg0: memref<8x2x512xf32, #tpu.memory_space<vmem>>, %arg1: memref<128x512xbf16, #tpu.memory_space<vmem>>, %arg2: memref<256x512xbf16, #tpu.memory_space<vmem>>, %arg3: memref<1x512xf32, #tpu.memory_space<vmem>>, %arg4: memref<128x128xf32, #tpu.memory_space<vmem>>, %arg5: memref<1x128xf32, #tpu.memory_space<vmem>>, %arg6: memref<2x128xf32, #tpu.memory_space<vmem>>) attributes {dimension_semantics = [], scalar_prefetch = 0 : i64, scratch_operands = 0 : i64, tpu.core_type = #tpu.core_type<tc>} {
    %c0 = arith.constant 0 : index
    %c0_0 = arith.constant 0 : index
    %0 = vector.load %arg1[%c0, %c0_0] : memref<128x512xbf16, #tpu.memory_space<vmem>>, vector<128x512xbf16>
    %c0_1 = arith.constant 0 : index
    %c0_2 = arith.constant 0 : index
    %1 = vector.load %arg2[%c0_1, %c0_2] : memref<256x512xbf16, #tpu.memory_space<vmem>>, vector<256x512xbf16>
    %c0_3 = arith.constant 0 : index
    %c0_4 = arith.constant 0 : index
    %2 = vector.load %arg3[%c0_3, %c0_4] : memref<1x512xf32, #tpu.memory_space<vmem>>, vector<1x512xf32>
    %3 = vector.shape_cast %2 : vector<1x512xf32> to vector<1x512xf32>
    %4 = vector.broadcast %3 : vector<1x512xf32> to vector<2x512xf32>
    %cst = arith.constant 0.000000e+00 : f32
    %5 = vector.broadcast %cst : f32 to vector<2x128xf32>
    %c0_i32 = arith.constant 0 : i32
    %6 = arith.index_cast %c0_i32 : i32 to index
    %c0_5 = arith.constant 0 : index
    %c0_6 = arith.constant 0 : index
    %7 = vector.load %arg0[%6, %c0_5, %c0_6] : memref<8x2x512xf32, #tpu.memory_space<vmem>>, vector<1x2x512xf32>
    %8 = vector.shape_cast %7 : vector<1x2x512xf32> to vector<2x512xf32>
    %9 = arith.truncf %5 : vector<2x128xf32> to vector<2x128xbf16>
    %cst_7 = arith.constant dense<0.000000e+00> : vector<2x512xf32>
    %10 = tpu.matmul %9, %0, %cst_7 {dimension_numbers = #tpu.dot_dimension_numbers<[1], [0], [0], [1], [0, 0, 1, 1], [], []>} : vector<2x128xbf16>, vector<128x512xbf16>, vector<2x512xf32> -> vector<2x512xf32>
    %11 = arith.addf %8, %10 : vector<2x512xf32>
    %12 = vector.extract_strided_slice %11 {offsets = [0, 0], sizes = [2, 384], strides = [1, 1]} : vector<2x512xf32> to vector<2x384xf32>
    %13 = arith.negf %12 : vector<2x384xf32>
    %14 = math.exp %13 : vector<2x384xf32>
    %cst_8 = arith.constant 1.000000e+00 : f32
    %15 = vector.broadcast %cst_8 : f32 to vector<2x384xf32>
    %16 = arith.addf %15, %14 : vector<2x384xf32>
    %17 = arith.divf %15, %16 : vector<2x384xf32>
    %18 = vector.extract_strided_slice %11 {offsets = [0, 384], sizes = [2, 128], strides = [1, 1]} : vector<2x512xf32> to vector<2x128xf32>
    %19 = math.tanh %18 : vector<2x128xf32>
    %20 = vector.extract_strided_slice %17 {offsets = [0, 0], sizes = [2, 128], strides = [1, 1]} : vector<2x384xf32> to vector<2x128xf32>
    %21 = vector.extract_strided_slice %17 {offsets = [0, 128], sizes = [2, 128], strides = [1, 1]} : vector<2x384xf32> to vector<2x128xf32>
    %22 = vector.extract_strided_slice %17 {offsets = [0, 256], sizes = [2, 128], strides = [1, 1]} : vector<2x384xf32> to vector<2x128xf32>
    %23 = arith.mulf %21, %5 : vector<2x128xf32>
    %24 = arith.mulf %20, %19 : vector<2x128xf32>
    %25 = arith.addf %23, %24 : vector<2x128xf32>
    %26 = math.tanh %25 : vector<2x128xf32>
    %27 = arith.mulf %22, %26 : vector<2x128xf32>
    %28 = tpu.concatenate %27, %5 in 1 : vector<2x128xf32>, vector<2x128xf32> -> vector<2x256xf32>
    %29 = arith.truncf %28 : vector<2x256xf32> to vector<2x256xbf16>
    %cst_9 = arith.constant dense<0.000000e+00> : vector<2x512xf32>
    %30 = tpu.matmul %29, %1, %cst_9 {dimension_numbers = #tpu.dot_dimension_numbers<[1], [0], [0], [1], [0, 0, 1, 1], [], []>} : vector<2x256xbf16>, vector<256x512xbf16>, vector<2x512xf32> -> vector<2x512xf32>
    %31 = arith.addf %4, %30 : vector<2x512xf32>
    %32 = vector.extract_strided_slice %31 {offsets = [0, 0], sizes = [2, 384], strides = [1, 1]} : vector<2x512xf32> to vector<2x384xf32>
    %33 = arith.negf %32 : vector<2x384xf32>
    %34 = math.exp %33 : vector<2x384xf32>
    %cst_10 = arith.constant 1.000000e+00 : f32
    %35 = vector.broadcast %cst_10 : f32 to vector<2x384xf32>
    %36 = arith.addf %35, %34 : vector<2x384xf32>
    %37 = arith.divf %35, %36 : vector<2x384xf32>
    %38 = vector.extract_strided_slice %31 {offsets = [0, 384], sizes = [2, 128], strides = [1, 1]} : vector<2x512xf32> to vector<2x128xf32>
    %39 = math.tanh %38 : vector<2x128xf32>
    %40 = vector.extract_strided_slice %37 {offsets = [0, 0], sizes = [2, 128], strides = [1, 1]} : vector<2x384xf32> to vector<2x128xf32>
    %41 = vector.extract_strided_slice %37 {offsets = [0, 128], sizes = [2, 128], strides = [1, 1]} : vector<2x384xf32> to vector<2x128xf32>
    %42 = vector.extract_strided_slice %37 {offsets = [0, 256], sizes = [2, 128], strides = [1, 1]} : vector<2x384xf32> to vector<2x128xf32>
    %43 = arith.mulf %41, %5 : vector<2x128xf32>
    %44 = arith.mulf %40, %39 : vector<2x128xf32>
    %45 = arith.addf %43, %44 : vector<2x128xf32>
    %46 = math.tanh %45 : vector<2x128xf32>
    %47 = arith.mulf %42, %46 : vector<2x128xf32>
    %c1_i32 = arith.constant 1 : i32
    %48 = arith.index_cast %c1_i32 : i32 to index
    %c0_11 = arith.constant 0 : index
    %c0_12 = arith.constant 0 : index
    %49 = vector.load %arg0[%48, %c0_11, %c0_12] : memref<8x2x512xf32, #tpu.memory_space<vmem>>, vector<1x2x512xf32>
    %50 = vector.shape_cast %49 : vector<1x2x512xf32> to vector<2x512xf32>
    %51 = arith.truncf %27 : vector<2x128xf32> to vector<2x128xbf16>
    %cst_13 = arith.constant dense<0.000000e+00> : vector<2x512xf32>
    %52 = tpu.matmul %51, %0, %cst_13 {dimension_numbers = #tpu.dot_dimension_numbers<[1], [0], [0], [1], [0, 0, 1, 1], [], []>} : vector<2x128xbf16>, vector<128x512xbf16>, vector<2x512xf32> -> vector<2x512xf32>
    %53 = arith.addf %50, %52 : vector<2x512xf32>
    %54 = vector.extract_strided_slice %53 {offsets = [0, 0], sizes = [2, 384], strides = [1, 1]} : vector<2x512xf32> to vector<2x384xf32>
    %55 = arith.negf %54 : vector<2x384xf32>
    %56 = math.exp %55 : vector<2x384xf32>
    %cst_14 = arith.constant 1.000000e+00 : f32
    %57 = vector.broadcast %cst_14 : f32 to vector<2x384xf32>
    %58 = arith.addf %57, %56 : vector<2x384xf32>
    %59 = arith.divf %57, %58 : vector<2x384xf32>
    %60 = vector.extract_strided_slice %53 {offsets = [0, 384], sizes = [2, 128], strides = [1, 1]} : vector<2x512xf32> to vector<2x128xf32>
    %61 = math.tanh %60 : vector<2x128xf32>
    %62 = vector.extract_strided_slice %59 {offsets = [0, 0], sizes = [2, 128], strides = [1, 1]} : vector<2x384xf32> to vector<2x128xf32>
    %63 = vector.extract_strided_slice %59 {offsets = [0, 128], sizes = [2, 128], strides = [1, 1]} : vector<2x384xf32> to vector<2x128xf32>
    %64 = vector.extract_strided_slice %59 {offsets = [0, 256], sizes = [2, 128], strides = [1, 1]} : vector<2x384xf32> to vector<2x128xf32>
    %65 = arith.mulf %63, %25 : vector<2x128xf32>
    %66 = arith.mulf %62, %61 : vector<2x128xf32>
    %67 = arith.addf %65, %66 : vector<2x128xf32>
    %68 = math.tanh %67 : vector<2x128xf32>
    %69 = arith.mulf %64, %68 : vector<2x128xf32>
    %70 = tpu.concatenate %69, %47 in 1 : vector<2x128xf32>, vector<2x128xf32> -> vector<2x256xf32>
    %71 = arith.truncf %70 : vector<2x256xf32> to vector<2x256xbf16>
    %cst_15 = arith.constant dense<0.000000e+00> : vector<2x512xf32>
    %72 = tpu.matmul %71, %1, %cst_15 {dimension_numbers = #tpu.dot_dimension_numbers<[1], [0], [0], [1], [0, 0, 1, 1], [], []>} : vector<2x256xbf16>, vector<256x512xbf16>, vector<2x512xf32> -> vector<2x512xf32>
    %73 = arith.addf %4, %72 : vector<2x512xf32>
    %74 = vector.extract_strided_slice %73 {offsets = [0, 0], sizes = [2, 384], strides = [1, 1]} : vector<2x512xf32> to vector<2x384xf32>
    %75 = arith.negf %74 : vector<2x384xf32>
    %76 = math.exp %75 : vector<2x384xf32>
    %cst_16 = arith.constant 1.000000e+00 : f32
    %77 = vector.broadcast %cst_16 : f32 to vector<2x384xf32>
    %78 = arith.addf %77, %76 : vector<2x384xf32>
    %79 = arith.divf %77, %78 : vector<2x384xf32>
    %80 = vector.extract_strided_slice %73 {offsets = [0, 384], sizes = [2, 128], strides = [1, 1]} : vector<2x512xf32> to vector<2x128xf32>
    %81 = math.tanh %80 : vector<2x128xf32>
    %82 = vector.extract_strided_slice %79 {offsets = [0, 0], sizes = [2, 128], strides = [1, 1]} : vector<2x384xf32> to vector<2x128xf32>
    %83 = vector.extract_strided_slice %79 {offsets = [0, 128], sizes = [2, 128], strides = [1, 1]} : vector<2x384xf32> to vector<2x128xf32>
    %84 = vector.extract_strided_slice %79 {offsets = [0, 256], sizes = [2, 128], strides = [1, 1]} : vector<2x384xf32> to vector<2x128xf32>
    %85 = arith.mulf %83, %45 : vector<2x128xf32>
    %86 = arith.mulf %82, %81 : vector<2x128xf32>
    %87 = arith.addf %85, %86 : vector<2x128xf32>
    %88 = math.tanh %87 : vector<2x128xf32>
    %89 = arith.mulf %84, %88 : vector<2x128xf32>
    %c2_i32 = arith.constant 2 : i32
    %90 = arith.index_cast %c2_i32 : i32 to index
    %c0_17 = arith.constant 0 : index
    %c0_18 = arith.constant 0 : index
    %91 = vector.load %arg0[%90, %c0_17, %c0_18] : memref<8x2x512xf32, #tpu.memory_space<vmem>>, vector<1x2x512xf32>
    %92 = vector.shape_cast %91 : vector<1x2x512xf32> to vector<2x512xf32>
    %93 = arith.truncf %69 : vector<2x128xf32> to vector<2x128xbf16>
    %cst_19 = arith.constant dense<0.000000e+00> : vector<2x512xf32>
    %94 = tpu.matmul %93, %0, %cst_19 {dimension_numbers = #tpu.dot_dimension_numbers<[1], [0], [0], [1], [0, 0, 1, 1], [], []>} : vector<2x128xbf16>, vector<128x512xbf16>, vector<2x512xf32> -> vector<2x512xf32>
    %95 = arith.addf %92, %94 : vector<2x512xf32>
    %96 = vector.extract_strided_slice %95 {offsets = [0, 0], sizes = [2, 384], strides = [1, 1]} : vector<2x512xf32> to vector<2x384xf32>
    %97 = arith.negf %96 : vector<2x384xf32>
    %98 = math.exp %97 : vector<2x384xf32>
    %cst_20 = arith.constant 1.000000e+00 : f32
    %99 = vector.broadcast %cst_20 : f32 to vector<2x384xf32>
    %100 = arith.addf %99, %98 : vector<2x384xf32>
    %101 = arith.divf %99, %100 : vector<2x384xf32>
    %102 = vector.extract_strided_slice %95 {offsets = [0, 384], sizes = [2, 128], strides = [1, 1]} : vector<2x512xf32> to vector<2x128xf32>
    %103 = math.tanh %102 : vector<2x128xf32>
    %104 = vector.extract_strided_slice %101 {offsets = [0, 0], sizes = [2, 128], strides = [1, 1]} : vector<2x384xf32> to vector<2x128xf32>
    %105 = vector.extract_strided_slice %101 {offsets = [0, 128], sizes = [2, 128], strides = [1, 1]} : vector<2x384xf32> to vector<2x128xf32>
    %106 = vector.extract_strided_slice %101 {offsets = [0, 256], sizes = [2, 128], strides = [1, 1]} : vector<2x384xf32> to vector<2x128xf32>
    %107 = arith.mulf %105, %67 : vector<2x128xf32>
    %108 = arith.mulf %104, %103 : vector<2x128xf32>
    %109 = arith.addf %107, %108 : vector<2x128xf32>
    %110 = math.tanh %109 : vector<2x128xf32>
    %111 = arith.mulf %106, %110 : vector<2x128xf32>
    %112 = tpu.concatenate %111, %89 in 1 : vector<2x128xf32>, vector<2x128xf32> -> vector<2x256xf32>
    %113 = arith.truncf %112 : vector<2x256xf32> to vector<2x256xbf16>
    %cst_21 = arith.constant dense<0.000000e+00> : vector<2x512xf32>
    %114 = tpu.matmul %113, %1, %cst_21 {dimension_numbers = #tpu.dot_dimension_numbers<[1], [0], [0], [1], [0, 0, 1, 1], [], []>} : vector<2x256xbf16>, vector<256x512xbf16>, vector<2x512xf32> -> vector<2x512xf32>
    %115 = arith.addf %4, %114 : vector<2x512xf32>
    %116 = vector.extract_strided_slice %115 {offsets = [0, 0], sizes = [2, 384], strides = [1, 1]} : vector<2x512xf32> to vector<2x384xf32>
    %117 = arith.negf %116 : vector<2x384xf32>
    %118 = math.exp %117 : vector<2x384xf32>
    %cst_22 = arith.constant 1.000000e+00 : f32
    %119 = vector.broadcast %cst_22 : f32 to vector<2x384xf32>
    %120 = arith.addf %119, %118 : vector<2x384xf32>
    %121 = arith.divf %119, %120 : vector<2x384xf32>
    %122 = vector.extract_strided_slice %115 {offsets = [0, 384], sizes = [2, 128], strides = [1, 1]} : vector<2x512xf32> to vector<2x128xf32>
    %123 = math.tanh %122 : vector<2x128xf32>
    %124 = vector.extract_strided_slice %121 {offsets = [0, 0], sizes = [2, 128], strides = [1, 1]} : vector<2x384xf32> to vector<2x128xf32>
    %125 = vector.extract_strided_slice %121 {offsets = [0, 128], sizes = [2, 128], strides = [1, 1]} : vector<2x384xf32> to vector<2x128xf32>
    %126 = vector.extract_strided_slice %121 {offsets = [0, 256], sizes = [2, 128], strides = [1, 1]} : vector<2x384xf32> to vector<2x128xf32>
    %127 = arith.mulf %125, %87 : vector<2x128xf32>
    %128 = arith.mulf %124, %123 : vector<2x128xf32>
    %129 = arith.addf %127, %128 : vector<2x128xf32>
    %130 = math.tanh %129 : vector<2x128xf32>
    %131 = arith.mulf %126, %130 : vector<2x128xf32>
    %c3_i32 = arith.constant 3 : i32
    %132 = arith.index_cast %c3_i32 : i32 to index
    %c0_23 = arith.constant 0 : index
    %c0_24 = arith.constant 0 : index
    %133 = vector.load %arg0[%132, %c0_23, %c0_24] : memref<8x2x512xf32, #tpu.memory_space<vmem>>, vector<1x2x512xf32>
    %134 = vector.shape_cast %133 : vector<1x2x512xf32> to vector<2x512xf32>
    %135 = arith.truncf %111 : vector<2x128xf32> to vector<2x128xbf16>
    %cst_25 = arith.constant dense<0.000000e+00> : vector<2x512xf32>
    %136 = tpu.matmul %135, %0, %cst_25 {dimension_numbers = #tpu.dot_dimension_numbers<[1], [0], [0], [1], [0, 0, 1, 1], [], []>} : vector<2x128xbf16>, vector<128x512xbf16>, vector<2x512xf32> -> vector<2x512xf32>
    %137 = arith.addf %134, %136 : vector<2x512xf32>
    %138 = vector.extract_strided_slice %137 {offsets = [0, 0], sizes = [2, 384], strides = [1, 1]} : vector<2x512xf32> to vector<2x384xf32>
    %139 = arith.negf %138 : vector<2x384xf32>
    %140 = math.exp %139 : vector<2x384xf32>
    %cst_26 = arith.constant 1.000000e+00 : f32
    %141 = vector.broadcast %cst_26 : f32 to vector<2x384xf32>
    %142 = arith.addf %141, %140 : vector<2x384xf32>
    %143 = arith.divf %141, %142 : vector<2x384xf32>
    %144 = vector.extract_strided_slice %137 {offsets = [0, 384], sizes = [2, 128], strides = [1, 1]} : vector<2x512xf32> to vector<2x128xf32>
    %145 = math.tanh %144 : vector<2x128xf32>
    %146 = vector.extract_strided_slice %143 {offsets = [0, 0], sizes = [2, 128], strides = [1, 1]} : vector<2x384xf32> to vector<2x128xf32>
    %147 = vector.extract_strided_slice %143 {offsets = [0, 128], sizes = [2, 128], strides = [1, 1]} : vector<2x384xf32> to vector<2x128xf32>
    %148 = vector.extract_strided_slice %143 {offsets = [0, 256], sizes = [2, 128], strides = [1, 1]} : vector<2x384xf32> to vector<2x128xf32>
    %149 = arith.mulf %147, %109 : vector<2x128xf32>
    %150 = arith.mulf %146, %145 : vector<2x128xf32>
    %151 = arith.addf %149, %150 : vector<2x128xf32>
    %152 = math.tanh %151 : vector<2x128xf32>
    %153 = arith.mulf %148, %152 : vector<2x128xf32>
    %154 = tpu.concatenate %153, %131 in 1 : vector<2x128xf32>, vector<2x128xf32> -> vector<2x256xf32>
    %155 = arith.truncf %154 : vector<2x256xf32> to vector<2x256xbf16>
    %cst_27 = arith.constant dense<0.000000e+00> : vector<2x512xf32>
    %156 = tpu.matmul %155, %1, %cst_27 {dimension_numbers = #tpu.dot_dimension_numbers<[1], [0], [0], [1], [0, 0, 1, 1], [], []>} : vector<2x256xbf16>, vector<256x512xbf16>, vector<2x512xf32> -> vector<2x512xf32>
    %157 = arith.addf %4, %156 : vector<2x512xf32>
    %158 = vector.extract_strided_slice %157 {offsets = [0, 0], sizes = [2, 384], strides = [1, 1]} : vector<2x512xf32> to vector<2x384xf32>
    %159 = arith.negf %158 : vector<2x384xf32>
    %160 = math.exp %159 : vector<2x384xf32>
    %cst_28 = arith.constant 1.000000e+00 : f32
    %161 = vector.broadcast %cst_28 : f32 to vector<2x384xf32>
    %162 = arith.addf %161, %160 : vector<2x384xf32>
    %163 = arith.divf %161, %162 : vector<2x384xf32>
    %164 = vector.extract_strided_slice %157 {offsets = [0, 384], sizes = [2, 128], strides = [1, 1]} : vector<2x512xf32> to vector<2x128xf32>
    %165 = math.tanh %164 : vector<2x128xf32>
    %166 = vector.extract_strided_slice %163 {offsets = [0, 0], sizes = [2, 128], strides = [1, 1]} : vector<2x384xf32> to vector<2x128xf32>
    %167 = vector.extract_strided_slice %163 {offsets = [0, 128], sizes = [2, 128], strides = [1, 1]} : vector<2x384xf32> to vector<2x128xf32>
    %168 = vector.extract_strided_slice %163 {offsets = [0, 256], sizes = [2, 128], strides = [1, 1]} : vector<2x384xf32> to vector<2x128xf32>
    %169 = arith.mulf %167, %129 : vector<2x128xf32>
    %170 = arith.mulf %166, %165 : vector<2x128xf32>
    %171 = arith.addf %169, %170 : vector<2x128xf32>
    %172 = math.tanh %171 : vector<2x128xf32>
    %173 = arith.mulf %168, %172 : vector<2x128xf32>
    %c4_i32 = arith.constant 4 : i32
    %174 = arith.index_cast %c4_i32 : i32 to index
    %c0_29 = arith.constant 0 : index
    %c0_30 = arith.constant 0 : index
    %175 = vector.load %arg0[%174, %c0_29, %c0_30] : memref<8x2x512xf32, #tpu.memory_space<vmem>>, vector<1x2x512xf32>
    %176 = vector.shape_cast %175 : vector<1x2x512xf32> to vector<2x512xf32>
    %177 = arith.truncf %153 : vector<2x128xf32> to vector<2x128xbf16>
    %cst_31 = arith.constant dense<0.000000e+00> : vector<2x512xf32>
    %178 = tpu.matmul %177, %0, %cst_31 {dimension_numbers = #tpu.dot_dimension_numbers<[1], [0], [0], [1], [0, 0, 1, 1], [], []>} : vector<2x128xbf16>, vector<128x512xbf16>, vector<2x512xf32> -> vector<2x512xf32>
    %179 = arith.addf %176, %178 : vector<2x512xf32>
    %180 = vector.extract_strided_slice %179 {offsets = [0, 0], sizes = [2, 384], strides = [1, 1]} : vector<2x512xf32> to vector<2x384xf32>
    %181 = arith.negf %180 : vector<2x384xf32>
    %182 = math.exp %181 : vector<2x384xf32>
    %cst_32 = arith.constant 1.000000e+00 : f32
    %183 = vector.broadcast %cst_32 : f32 to vector<2x384xf32>
    %184 = arith.addf %183, %182 : vector<2x384xf32>
    %185 = arith.divf %183, %184 : vector<2x384xf32>
    %186 = vector.extract_strided_slice %179 {offsets = [0, 384], sizes = [2, 128], strides = [1, 1]} : vector<2x512xf32> to vector<2x128xf32>
    %187 = math.tanh %186 : vector<2x128xf32>
    %188 = vector.extract_strided_slice %185 {offsets = [0, 0], sizes = [2, 128], strides = [1, 1]} : vector<2x384xf32> to vector<2x128xf32>
    %189 = vector.extract_strided_slice %185 {offsets = [0, 128], sizes = [2, 128], strides = [1, 1]} : vector<2x384xf32> to vector<2x128xf32>
    %190 = vector.extract_strided_slice %185 {offsets = [0, 256], sizes = [2, 128], strides = [1, 1]} : vector<2x384xf32> to vector<2x128xf32>
    %191 = arith.mulf %189, %151 : vector<2x128xf32>
    %192 = arith.mulf %188, %187 : vector<2x128xf32>
    %193 = arith.addf %191, %192 : vector<2x128xf32>
    %194 = math.tanh %193 : vector<2x128xf32>
    %195 = arith.mulf %190, %194 : vector<2x128xf32>
    %196 = tpu.concatenate %195, %173 in 1 : vector<2x128xf32>, vector<2x128xf32> -> vector<2x256xf32>
    %197 = arith.truncf %196 : vector<2x256xf32> to vector<2x256xbf16>
    %cst_33 = arith.constant dense<0.000000e+00> : vector<2x512xf32>
    %198 = tpu.matmul %197, %1, %cst_33 {dimension_numbers = #tpu.dot_dimension_numbers<[1], [0], [0], [1], [0, 0, 1, 1], [], []>} : vector<2x256xbf16>, vector<256x512xbf16>, vector<2x512xf32> -> vector<2x512xf32>
    %199 = arith.addf %4, %198 : vector<2x512xf32>
    %200 = vector.extract_strided_slice %199 {offsets = [0, 0], sizes = [2, 384], strides = [1, 1]} : vector<2x512xf32> to vector<2x384xf32>
    %201 = arith.negf %200 : vector<2x384xf32>
    %202 = math.exp %201 : vector<2x384xf32>
    %cst_34 = arith.constant 1.000000e+00 : f32
    %203 = vector.broadcast %cst_34 : f32 to vector<2x384xf32>
    %204 = arith.addf %203, %202 : vector<2x384xf32>
    %205 = arith.divf %203, %204 : vector<2x384xf32>
    %206 = vector.extract_strided_slice %199 {offsets = [0, 384], sizes = [2, 128], strides = [1, 1]} : vector<2x512xf32> to vector<2x128xf32>
    %207 = math.tanh %206 : vector<2x128xf32>
    %208 = vector.extract_strided_slice %205 {offsets = [0, 0], sizes = [2, 128], strides = [1, 1]} : vector<2x384xf32> to vector<2x128xf32>
    %209 = vector.extract_strided_slice %205 {offsets = [0, 128], sizes = [2, 128], strides = [1, 1]} : vector<2x384xf32> to vector<2x128xf32>
    %210 = vector.extract_strided_slice %205 {offsets = [0, 256], sizes = [2, 128], strides = [1, 1]} : vector<2x384xf32> to vector<2x128xf32>
    %211 = arith.mulf %209, %171 : vector<2x128xf32>
    %212 = arith.mulf %208, %207 : vector<2x128xf32>
    %213 = arith.addf %211, %212 : vector<2x128xf32>
    %214 = math.tanh %213 : vector<2x128xf32>
    %215 = arith.mulf %210, %214 : vector<2x128xf32>
    %c5_i32 = arith.constant 5 : i32
    %216 = arith.index_cast %c5_i32 : i32 to index
    %c0_35 = arith.constant 0 : index
    %c0_36 = arith.constant 0 : index
    %217 = vector.load %arg0[%216, %c0_35, %c0_36] : memref<8x2x512xf32, #tpu.memory_space<vmem>>, vector<1x2x512xf32>
    %218 = vector.shape_cast %217 : vector<1x2x512xf32> to vector<2x512xf32>
    %219 = arith.truncf %195 : vector<2x128xf32> to vector<2x128xbf16>
    %cst_37 = arith.constant dense<0.000000e+00> : vector<2x512xf32>
    %220 = tpu.matmul %219, %0, %cst_37 {dimension_numbers = #tpu.dot_dimension_numbers<[1], [0], [0], [1], [0, 0, 1, 1], [], []>} : vector<2x128xbf16>, vector<128x512xbf16>, vector<2x512xf32> -> vector<2x512xf32>
    %221 = arith.addf %218, %220 : vector<2x512xf32>
    %222 = vector.extract_strided_slice %221 {offsets = [0, 0], sizes = [2, 384], strides = [1, 1]} : vector<2x512xf32> to vector<2x384xf32>
    %223 = arith.negf %222 : vector<2x384xf32>
    %224 = math.exp %223 : vector<2x384xf32>
    %cst_38 = arith.constant 1.000000e+00 : f32
    %225 = vector.broadcast %cst_38 : f32 to vector<2x384xf32>
    %226 = arith.addf %225, %224 : vector<2x384xf32>
    %227 = arith.divf %225, %226 : vector<2x384xf32>
    %228 = vector.extract_strided_slice %221 {offsets = [0, 384], sizes = [2, 128], strides = [1, 1]} : vector<2x512xf32> to vector<2x128xf32>
    %229 = math.tanh %228 : vector<2x128xf32>
    %230 = vector.extract_strided_slice %227 {offsets = [0, 0], sizes = [2, 128], strides = [1, 1]} : vector<2x384xf32> to vector<2x128xf32>
    %231 = vector.extract_strided_slice %227 {offsets = [0, 128], sizes = [2, 128], strides = [1, 1]} : vector<2x384xf32> to vector<2x128xf32>
    %232 = vector.extract_strided_slice %227 {offsets = [0, 256], sizes = [2, 128], strides = [1, 1]} : vector<2x384xf32> to vector<2x128xf32>
    %233 = arith.mulf %231, %193 : vector<2x128xf32>
    %234 = arith.mulf %230, %229 : vector<2x128xf32>
    %235 = arith.addf %233, %234 : vector<2x128xf32>
    %236 = math.tanh %235 : vector<2x128xf32>
    %237 = arith.mulf %232, %236 : vector<2x128xf32>
    %238 = tpu.concatenate %237, %215 in 1 : vector<2x128xf32>, vector<2x128xf32> -> vector<2x256xf32>
    %239 = arith.truncf %238 : vector<2x256xf32> to vector<2x256xbf16>
    %cst_39 = arith.constant dense<0.000000e+00> : vector<2x512xf32>
    %240 = tpu.matmul %239, %1, %cst_39 {dimension_numbers = #tpu.dot_dimension_numbers<[1], [0], [0], [1], [0, 0, 1, 1], [], []>} : vector<2x256xbf16>, vector<256x512xbf16>, vector<2x512xf32> -> vector<2x512xf32>
    %241 = arith.addf %4, %240 : vector<2x512xf32>
    %242 = vector.extract_strided_slice %241 {offsets = [0, 0], sizes = [2, 384], strides = [1, 1]} : vector<2x512xf32> to vector<2x384xf32>
    %243 = arith.negf %242 : vector<2x384xf32>
    %244 = math.exp %243 : vector<2x384xf32>
    %cst_40 = arith.constant 1.000000e+00 : f32
    %245 = vector.broadcast %cst_40 : f32 to vector<2x384xf32>
    %246 = arith.addf %245, %244 : vector<2x384xf32>
    %247 = arith.divf %245, %246 : vector<2x384xf32>
    %248 = vector.extract_strided_slice %241 {offsets = [0, 384], sizes = [2, 128], strides = [1, 1]} : vector<2x512xf32> to vector<2x128xf32>
    %249 = math.tanh %248 : vector<2x128xf32>
    %250 = vector.extract_strided_slice %247 {offsets = [0, 0], sizes = [2, 128], strides = [1, 1]} : vector<2x384xf32> to vector<2x128xf32>
    %251 = vector.extract_strided_slice %247 {offsets = [0, 128], sizes = [2, 128], strides = [1, 1]} : vector<2x384xf32> to vector<2x128xf32>
    %252 = vector.extract_strided_slice %247 {offsets = [0, 256], sizes = [2, 128], strides = [1, 1]} : vector<2x384xf32> to vector<2x128xf32>
    %253 = arith.mulf %251, %213 : vector<2x128xf32>
    %254 = arith.mulf %250, %249 : vector<2x128xf32>
    %255 = arith.addf %253, %254 : vector<2x128xf32>
    %256 = math.tanh %255 : vector<2x128xf32>
    %257 = arith.mulf %252, %256 : vector<2x128xf32>
    %c6_i32 = arith.constant 6 : i32
    %258 = arith.index_cast %c6_i32 : i32 to index
    %c0_41 = arith.constant 0 : index
    %c0_42 = arith.constant 0 : index
    %259 = vector.load %arg0[%258, %c0_41, %c0_42] : memref<8x2x512xf32, #tpu.memory_space<vmem>>, vector<1x2x512xf32>
    %260 = vector.shape_cast %259 : vector<1x2x512xf32> to vector<2x512xf32>
    %261 = arith.truncf %237 : vector<2x128xf32> to vector<2x128xbf16>
    %cst_43 = arith.constant dense<0.000000e+00> : vector<2x512xf32>
    %262 = tpu.matmul %261, %0, %cst_43 {dimension_numbers = #tpu.dot_dimension_numbers<[1], [0], [0], [1], [0, 0, 1, 1], [], []>} : vector<2x128xbf16>, vector<128x512xbf16>, vector<2x512xf32> -> vector<2x512xf32>
    %263 = arith.addf %260, %262 : vector<2x512xf32>
    %264 = vector.extract_strided_slice %263 {offsets = [0, 0], sizes = [2, 384], strides = [1, 1]} : vector<2x512xf32> to vector<2x384xf32>
    %265 = arith.negf %264 : vector<2x384xf32>
    %266 = math.exp %265 : vector<2x384xf32>
    %cst_44 = arith.constant 1.000000e+00 : f32
    %267 = vector.broadcast %cst_44 : f32 to vector<2x384xf32>
    %268 = arith.addf %267, %266 : vector<2x384xf32>
    %269 = arith.divf %267, %268 : vector<2x384xf32>
    %270 = vector.extract_strided_slice %263 {offsets = [0, 384], sizes = [2, 128], strides = [1, 1]} : vector<2x512xf32> to vector<2x128xf32>
    %271 = math.tanh %270 : vector<2x128xf32>
    %272 = vector.extract_strided_slice %269 {offsets = [0, 0], sizes = [2, 128], strides = [1, 1]} : vector<2x384xf32> to vector<2x128xf32>
    %273 = vector.extract_strided_slice %269 {offsets = [0, 128], sizes = [2, 128], strides = [1, 1]} : vector<2x384xf32> to vector<2x128xf32>
    %274 = vector.extract_strided_slice %269 {offsets = [0, 256], sizes = [2, 128], strides = [1, 1]} : vector<2x384xf32> to vector<2x128xf32>
    %275 = arith.mulf %273, %235 : vector<2x128xf32>
    %276 = arith.mulf %272, %271 : vector<2x128xf32>
    %277 = arith.addf %275, %276 : vector<2x128xf32>
    %278 = math.tanh %277 : vector<2x128xf32>
    %279 = arith.mulf %274, %278 : vector<2x128xf32>
    %280 = tpu.concatenate %279, %257 in 1 : vector<2x128xf32>, vector<2x128xf32> -> vector<2x256xf32>
    %281 = arith.truncf %280 : vector<2x256xf32> to vector<2x256xbf16>
    %cst_45 = arith.constant dense<0.000000e+00> : vector<2x512xf32>
    %282 = tpu.matmul %281, %1, %cst_45 {dimension_numbers = #tpu.dot_dimension_numbers<[1], [0], [0], [1], [0, 0, 1, 1], [], []>} : vector<2x256xbf16>, vector<256x512xbf16>, vector<2x512xf32> -> vector<2x512xf32>
    %283 = arith.addf %4, %282 : vector<2x512xf32>
    %284 = vector.extract_strided_slice %283 {offsets = [0, 0], sizes = [2, 384], strides = [1, 1]} : vector<2x512xf32> to vector<2x384xf32>
    %285 = arith.negf %284 : vector<2x384xf32>
    %286 = math.exp %285 : vector<2x384xf32>
    %cst_46 = arith.constant 1.000000e+00 : f32
    %287 = vector.broadcast %cst_46 : f32 to vector<2x384xf32>
    %288 = arith.addf %287, %286 : vector<2x384xf32>
    %289 = arith.divf %287, %288 : vector<2x384xf32>
    %290 = vector.extract_strided_slice %283 {offsets = [0, 384], sizes = [2, 128], strides = [1, 1]} : vector<2x512xf32> to vector<2x128xf32>
    %291 = math.tanh %290 : vector<2x128xf32>
    %292 = vector.extract_strided_slice %289 {offsets = [0, 0], sizes = [2, 128], strides = [1, 1]} : vector<2x384xf32> to vector<2x128xf32>
    %293 = vector.extract_strided_slice %289 {offsets = [0, 128], sizes = [2, 128], strides = [1, 1]} : vector<2x384xf32> to vector<2x128xf32>
    %294 = vector.extract_strided_slice %289 {offsets = [0, 256], sizes = [2, 128], strides = [1, 1]} : vector<2x384xf32> to vector<2x128xf32>
    %295 = arith.mulf %293, %255 : vector<2x128xf32>
    %296 = arith.mulf %292, %291 : vector<2x128xf32>
    %297 = arith.addf %295, %296 : vector<2x128xf32>
    %298 = math.tanh %297 : vector<2x128xf32>
    %299 = arith.mulf %294, %298 : vector<2x128xf32>
    %c7_i32 = arith.constant 7 : i32
    %300 = arith.index_cast %c7_i32 : i32 to index
    %c0_47 = arith.constant 0 : index
    %c0_48 = arith.constant 0 : index
    %301 = vector.load %arg0[%300, %c0_47, %c0_48] : memref<8x2x512xf32, #tpu.memory_space<vmem>>, vector<1x2x512xf32>
    %302 = vector.shape_cast %301 : vector<1x2x512xf32> to vector<2x512xf32>
    %303 = arith.truncf %279 : vector<2x128xf32> to vector<2x128xbf16>
    %cst_49 = arith.constant dense<0.000000e+00> : vector<2x512xf32>
    %304 = tpu.matmul %303, %0, %cst_49 {dimension_numbers = #tpu.dot_dimension_numbers<[1], [0], [0], [1], [0, 0, 1, 1], [], []>} : vector<2x128xbf16>, vector<128x512xbf16>, vector<2x512xf32> -> vector<2x512xf32>
    %305 = arith.addf %302, %304 : vector<2x512xf32>
    %306 = vector.extract_strided_slice %305 {offsets = [0, 0], sizes = [2, 384], strides = [1, 1]} : vector<2x512xf32> to vector<2x384xf32>
    %307 = arith.negf %306 : vector<2x384xf32>
    %308 = math.exp %307 : vector<2x384xf32>
    %cst_50 = arith.constant 1.000000e+00 : f32
    %309 = vector.broadcast %cst_50 : f32 to vector<2x384xf32>
    %310 = arith.addf %309, %308 : vector<2x384xf32>
    %311 = arith.divf %309, %310 : vector<2x384xf32>
    %312 = vector.extract_strided_slice %305 {offsets = [0, 384], sizes = [2, 128], strides = [1, 1]} : vector<2x512xf32> to vector<2x128xf32>
    %313 = math.tanh %312 : vector<2x128xf32>
    %314 = vector.extract_strided_slice %311 {offsets = [0, 0], sizes = [2, 128], strides = [1, 1]} : vector<2x384xf32> to vector<2x128xf32>
    %315 = vector.extract_strided_slice %311 {offsets = [0, 128], sizes = [2, 128], strides = [1, 1]} : vector<2x384xf32> to vector<2x128xf32>
    %316 = vector.extract_strided_slice %311 {offsets = [0, 256], sizes = [2, 128], strides = [1, 1]} : vector<2x384xf32> to vector<2x128xf32>
    %317 = arith.mulf %315, %277 : vector<2x128xf32>
    %318 = arith.mulf %314, %313 : vector<2x128xf32>
    %319 = arith.addf %317, %318 : vector<2x128xf32>
    %320 = math.tanh %319 : vector<2x128xf32>
    %321 = arith.mulf %316, %320 : vector<2x128xf32>
    %322 = tpu.concatenate %321, %299 in 1 : vector<2x128xf32>, vector<2x128xf32> -> vector<2x256xf32>
    %323 = arith.truncf %322 : vector<2x256xf32> to vector<2x256xbf16>
    %cst_51 = arith.constant dense<0.000000e+00> : vector<2x512xf32>
    %324 = tpu.matmul %323, %1, %cst_51 {dimension_numbers = #tpu.dot_dimension_numbers<[1], [0], [0], [1], [0, 0, 1, 1], [], []>} : vector<2x256xbf16>, vector<256x512xbf16>, vector<2x512xf32> -> vector<2x512xf32>
    %325 = arith.addf %4, %324 : vector<2x512xf32>
    %326 = vector.extract_strided_slice %325 {offsets = [0, 0], sizes = [2, 384], strides = [1, 1]} : vector<2x512xf32> to vector<2x384xf32>
    %327 = arith.negf %326 : vector<2x384xf32>
    %328 = math.exp %327 : vector<2x384xf32>
    %cst_52 = arith.constant 1.000000e+00 : f32
    %329 = vector.broadcast %cst_52 : f32 to vector<2x384xf32>
    %330 = arith.addf %329, %328 : vector<2x384xf32>
    %331 = arith.divf %329, %330 : vector<2x384xf32>
    %332 = vector.extract_strided_slice %325 {offsets = [0, 384], sizes = [2, 128], strides = [1, 1]} : vector<2x512xf32> to vector<2x128xf32>
    %333 = math.tanh %332 : vector<2x128xf32>
    %334 = vector.extract_strided_slice %331 {offsets = [0, 0], sizes = [2, 128], strides = [1, 1]} : vector<2x384xf32> to vector<2x128xf32>
    %335 = vector.extract_strided_slice %331 {offsets = [0, 128], sizes = [2, 128], strides = [1, 1]} : vector<2x384xf32> to vector<2x128xf32>
    %336 = vector.extract_strided_slice %331 {offsets = [0, 256], sizes = [2, 128], strides = [1, 1]} : vector<2x384xf32> to vector<2x128xf32>
    %337 = arith.mulf %335, %297 : vector<2x128xf32>
    %338 = arith.mulf %334, %333 : vector<2x128xf32>
    %339 = arith.addf %337, %338 : vector<2x128xf32>
    %340 = math.tanh %339 : vector<2x128xf32>
    %341 = arith.mulf %336, %340 : vector<2x128xf32>
    %c8_i32 = arith.constant 8 : i32
    %c0_53 = arith.constant 0 : index
    %c0_54 = arith.constant 0 : index
    %342 = vector.load %arg4[%c0_53, %c0_54] : memref<128x128xf32, #tpu.memory_space<vmem>>, vector<128x128xf32>
    %cst_55 = arith.constant dense<0.000000e+00> : vector<2x128xf32>
    %343 = tpu.matmul %341, %342, %cst_55 {dimension_numbers = #tpu.dot_dimension_numbers<[1], [0], [0], [1], [0, 0, 1, 1], [], []>} : vector<2x128xf32>, vector<128x128xf32>, vector<2x128xf32> -> vector<2x128xf32>
    %c0_56 = arith.constant 0 : index
    %c0_57 = arith.constant 0 : index
    %344 = vector.load %arg5[%c0_56, %c0_57] : memref<1x128xf32, #tpu.memory_space<vmem>>, vector<1x128xf32>
    %345 = vector.broadcast %344 : vector<1x128xf32> to vector<2x128xf32>
    %346 = arith.addf %343, %345 : vector<2x128xf32>
    %c0_58 = arith.constant 0 : index
    %c0_59 = arith.constant 0 : index
    %347 = vector.load %arg6[%c0_58, %c0_59] : memref<2x128xf32, #tpu.memory_space<vmem>>, vector<2x128xf32>
    tpu.vector_store %arg6[%c0_58, %c0_59], %346 {strides = array<i32>} : memref<2x128xf32, #tpu.memory_space<vmem>>, vector<2x128xf32>,
    return
  }
}

</mosaic_0001>

<bundles_post_ra>
// kernel: sentence_rnn_forward.1
= control target key start
LH: loop header
LB: loop body
LE: loop exit
PB: predicated region body
PF: predicated region fallthrough
CT: control target
= control target key end

     0   :  { %11 = vsyncpa [#allocation3], 0  ;;  %s5317_s0 = inlined_call_operand.vmem [shape: f32[8,2,512], index: 0, kind: input, shape index: {}]   ;;  %s5318_s1 = inlined_call_operand.vmem [shape: bf16[128,512], index: 1, kind: input, shape index: {}]   ;;  %s5319_s2 = inlined_call_operand.hbm [shape: bf16[256,512], index: 2, kind: input, shape index: {}]   ;;  %s5320_s3 = inlined_call_operand.vmem [shape: f32[1,512], index: 3, kind: input, shape index: {}]   ;;  %s5321_s4 = inlined_call_operand.hbm [shape: f32[128,128], index: 4, kind: input, shape index: {}]   ;;  %s5322_s5 = inlined_call_operand.vmem [shape: f32[1,128], index: 5, kind: input, shape index: {}]   ;;  %s5323_s6 = inlined_call_operand.hbm [shape: f32[2,128], index: 6, kind: output, shape index: {}]  }
   0x1   :  { %12 = vsyncpa [#allocation6], 0 }
   0x2   :  { %13 = vsyncpa [#allocation4], 0  ;;  %s3466_s21 = smov [#allocation2]  }
   0x3   :  { %s23_s22 = sshll.u32 %s3466_s21, 4  ;;  %s24_s22 = int_to_ptr.vmem [resolvable:$true] %s23_s22 }
   0x4   :  { %s3408_s23 = scalar_lea.vmem %s24_s22, 8192  ;;  %p3413_p1 = scmp.lt.s32.totalorder %s24_s22, %s24_s22 }
   0x5   :  { %p3409_p0 = scmp.ne.s32.totalorder %s24_s22, %s3408_s23  ;;  %p3414_p2 = scmp.lt.s32.totalorder %s3408_s23, %s3408_s23 }
   0x7   :  { %p3415_p3 = por %p3414_p2, %p3413_p1 }
   0x9   :  { %p3416_p4 = pnand %p3415_p3, %p3409_p0 }
   0xb   :  { %3419 = shalt.err (!%p3416_p4)
}
   0xc   :  { %s3467_s24 = smov 256   ;;  %s3468_s25 = smov 16  }
   0xd   :  { %29 = dma.hbm_to_vmem [thread:$0]  %s5319_s2, 8192, %s24_s22, [#allocation3], %s3467_s24, %s3467_s24, %s3468_s25  }
   0xe   :  { %s3469_s28 = smov [#allocation5]  }
   0xf   :  { %s37_s29 = sshll.u32 %s3469_s28, 4  ;;  %s38_s29 = int_to_ptr.vmem [resolvable:$true] %s37_s29 }
  0x10   :  { %s3428_s30 = scalar_lea.vmem %s38_s29, 2048  ;;  %p3433_p6 = scmp.lt.s32.totalorder %s38_s29, %s38_s29 }
  0x11   :  { %p3429_p5 = scmp.ne.s32.totalorder %s38_s29, %s3428_s30  ;;  %p3434_p7 = scmp.lt.s32.totalorder %s3428_s30, %s3428_s30 }
  0x13   :  { %p3435_p8 = por %p3434_p7, %p3433_p6 }
  0x15   :  { %p3436_p9 = pnand %p3435_p8, %p3429_p5 }
  0x17   :  { %3439 = shalt.err (!%p3436_p9)
}
  0x18   :  { %s3470_s7 = smov 128   ;;  %s3471_s8 = smov 8  }
  0x19   :  { %43 = dma.hbm_to_vmem [thread:$0]  %s5321_s4, 2048, %s38_s29, [#allocation6], %s3470_s7, %s3470_s7, %s3471_s8  }
  0x1a   :  { %3460 = dma.done.wait [#allocation3], 8192  }
  0x1b   :  { %3461 = vsyncadd [#allocation3], 4294959104 }
  0x1c   :  { %3462 = dma.done.wait [#allocation6], 2048  }
  0x1d   :  { %3463 = vsyncadd [#allocation6], 4294965248  ;;  %v5324_v0 = vmov 0   ;;  %v3524_v1 = vld [vmem:[%s5318_s1 + $0xe4] ss:$16 sps:$4 sm:$0xff]   ;;  %vm3476_vm0 = vmmov 0  }
  0x1e   :  { %364 = vmatprep.mubr.bf16.mxu0 %v5324_v0  ;;  %405 = vmatprep.mubr.bf16.mxu1 %v5324_v0  ;;  %5608 = vst [vmem:[#allocation11_spill] sm:$0xff] %v3524_v1  ;;  %v3529_v2 = vld [vmem:[%s5318_s1 + $0xec] ss:$16 sps:$4 sm:$0xff]   ;;  %v3535_v3 = vld [vmem:[%s5318_s1 + $0xe0] ss:$16 sps:$4 sm:$0xff]   ;;  %s3477_s7 = smov [#allocation7]  }
  0x1f   :  { %5609 = vst [vmem:[#allocation12_spill] sm:$0xff] %v3529_v2  ;;  %332 = vmatprep.subr.bf16.mxu0 %v3524_v1  ;;  %v3540_v4 = vld [vmem:[%s5318_s1 + $0xe8] ss:$16 sps:$4 sm:$0xff]   ;;  %373 = vmatprep.subr.bf16.mxu1 %v3529_v2  ;;  %v3546_v5 = vld [vmem:[%s5318_s1 + $0xc4] ss:$16 sps:$4 sm:$0xff]   ;;  %s2662_s8 = sshll.u32 %s3477_s7, 4  ;;  %s2663_s8 = int_to_ptr.vmem [resolvable:$true] %s2662_s8 }
  0x20   :  { %333 = vmatpush1.bf16.msra.mxu0 %v3535_v3  ;;  %374 = vmatpush1.bf16.msra.mxu1 %v3540_v4  ;;  %v3553_v6 = vld [vmem:[%s5318_s1 + $0xcc] ss:$16 sps:$4 sm:$0xff]   ;;  %v3558_v7 = vld [vmem:[%s5318_s1 + $0xc0] ss:$16 sps:$4 sm:$0xff]   ;;  %v3564_v8 = vld [vmem:[%s5318_s1 + $0xc8] ss:$16 sps:$4 sm:$0xff]   ;;  %p3445_p11 = scmp.lt.s32.totalorder %s2663_s8, %s2663_s8 }
  0x21   :  { %334 = vmatprep.subr.bf16.mxu0 %v3546_v5  ;;  %375 = vmatprep.subr.bf16.mxu1 %v3553_v6  ;;  %v3570_v9 = vld [vmem:[%s5318_s1 + $0xa4] ss:$16 sps:$4 sm:$0xff]   ;;  %v3575_v10 = vld [vmem:[%s5318_s1 + $0xac] ss:$16 sps:$4 sm:$0xff]   ;;  %v3580_v11 = vld [vmem:[%s5318_s1 + $0xa0] ss:$16 sps:$4 sm:$0xff]  }
  0x22   :  { %v3585_v12 = vld [vmem:[%s5318_s1 + $0xa8] ss:$16 sps:$4 sm:$0xff]   ;;  %v3592_v13 = vld [vmem:[%s5318_s1 + $0x84] ss:$16 sps:$4 sm:$0xff]   ;;  %v3599_v14 = vld [vmem:[%s5318_s1 + $0x8c] ss:$16 sps:$4 sm:$0xff]  }
  0x23   :  { %v3604_v15 = vld [vmem:[%s5318_s1 + $0x80] ss:$16 sps:$4 sm:$0xff]   ;;  %v3611_v16 = vld [vmem:[%s5318_s1 + $0x88] ss:$16 sps:$4 sm:$0xff]   ;;  %v3616_v17 = vld [vmem:[%s5318_s1 + $0x64] ss:$16 sps:$4 sm:$0xff]  }
  0x24   :  { %335 = vmatpush1.bf16.msra.mxu0 %v3558_v7  ;;  %376 = vmatpush1.bf16.msra.mxu1 %v3564_v8  ;;  %v3623_v18 = vld [vmem:[%s5318_s1 + $0x6c] ss:$16 sps:$4 sm:$0xff]   ;;  %v3628_v19 = vld [vmem:[%s5318_s1 + $0x60] ss:$16 sps:$4 sm:$0xff]   ;;  %v3633_v20 = vld [vmem:[%s5318_s1 + $0x68] ss:$16 sps:$4 sm:$0xff]  }
  0x25   :  { %336 = vmatprep.subr.bf16.mxu0 %v3570_v9  ;;  %377 = vmatprep.subr.bf16.mxu1 %v3575_v10  ;;  %v3640_v21 = vld [vmem:[%s5318_s1 + $0x44] ss:$16 sps:$4 sm:$0xff]   ;;  %v3647_v22 = vld [vmem:[%s5318_s1 + $0x4c] ss:$16 sps:$4 sm:$0xff]   ;;  %v3652_v23 = vld [vmem:[%s5318_s1 + $0x40] ss:$16 sps:$4 sm:$0xff]  }
  0x26   :  { %v3659_v24 = vld [vmem:[%s5318_s1 + $0x48] ss:$16 sps:$4 sm:$0xff]   ;;  %v3664_v25 = vld [vmem:[%s5318_s1 + $0x24] ss:$16 sps:$4 sm:$0xff]   ;;  %v3671_v26 = vld [vmem:[%s5318_s1 + $0x2c] ss:$16 sps:$4 sm:$0xff]  }
  0x27   :  { %v3676_v27 = vld [vmem:[%s5318_s1 + $0x20] ss:$16 sps:$4 sm:$0xff]   ;;  %v3681_v28 = vld [vmem:[%s5318_s1 + $0x28] ss:$16 sps:$4 sm:$0xff]   ;;  %v3686_v29 = vld [vmem:[%s5318_s1 + $0x4] ss:$16 sps:$4 sm:$0xff]  }
  0x28   :  { %337 = vmatpush1.bf16.msra.mxu0 %v3580_v11  ;;  %378 = vmatpush1.bf16.msra.mxu1 %v3585_v12  ;;  %v3691_v30 = vld [vmem:[%s5318_s1 + $0xc] ss:$16 sps:$4 sm:$0xff]   ;;  %v3700_v31 = vld [vmem:[%s5318_s1] ss:$16 sps:$4 sm:$0xff]   ;;  %v3705_v32 = vld [vmem:[%s5318_s1 + $0x8] ss:$16 sps:$4 sm:$0xff]  }
  0x29   :  { %338 = vmatprep.subr.bf16.mxu0 %v3592_v13  ;;  %379 = vmatprep.subr.bf16.mxu1 %v3599_v14  ;;  %v3715_v33 = vld [vmem:[#allocation2 + $0xe4] ss:$16 sps:$4 sm:$0xff]   ;;  %v3717_v34 = vld [vmem:[#allocation2 + $0xec] ss:$16 sps:$4 sm:$0xff]   ;;  %v3719_v35 = vld [vmem:[#allocation2 + $0xe0] ss:$16 sps:$4 sm:$0xff]  }
  0x2a   :  { %v3721_v36 = vld [vmem:[#allocation2 + $0xe8] ss:$16 sps:$4 sm:$0xff]   ;;  %v3727_v37 = vld [vmem:[#allocation2 + $0xc4] ss:$16 sps:$4 sm:$0xff]   ;;  %v3729_v38 = vld [vmem:[#allocation2 + $0xcc] ss:$16 sps:$4 sm:$0xff]  }
  0x2b   :  { %v3731_v39 = vld [vmem:[#allocation2 + $0xc0] ss:$16 sps:$4 sm:$0xff]   ;;  %v3733_v40 = vld [vmem:[#allocation2 + $0xc8] ss:$16 sps:$4 sm:$0xff]   ;;  %v3739_v41 = vld [vmem:[#allocation2 + $0xa4] ss:$16 sps:$4 sm:$0xff]  }
  0x2c   :  { %339 = vmatpush1.bf16.msra.mxu0 %v3604_v15  ;;  %380 = vmatpush1.bf16.msra.mxu1 %v3611_v16  ;;  %v3741_v42 = vld [vmem:[#allocation2 + $0xac] ss:$16 sps:$4 sm:$0xff]   ;;  %v3743_v43 = vld [vmem:[#allocation2 + $0xa0] ss:$16 sps:$4 sm:$0xff]   ;;  %v3745_v44 = vld [vmem:[#allocation2 + $0xa8] ss:$16 sps:$4 sm:$0xff]  }
  0x2d   :  { %340 = vmatprep.subr.bf16.mxu0 %v3616_v17  ;;  %381 = vmatprep.subr.bf16.mxu1 %v3623_v18  ;;  %v3751_v45 = vld [vmem:[#allocation2 + $0x84] ss:$16 sps:$4 sm:$0xff]   ;;  %v3753_v46 = vld [vmem:[#allocation2 + $0x8c] ss:$16 sps:$4 sm:$0xff]   ;;  %v3755_v47 = vld [vmem:[#allocation2 + $0x80] ss:$16 sps:$4 sm:$0xff]  }
  0x2e   :  { %5610 = vst [vmem:[#allocation13_spill] sm:$0xff] %v3751_v45  ;;  %5611 = vst [vmem:[#allocation14_spill] sm:$0xff] %v3753_v46  ;;  %v3757_v48 = vld [vmem:[#allocation2 + $0x88] ss:$16 sps:$4 sm:$0xff]   ;;  %v3763_v49 = vld [vmem:[#allocation2 + $0x64] ss:$16 sps:$4 sm:$0xff]  }
  0x2f   :  { %5612 = vst [vmem:[#allocation15_spill] sm:$0xff] %v3755_v47  ;;  %5613 = vst [vmem:[#allocation16_spill] sm:$0xff] %v3757_v48  ;;  %v3765_v50 = vld [vmem:[#allocation2 + $0x6c] ss:$16 sps:$4 sm:$0xff]   ;;  %v3767_v51 = vld [vmem:[#allocation2 + $0x60] ss:$16 sps:$4 sm:$0xff]  }
  0x30   :  { %341 = vmatpush1.bf16.msra.mxu0 %v3628_v19  ;;  %382 = vmatpush1.bf16.msra.mxu1 %v3633_v20  ;;  %5614 = vst [vmem:[#allocation17_spill] sm:$0xff] %v3763_v49  ;;  %5615 = vst [vmem:[#allocation18_spill] sm:$0xff] %v3765_v50  ;;  %v3769_v52 = vld [vmem:[#allocation2 + $0x68] ss:$16 sps:$4 sm:$0xff]   ;;  %v3775_v53 = vld [vmem:[#allocation2 + $0x44] ss:$16 sps:$4 sm:$0xff]  }
  0x31   :  { %342 = vmatprep.subr.bf16.mxu0 %v3640_v21  ;;  %383 = vmatprep.subr.bf16.mxu1 %v3647_v22  ;;  %5616 = vst [vmem:[#allocation19_spill] sm:$0xff] %v3767_v51  ;;  %5617 = vst [vmem:[#allocation20_spill] sm:$0xff] %v3769_v52  ;;  %v3777_v54 = vld [vmem:[#allocation2 + $0x4c] ss:$16 sps:$4 sm:$0xff]   ;;  %v3779_v55 = vld [vmem:[#allocation2 + $0x40] ss:$16 sps:$4 sm:$0xff]  }
  0x32   :  { %5618 = vst [vmem:[#allocation21_spill] sm:$0xff] %v3775_v53  ;;  %5619 = vst [vmem:[#allocation22_spill] sm:$0xff] %v3777_v54  ;;  %v3781_v56 = vld [vmem:[#allocation2 + $0x48] ss:$16 sps:$4 sm:$0xff]   ;;  %v3787_v57 = vld [vmem:[#allocation2 + $0x24] ss:$16 sps:$4 sm:$0xff]  }
  0x33   :  { %5620 = vst [vmem:[#allocation23_spill] sm:$0xff] %v3779_v55  ;;  %5621 = vst [vmem:[#allocation24_spill] sm:$0xff] %v3781_v56  ;;  %v3789_v58 = vld [vmem:[#allocation2 + $0x2c] ss:$16 sps:$4 sm:$0xff]   ;;  %v3791_v59 = vld [vmem:[#allocation2 + $0x20] ss:$16 sps:$4 sm:$0xff]  }
  0x34   :  { %343 = vmatpush1.bf16.msra.mxu0 %v3652_v23  ;;  %384 = vmatpush1.bf16.msra.mxu1 %v3659_v24  ;;  %5622 = vst [vmem:[#allocation25_spill] sm:$0xff] %v3787_v57  ;;  %5623 = vst [vmem:[#allocation26_spill] sm:$0xff] %v3789_v58  ;;  %v3793_v60 = vld [vmem:[#allocation2 + $0x28] ss:$16 sps:$4 sm:$0xff]   ;;  %v3799_v61 = vld [vmem:[#allocation2 + $0x4] ss:$16 sps:$4 sm:$0xff]  }
  0x35   :  { %344 = vmatprep.subr.bf16.mxu0 %v3664_v25  ;;  %385 = vmatprep.subr.bf16.mxu1 %v3671_v26  ;;  %5624 = vst [vmem:[#allocation27_spill] sm:$0xff] %v3791_v59  ;;  %5625 = vst [vmem:[#allocation28_spill] sm:$0xff] %v3793_v60  ;;  %v3801_v62 = vld [vmem:[#allocation2 + $0xc] ss:$16 sps:$4 sm:$0xff]   ;;  %v3803_v63 = vld [vmem:[#allocation2] ss:$16 sps:$4 sm:$0xff]  }
  0x36   :  { %5626 = vst [vmem:[#allocation29_spill] sm:$0xff] %v3799_v61  ;;  %5627 = vst [vmem:[#allocation30_spill] sm:$0xff] %v3801_v62  ;;  %s3440_s9 = scalar_lea.vmem %s2663_s8, 32 }
  0x37   :  { %5628 = vst [vmem:[#allocation31_spill] sm:$0xff] %v3803_v63  ;;  %p3441_p10 = scmp.ne.s32.totalorder %s2663_s8, %s3440_s9  ;;  %p3446_p12 = scmp.lt.s32.totalorder %s3440_s9, %s3440_s9 }
  0x38   :  { %345 = vmatpush1.bf16.msra.mxu0 %v3676_v27  ;;  %386 = vmatpush1.bf16.msra.mxu1 %v3681_v28 }
  0x39   :  { %346 = vmatprep.subr.bf16.mxu0 %v3686_v29  ;;  %387 = vmatprep.subr.bf16.mxu1 %v3691_v30  ;;  %p3447_p13 = por %p3446_p12, %p3445_p11 }
  0x3b   :  { %p3448_p0 = pnand %p3447_p13, %p3441_p10 }
  0x3c   :  { %347 = vmatpush1.bf16.msra.mxu0 %v3700_v31  ;;  %388 = vmatpush1.bf16.msra.mxu1 %v3705_v32 }
  0x3d   :  { %779 = vmatprep.subr.bf16.mxu0 %v3715_v33  ;;  %820 = vmatprep.subr.bf16.mxu1 %v3717_v34 }
  0x3f   :  { %365 = vmatmul.mubr.bf16.vlgmr.msra.gmra.mxu0 %v5324_v0  ;;  %406 = vmatmul.mubr.bf16.vlgmr.msra.gmra.mxu1 %v5324_v0  ;;  %v3805_v0 = vld [vmem:[#allocation2 + $0x8] ss:$16 sps:$4 sm:$0xff]  }
  0x40   :  { %780 = vmatpush1.bf16.msra.mxu0 %v3719_v35  ;;  %821 = vmatpush1.bf16.msra.mxu1 %v3721_v36  ;;  %5629 = vst [vmem:[#allocation32_spill] sm:$0xff] %v3805_v0 }
  0x41   :  { %781 = vmatprep.subr.bf16.mxu0 %v3727_v37  ;;  %822 = vmatprep.subr.bf16.mxu1 %v3729_v38 }
  0x44   :  { %782 = vmatpush1.bf16.msra.mxu0 %v3731_v39  ;;  %823 = vmatpush1.bf16.msra.mxu1 %v3733_v40 }
  0x45   :  { %783 = vmatprep.subr.bf16.mxu0 %v3739_v41  ;;  %824 = vmatprep.subr.bf16.mxu1 %v3741_v42 }
  0x48   :  { %784 = vmatpush1.bf16.msra.mxu0 %v3743_v43  ;;  %825 = vmatpush1.bf16.msra.mxu1 %v3745_v44 }
  0x49   :  { %785 = vmatprep.subr.bf16.mxu0 %v3751_v45  ;;  %826 = vmatprep.subr.bf16.mxu1 %v3753_v46 }
  0x4c   :  { %786 = vmatpush1.bf16.msra.mxu0 %v3755_v47  ;;  %827 = vmatpush1.bf16.msra.mxu1 %v3757_v48 }
  0x4d   :  { %787 = vmatprep.subr.bf16.mxu0 %v3763_v49  ;;  %828 = vmatprep.subr.bf16.mxu1 %v3765_v50 }
  0x50   :  { %788 = vmatpush1.bf16.msra.mxu0 %v3767_v51  ;;  %829 = vmatpush1.bf16.msra.mxu1 %v3769_v52 }
  0x51   :  { %789 = vmatprep.subr.bf16.mxu0 %v3775_v53  ;;  %830 = vmatprep.subr.bf16.mxu1 %v3777_v54 }
  0x54   :  { %790 = vmatpush1.bf16.msra.mxu0 %v3779_v55  ;;  %831 = vmatpush1.bf16.msra.mxu1 %v3781_v56  ;;  %v3845_v56 = vld [vmem:[#allocation2 + $0x184] ss:$16 sps:$4 sm:$0xff]  }
  0x55   :  { %791 = vmatprep.subr.bf16.mxu0 %v3787_v57  ;;  %832 = vmatprep.subr.bf16.mxu1 %v3789_v58  ;;  %v3811_v58 = vld [vmem:[#allocation2 + $0x1e4] ss:$16 sps:$4 sm:$0xff]   ;;  %v3817_v57 = vld [vmem:[#allocation2 + $0x1e8] ss:$16 sps:$4 sm:$0xff]   ;;  %5642 = vst [vmem:[#allocation45_spill] sm:$0xff] %v3845_v56 }
  0x56   :  { %5630 = vst [vmem:[#allocation33_spill] sm:$0xff] %v3811_v58  ;;  %5633 = vst [vmem:[#allocation36_spill] sm:$0xff] %v3817_v57 }
  0x58   :  { %792 = vmatpush1.bf16.msra.mxu0 %v3791_v59  ;;  %833 = vmatpush1.bf16.msra.mxu1 %v3793_v60  ;;  %v3813_v59 = vld [vmem:[#allocation2 + $0x1ec] ss:$16 sps:$4 sm:$0xff]   ;;  %v3815_v60 = vld [vmem:[#allocation2 + $0x1e0] ss:$16 sps:$4 sm:$0xff]  }
  0x59   :  { %793 = vmatprep.subr.bf16.mxu0 %v3799_v61  ;;  %834 = vmatprep.subr.bf16.mxu1 %v3801_v62  ;;  %5631 = vst [vmem:[#allocation34_spill] sm:$0xff] %v3813_v59  ;;  %5632 = vst [vmem:[#allocation35_spill] sm:$0xff] %v3815_v60  ;;  %v3823_v62 = vld [vmem:[#allocation2 + $0x1c4] ss:$16 sps:$4 sm:$0xff]   ;;  %v3829_v61 = vld [vmem:[#allocation2 + $0x1c8] ss:$16 sps:$4 sm:$0xff]  }
  0x5a   :  { %5634 = vst [vmem:[#allocation37_spill] sm:$0xff] %v3823_v62  ;;  %5637 = vst [vmem:[#allocation40_spill] sm:$0xff] %v3829_v61 }
  0x5c   :  { %794 = vmatpush1.bf16.msra.mxu0 %v3803_v63  ;;  %835 = vmatpush1.bf16.msra.mxu1 %v3805_v0  ;;  %v3825_v63 = vld [vmem:[#allocation2 + $0x1cc] ss:$16 sps:$4 sm:$0xff]   ;;  %v3827_v0 = vld [vmem:[#allocation2 + $0x1c0] ss:$16 sps:$4 sm:$0xff]  }
  0x5d   :  { %795 = vmatprep.subr.bf16.mxu0 %v3811_v58  ;;  %836 = vmatprep.subr.bf16.mxu1 %v3813_v59  ;;  %5635 = vst [vmem:[#allocation38_spill] sm:$0xff] %v3825_v63  ;;  %5636 = vst [vmem:[#allocation39_spill] sm:$0xff] %v3827_v0  ;;  %v3835_v59 = vld [vmem:[#allocation2 + $0x1a4] ss:$16 sps:$4 sm:$0xff]   ;;  %v3841_v58 = vld [vmem:[#allocation2 + $0x1a8] ss:$16 sps:$4 sm:$0xff]  }
  0x5e   :  { %5638 = vst [vmem:[#allocation41_spill] sm:$0xff] %v3835_v59  ;;  %5641 = vst [vmem:[#allocation44_spill] sm:$0xff] %v3841_v58 }
  0x60   :  { %796 = vmatpush2.bf16.msra.mxu0 %v3815_v60  ;;  %837 = vmatpush2.bf16.msra.mxu1 %v3817_v57  ;;  %v3837_v60 = vld [vmem:[#allocation2 + $0x1ac] ss:$16 sps:$4 sm:$0xff]   ;;  %v3839_v57 = vld [vmem:[#allocation2 + $0x1a0] ss:$16 sps:$4 sm:$0xff]  }
  0x61   :  { %797 = vmatprep.subr.bf16.mxu0 %v3823_v62  ;;  %838 = vmatprep.subr.bf16.mxu1 %v3825_v63  ;;  %5639 = vst [vmem:[#allocation42_spill] sm:$0xff] %v3837_v60  ;;  %5640 = vst [vmem:[#allocation43_spill] sm:$0xff] %v3839_v57  ;;  %v3847_v62 = vld [vmem:[#allocation2 + $0x18c] ss:$16 sps:$4 sm:$0xff]   ;;  %v3857_v63 = vld [vmem:[#allocation2 + $0x164] ss:$16 sps:$4 sm:$0xff]  }
  0x62   :  { %5643 = vst [vmem:[#allocation46_spill] sm:$0xff] %v3847_v62  ;;  %5646 = vst [vmem:[#allocation49_spill] sm:$0xff] %v3857_v63 }
  0x64   :  { %798 = vmatpush2.bf16.msra.mxu0 %v3827_v0  ;;  %839 = vmatpush2.bf16.msra.mxu1 %v3829_v61  ;;  %v3851_v61 = vld [vmem:[#allocation2 + $0x180] ss:$16 sps:$4 sm:$0xff]   ;;  %v3853_v0 = vld [vmem:[#allocation2 + $0x188] ss:$16 sps:$4 sm:$0xff]  }
  0x65   :  { %799 = vmatprep.subr.bf16.mxu0 %v3835_v59  ;;  %840 = vmatprep.subr.bf16.mxu1 %v3837_v60  ;;  %5644 = vst [vmem:[#allocation47_spill] sm:$0xff] %v3851_v61  ;;  %5645 = vst [vmem:[#allocation48_spill] sm:$0xff] %v3853_v0  ;;  %v3859_v59 = vld [vmem:[#allocation2 + $0x16c] ss:$16 sps:$4 sm:$0xff]   ;;  %v3863_v60 = vld [vmem:[#allocation2 + $0x160] ss:$16 sps:$4 sm:$0xff]  }
  0x66   :  { %5647 = vst [vmem:[#allocation50_spill] sm:$0xff] %v3859_v59  ;;  %5648 = vst [vmem:[#allocation51_spill] sm:$0xff] %v3863_v60 }
  0x68   :  { %800 = vmatpush2.bf16.msra.mxu0 %v3839_v57  ;;  %841 = vmatpush2.bf16.msra.mxu1 %v3841_v58  ;;  %v3865_v57 = vld [vmem:[#allocation2 + $0x168] ss:$16 sps:$4 sm:$0xff]   ;;  %v3869_v58 = vld [vmem:[#allocation2 + $0x144] ss:$16 sps:$4 sm:$0xff]  }
  0x69   :  { %801 = vmatprep.subr.bf16.mxu0 %v3845_v56  ;;  %842 = vmatprep.subr.bf16.mxu1 %v3847_v62  ;;  %5649 = vst [vmem:[#allocation52_spill] sm:$0xff] %v3865_v57  ;;  %5650 = vst [vmem:[#allocation53_spill] sm:$0xff] %v3869_v58  ;;  %v3871_v56 = vld [vmem:[#allocation2 + $0x14c] ss:$16 sps:$4 sm:$0xff]   ;;  %v3473_v62 = vmov 0.0|0.0  }
  0x6a   :  { %5651 = vst [vmem:[#allocation54_spill] sm:$0xff] %v3871_v56  ;;  %811 = vmatprep.mubr.bf16.mxu0 %v3473_v62  ;;  %852 = vmatprep.mubr.bf16.mxu1 %v3473_v62  ;;  %v3887_v62 = vld [vmem:[#allocation2 + $0x120] ss:$16 sps:$4 sm:$0xff]  }
  0x6b   :  { %5656 = vst [vmem:[#allocation59_spill] sm:$0xff] %v3887_v62 }
  0x6c   :  { %802 = vmatpush2.bf16.msra.mxu0 %v3851_v61  ;;  %843 = vmatpush2.bf16.msra.mxu1 %v3853_v0  ;;  %v3875_v0 = vld [vmem:[#allocation2 + $0x140] ss:$16 sps:$4 sm:$0xff]   ;;  %v3877_v61 = vld [vmem:[#allocation2 + $0x148] ss:$16 sps:$4 sm:$0xff]  }
  0x6d   :  { %803 = vmatprep.subr.bf16.mxu0 %v3857_v63  ;;  %844 = vmatprep.subr.bf16.mxu1 %v3859_v59  ;;  %5652 = vst [vmem:[#allocation55_spill] sm:$0xff] %v3875_v0  ;;  %5653 = vst [vmem:[#allocation56_spill] sm:$0xff] %v3877_v61  ;;  %v3881_v59 = vld [vmem:[#allocation2 + $0x124] ss:$16 sps:$4 sm:$0xff]   ;;  %v3883_v63 = vld [vmem:[#allocation2 + $0x12c] ss:$16 sps:$4 sm:$0xff]  }
  0x6e   :  { %5654 = vst [vmem:[#allocation57_spill] sm:$0xff] %v3881_v59  ;;  %5655 = vst [vmem:[#allocation58_spill] sm:$0xff] %v3883_v63 }
  0x70   :  { %804 = vmatpush2.bf16.msra.mxu0 %v3863_v60  ;;  %845 = vmatpush2.bf16.msra.mxu1 %v3865_v57  ;;  %v3889_v60 = vld [vmem:[#allocation2 + $0x128] ss:$16 sps:$4 sm:$0xff]   ;;  %v3893_v57 = vld [vmem:[#allocation2 + $0x104] ss:$16 sps:$4 sm:$0xff]  }
  0x71   :  { %805 = vmatprep.subr.bf16.mxu0 %v3869_v58  ;;  %846 = vmatprep.subr.bf16.mxu1 %v3871_v56  ;;  %5657 = vst [vmem:[#allocation60_spill] sm:$0xff] %v3889_v60  ;;  %5658 = vst [vmem:[#allocation61_spill] sm:$0xff] %v3893_v57  ;;  %v3895_v58 = vld [vmem:[#allocation2 + $0x10c] ss:$16 sps:$4 sm:$0xff]   ;;  %v3899_v56 = vld [vmem:[#allocation2 + $0x100] ss:$16 sps:$4 sm:$0xff]  }
  0x72   :  { %5659 = vst [vmem:[#allocation62_spill] sm:$0xff] %v3895_v58  ;;  %5660 = vst [vmem:[#allocation63_spill] sm:$0xff] %v3899_v56 }
  0x74   :  { %806 = vmatpush2.bf16.msra.mxu0 %v3875_v0  ;;  %847 = vmatpush2.bf16.msra.mxu1 %v3877_v61  ;;  %v3901_v0 = vld [vmem:[#allocation2 + $0x108] ss:$16 sps:$4 sm:$0xff]  }
  0x75   :  { %807 = vmatprep.subr.bf16.mxu0 %v3881_v59  ;;  %848 = vmatprep.subr.bf16.mxu1 %v3883_v63  ;;  %5661 = vst [vmem:[#allocation64_spill] sm:$0xff] %v3901_v0  ;;  %v151_v63 = vlaneseq }
  0x78   :  { %808 = vmatpush2.bf16.msra.mxu0 %v3887_v62  ;;  %849 = vmatpush2.bf16.msra.mxu1 %v3889_v60  ;;  %v3474_v62 = vmov 1983009808   ;;  %v3909_v60 = vshrl.u32 %v151_v63, 7  ;;  %v171_v63 = vld [vmem:[%s5317_s0] sm:$0xff] }
  0x79   :  { %809 = vmatprep.subr.bf16.mxu0 %v3893_v57  ;;  %850 = vmatprep.subr.bf16.mxu1 %v3895_v58  ;;  %v421_v59 = vunpack.c.l.s4 %v3474_v62 }
  0x7a   :  { %5662 = vst [vmem:[#allocation65_spill] sm:$0xff] %v3909_v60 }
  0x7b   :  { %v422_v61 = vunpack.c.0.s8 %v421_v59 }
  0x7c   :  { %810 = vmatpush2.bf16.msra.mxu0 %v3899_v56  ;;  %851 = vmatpush2.bf16.msra.mxu1 %v3901_v0 }
  0x7d   :  { %891 = vmatprep.subr.bf16.mxu0 %v3524_v1  ;;  %932 = vmatprep.subr.bf16.mxu1 %v3529_v2  ;;  %v3912_v57 = vsub.s32 %v422_v61, %v3909_v60 }
  0xff   :  { %v366_v55 = vpop.f32.mrf.mxu0  ;;  %v407_v54 = vpop.f32.mrf.mxu1 }
 0x101   :  { %v368_v58 = vpop.f32.mrf.mxu0  ;;  %v409_v53 = vpop.f32.mrf.mxu1 }
 0x102   :  { %v418_v56 = vcombine.low %v366_v55, %v368_v58  ;;  %v419_v52 = vcombine.low %v407_v54, %v409_v53 }
 0x103   :  { %v370_v0 = vpop.f32.mrf.mxu0  ;;  %v411_v51 = vpop.f32.mrf.mxu1 }
 0x104   :  { %v426_v1 = vrot.slane %v418_v56, %v3912_v57  ;;  %v433_v2 = vrot.slane %v419_v52, %v3912_v57 }
 0x105   :  { %v371_v59 = vpop.f32.mrf.mxu0  ;;  %v412_v62 = vpop.f32.mrf.mxu1 }
 0x106   :  { %v434_v50 = vcombine.low %v426_v1, %v433_v2  ;;  %v5670_v62 = vld [vmem:[#allocation22_spill] sm:$0xff] }
 0x108   :  { %v436_v49 = vadd.f32 %v434_v50, %v171_v63  ;;  %v5667_v50 = vld [vmem:[#allocation19_spill] sm:$0xff]  ;;  %v5669_v63 = vld [vmem:[#allocation21_spill] sm:$0xff] }
 0x10a   :  { %v2704_v61 = vmul.f32 -1.442695, %v436_v49  ;;  %v444_v55 = vrot.slane %v436_v49, 6  ;;  %v5666_v49 = vld [vmem:[#allocation18_spill] sm:$0xff] }
 0x10c   :  { %3016 = vpow2.f32 %v2704_v61  ;;  %v5671_v61 = vld [vmem:[#allocation23_spill] sm:$0xff] }
 0x119   :  { %v3017_v60 = vpop.eup %3016 }
 0x11a   :  { %v440_v48 = vadd.f32 1.0, %v3017_v60  ;;  %v5668_v60 = vld [vmem:[#allocation20_spill] sm:$0xff] }
 0x11c   :  { %3018 = vrcp.f32 %v440_v48  ;;  %v5663_v48 = vmov 0  }
 0x11d   :  { %3020 = vtanh.f32 %v444_v55  ;;  %v5672_v55 = vld [vmem:[#allocation24_spill] sm:$0xff] }
 0x129   :  { %v3019_v0 = vpop.eup %3018 }
 0x12a   :  { %v448_v51 = vrot.slane %v3019_v0, 2  ;;  %v3021_v53 = vpop.eup %3020  ;;  %v454_v58 = vrot.slane %v3019_v0, 4 }
 0x12b   :  { %v451_v54 = vmul.f32 %v3021_v53, %v3019_v0  ;;  %v5673_v0 = vld [vmem:[#allocation25_spill] sm:$0xff]  ;;  %v5675_v53 = vld [vmem:[#allocation27_spill] sm:$0xff] }
 0x12c   :  { %v450_v52 = vmul.f32 0.0, %v448_v51  ;;  %v5674_v51 = vld [vmem:[#allocation26_spill] sm:$0xff] }
 0x12e   :  { %v3919_v56 = vadd.f32 %v451_v54, %v450_v52  ;;  %v5676_v54 = vld [vmem:[#allocation28_spill] sm:$0xff]  ;;  %v5677_v52 = vld [vmem:[#allocation29_spill] sm:$0xff] }
 0x130   :  { %3022 = vtanh.f32 %v3919_v56 }
 0x13d   :  { %v3023_v59 = vpop.eup %3022 }
 0x13e   :  { %v456_v1 = vmul.f32 %v3023_v59, %v454_v58  ;;  %v5678_v58 = vld [vmem:[#allocation30_spill] sm:$0xff]  ;;  %v5679_v59 = vld [vmem:[#allocation31_spill] sm:$0xff] }
 0x140   :  { %v457_v2 = vpack.c.bf16 %v456_v1, %v456_v1  ;;  %v5680_v1 = vld [vmem:[#allocation32_spill] sm:$0xff] }
 0x142   :  { %812 = vmatmul.mubr.bf16.vlgmr.msra.gmra.mxu0 %v457_v2  ;;  %853 = vmatmul.mubr.bf16.vlgmr.msra.gmra.mxu1 %v457_v2 }
 0x143   :  { %892 = vmatpush1.bf16.msra.mxu0 %v3535_v3  ;;  %933 = vmatpush1.bf16.msra.mxu1 %v3540_v4  ;;  %v5664_v3 = vld [vmem:[#allocation16_spill] sm:$0xff]  ;;  %v5665_v4 = vld [vmem:[#allocation17_spill] sm:$0xff] }
 0x144   :  { %893 = vmatprep.subr.bf16.mxu0 %v3546_v5  ;;  %934 = vmatprep.subr.bf16.mxu1 %v3553_v6 }
 0x145   :  { %923 = vmatprep.mubr.bf16.mxu0 %v5663_v48  ;;  %964 = vmatprep.mubr.bf16.mxu1 %v5663_v48 }
 0x147   :  { %894 = vmatpush1.bf16.msra.mxu0 %v3558_v7  ;;  %935 = vmatpush1.bf16.msra.mxu1 %v3564_v8 }
 0x148   :  { %895 = vmatprep.subr.bf16.mxu0 %v3570_v9  ;;  %936 = vmatprep.subr.bf16.mxu1 %v3575_v10 }
 0x14b   :  { %896 = vmatpush1.bf16.msra.mxu0 %v3580_v11  ;;  %937 = vmatpush1.bf16.msra.mxu1 %v3585_v12 }
 0x14c   :  { %897 = vmatprep.subr.bf16.mxu0 %v3592_v13  ;;  %938 = vmatprep.subr.bf16.mxu1 %v3599_v14 }
 0x14f   :  { %898 = vmatpush1.bf16.msra.mxu0 %v3604_v15  ;;  %939 = vmatpush1.bf16.msra.mxu1 %v3611_v16 }
 0x150   :  { %899 = vmatprep.subr.bf16.mxu0 %v3616_v17  ;;  %940 = vmatprep.subr.bf16.mxu1 %v3623_v18 }
 0x153   :  { %900 = vmatpush1.bf16.msra.mxu0 %v3628_v19  ;;  %941 = vmatpush1.bf16.msra.mxu1 %v3633_v20 }
 0x154   :  { %901 = vmatprep.subr.bf16.mxu0 %v3640_v21  ;;  %942 = vmatprep.subr.bf16.mxu1 %v3647_v22 }
 0x157   :  { %902 = vmatpush1.bf16.msra.mxu0 %v3652_v23  ;;  %943 = vmatpush1.bf16.msra.mxu1 %v3659_v24 }
 0x158   :  { %903 = vmatprep.subr.bf16.mxu0 %v3664_v25  ;;  %944 = vmatprep.subr.bf16.mxu1 %v3671_v26 }
 0x15b   :  { %904 = vmatpush1.bf16.msra.mxu0 %v3676_v27  ;;  %945 = vmatpush1.bf16.msra.mxu1 %v3681_v28 }
 0x15c   :  { %905 = vmatprep.subr.bf16.mxu0 %v3686_v29  ;;  %946 = vmatprep.subr.bf16.mxu1 %v3691_v30 }
 0x15f   :  { %906 = vmatpush1.bf16.msra.mxu0 %v3700_v31  ;;  %947 = vmatpush1.bf16.msra.mxu1 %v3705_v32 }
 0x160   :  { %1018 = vmatprep.subr.bf16.mxu0 %v3715_v33  ;;  %1059 = vmatprep.subr.bf16.mxu1 %v3717_v34 }
 0x162   :  { %924 = vmatmul.mubr.bf16.vlgmr.msra.gmra.mxu0 %v457_v2  ;;  %965 = vmatmul.mubr.bf16.vlgmr.msra.gmra.mxu1 %v457_v2  ;;  %v5681_v2 = vld [vmem:[#allocation33_spill] sm:$0xff] }
 0x163   :  { %1019 = vmatpush1.bf16.msra.mxu0 %v3719_v35  ;;  %1060 = vmatpush1.bf16.msra.mxu1 %v3721_v36 }
 0x164   :  { %1020 = vmatprep.subr.bf16.mxu0 %v3727_v37  ;;  %1061 = vmatprep.subr.bf16.mxu1 %v3729_v38 }
 0x167   :  { %1021 = vmatpush1.bf16.msra.mxu0 %v3731_v39  ;;  %1062 = vmatpush1.bf16.msra.mxu1 %v3733_v40 }
 0x168   :  { %1022 = vmatprep.subr.bf16.mxu0 %v3739_v41  ;;  %1063 = vmatprep.subr.bf16.mxu1 %v3741_v42 }
 0x16b   :  { %1023 = vmatpush1.bf16.msra.mxu0 %v3743_v43  ;;  %1064 = vmatpush1.bf16.msra.mxu1 %v3745_v44 }
 0x16c   :  { %1024 = vmatprep.subr.bf16.mxu0 %v3751_v45  ;;  %1065 = vmatprep.subr.bf16.mxu1 %v3753_v46 }
 0x16f   :  { %1025 = vmatpush1.bf16.msra.mxu0 %v3755_v47  ;;  %1066 = vmatpush1.bf16.msra.mxu1 %v5664_v3 }
 0x170   :  { %1026 = vmatprep.subr.bf16.mxu0 %v5665_v4  ;;  %1067 = vmatprep.subr.bf16.mxu1 %v5666_v49 }
 0x173   :  { %1027 = vmatpush1.bf16.msra.mxu0 %v5667_v50  ;;  %1068 = vmatpush1.bf16.msra.mxu1 %v5668_v60 }
 0x174   :  { %1028 = vmatprep.subr.bf16.mxu0 %v5669_v63  ;;  %1069 = vmatprep.subr.bf16.mxu1 %v5670_v62 }
 0x177   :  { %1029 = vmatpush1.bf16.msra.mxu0 %v5671_v61  ;;  %1070 = vmatpush1.bf16.msra.mxu1 %v5672_v55  ;;  %v5682_v61 = vld [vmem:[#allocation34_spill] sm:$0xff]  ;;  %v5683_v55 = vld [vmem:[#allocation35_spill] sm:$0xff] }
 0x178   :  { %1030 = vmatprep.subr.bf16.mxu0 %v5673_v0  ;;  %1071 = vmatprep.subr.bf16.mxu1 %v5674_v51  ;;  %v5684_v0 = vld [vmem:[#allocation36_spill] sm:$0xff]  ;;  %v5685_v51 = vld [vmem:[#allocation37_spill] sm:$0xff] }
 0x17b   :  { %1031 = vmatpush1.bf16.msra.mxu0 %v5675_v53  ;;  %1072 = vmatpush1.bf16.msra.mxu1 %v5676_v54  ;;  %v5686_v53 = vld [vmem:[#allocation38_spill] sm:$0xff]  ;;  %v5687_v54 = vld [vmem:[#allocation39_spill] sm:$0xff] }
 0x17c   :  { %1032 = vmatprep.subr.bf16.mxu0 %v5677_v52  ;;  %1073 = vmatprep.subr.bf16.mxu1 %v5678_v58  ;;  %v5688_v52 = vld [vmem:[#allocation40_spill] sm:$0xff]  ;;  %v5689_v58 = vld [vmem:[#allocation41_spill] sm:$0xff] }
 0x17f   :  { %1033 = vmatpush1.bf16.msra.mxu0 %v5679_v59  ;;  %1074 = vmatpush1.bf16.msra.mxu1 %v5680_v1  ;;  %v5690_v59 = vld [vmem:[#allocation42_spill] sm:$0xff]  ;;  %v5691_v1 = vld [vmem:[#allocation43_spill] sm:$0xff] }
 0x180   :  { %1034 = vmatprep.subr.bf16.mxu0 %v5681_v2  ;;  %1075 = vmatprep.subr.bf16.mxu1 %v5682_v61  ;;  %v5692_v2 = vld [vmem:[#allocation44_spill] sm:$0xff]  ;;  %v5693_v61 = vld [vmem:[#allocation45_spill] sm:$0xff] }
 0x183   :  { %1035 = vmatpush2.bf16.msra.mxu0 %v5683_v55  ;;  %1076 = vmatpush2.bf16.msra.mxu1 %v5684_v0  ;;  %v5694_v55 = vld [vmem:[#allocation46_spill] sm:$0xff]  ;;  %v5695_v0 = vld [vmem:[#allocation47_spill] sm:$0xff] }
 0x184   :  { %1036 = vmatprep.subr.bf16.mxu0 %v5685_v51  ;;  %1077 = vmatprep.subr.bf16.mxu1 %v5686_v53  ;;  %v5696_v51 = vld [vmem:[#allocation48_spill] sm:$0xff]  ;;  %v5697_v53 = vld [vmem:[#allocation49_spill] sm:$0xff] }
 0x187   :  { %1037 = vmatpush2.bf16.msra.mxu0 %v5687_v54  ;;  %1078 = vmatpush2.bf16.msra.mxu1 %v5688_v52  ;;  %v5698_v54 = vld [vmem:[#allocation50_spill] sm:$0xff]  ;;  %v5699_v52 = vld [vmem:[#allocation51_spill] sm:$0xff] }
 0x188   :  { %1038 = vmatprep.subr.bf16.mxu0 %v5689_v58  ;;  %1079 = vmatprep.subr.bf16.mxu1 %v5690_v59  ;;  %v5700_v58 = vld [vmem:[#allocation52_spill] sm:$0xff]  ;;  %v5701_v59 = vld [vmem:[#allocation53_spill] sm:$0xff] }
 0x18b   :  { %1039 = vmatpush2.bf16.msra.mxu0 %v5691_v1  ;;  %1080 = vmatpush2.bf16.msra.mxu1 %v5692_v2  ;;  %v5702_v1 = vld [vmem:[#allocation54_spill] sm:$0xff]  ;;  %v5703_v2 = vld [vmem:[#allocation55_spill] sm:$0xff] }
 0x18c   :  { %1040 = vmatprep.subr.bf16.mxu0 %v5693_v61  ;;  %1081 = vmatprep.subr.bf16.mxu1 %v5694_v55  ;;  %v5704_v61 = vld [vmem:[#allocation56_spill] sm:$0xff]  ;;  %v5705_v55 = vld [vmem:[#allocation57_spill] sm:$0xff] }
 0x18f   :  { %1041 = vmatpush2.bf16.msra.mxu0 %v5695_v0  ;;  %1082 = vmatpush2.bf16.msra.mxu1 %v5696_v51  ;;  %v5706_v0 = vld [vmem:[#allocation58_spill] sm:$0xff]  ;;  %v5707_v51 = vld [vmem:[#allocation59_spill] sm:$0xff] }
 0x190   :  { %1042 = vmatprep.subr.bf16.mxu0 %v5697_v53  ;;  %1083 = vmatprep.subr.bf16.mxu1 %v5698_v54  ;;  %v5708_v53 = vld [vmem:[#allocation60_spill] sm:$0xff]  ;;  %v5709_v54 = vld [vmem:[#allocation61_spill] sm:$0xff] }
 0x193   :  { %1043 = vmatpush2.bf16.msra.mxu0 %v5699_v52  ;;  %1084 = vmatpush2.bf16.msra.mxu1 %v5700_v58  ;;  %v5710_v52 = vld [vmem:[#allocation62_spill] sm:$0xff]  ;;  %v5711_v58 = vld [vmem:[#allocation63_spill] sm:$0xff] }
 0x194   :  { %1044 = vmatprep.subr.bf16.mxu0 %v5701_v59  ;;  %1085 = vmatprep.subr.bf16.mxu1 %v5702_v1  ;;  %v5712_v59 = vld [vmem:[#allocation64_spill] sm:$0xff]  ;;  %v5713_v1 = vld [vmem:[#allocation11_spill] sm:$0xff] }
 0x197   :  { %1045 = vmatpush2.bf16.msra.mxu0 %v5703_v2  ;;  %1086 = vmatpush2.bf16.msra.mxu1 %v5704_v61  ;;  %v5714_v2 = vld [vmem:[#allocation12_spill] sm:$0xff]  ;;  %v5715_v61 = vld [vmem:[#allocation65_spill] sm:$0xff] }
 0x198   :  { %1046 = vmatprep.subr.bf16.mxu0 %v5705_v55  ;;  %1087 = vmatprep.subr.bf16.mxu1 %v5706_v0  ;;  %v153_v55 = vsub.s32 0, %v5715_v61  ;;  %v161_v60 = vsub.s32 2, %v5715_v61  ;;  %v165_v47 = vsub.s32 3, %v5715_v61 }
 0x19b   :  { %1047 = vmatpush2.bf16.msra.mxu0 %v5707_v51  ;;  %1088 = vmatpush2.bf16.msra.mxu1 %v5708_v53  ;;  %v149_v51 = vld [vmem:[%s5320_s3] sm:$0xf]  ;;  %v157_v53 = vsub.s32 1, %v5715_v61 }
 0x19c   :  { %1048 = vmatprep.subr.bf16.mxu0 %v5709_v54  ;;  %1089 = vmatprep.subr.bf16.mxu1 %v5710_v52  ;;  %v4025_v0 = vrot.slane %v149_v51, %v153_v55 }
 0x19d   :  { %v4027_v54 = vrot.slane %v149_v51, %v157_v53  ;;  %v4032_v53 = vrot.slane %v149_v51, %v161_v60 }
 0x19e   :  { %5716 = vst [vmem:[#allocation11_spill] sm:$0xff] %v4025_v0 }
 0x19f   :  { %1049 = vmatpush2.bf16.msra.mxu0 %v5711_v58  ;;  %1090 = vmatpush2.bf16.msra.mxu1 %v5712_v59  ;;  %5717 = vst [vmem:[#allocation12_spill] sm:$0xff] %v4027_v54  ;;  %5718 = vst [vmem:[#allocation65_spill] sm:$0xff] %v4032_v53 }
 0x1a0   :  { %1130 = vmatprep.subr.bf16.mxu0 %v5713_v1  ;;  %1171 = vmatprep.subr.bf16.mxu1 %v5714_v2 }
 0x202   :  { %v813_v52 = vpop.f32.mrf.mxu0  ;;  %v854_v58 = vpop.f32.mrf.mxu1 }
 0x203   :  { %v861_v59 = vadd.f32 %v813_v52, %v4025_v0  ;;  %v863_v52 = vadd.f32 %v854_v58, %v4032_v53  ;;  %v4036_v0 = vrot.slane %v149_v51, %v165_v47 }
 0x204   :  { %v815_v62 = vpop.f32.mrf.mxu0  ;;  %v856_v1 = vpop.f32.mrf.mxu1 }
 0x205   :  { %v2769_v63 = vmul.f32 -1.442695, %v861_v59  ;;  %v862_v2 = vadd.f32 %v815_v62, %v4027_v54  ;;  %5719 = vst [vmem:[#allocation66_spill] sm:$0xff] %v4036_v0  ;;  %v2771_v59 = vmul.f32 -1.442695, %v863_v52  ;;  %v864_v62 = vadd.f32 %v856_v1, %v4036_v0 }
 0x206   :  { %v817_v50 = vpop.f32.mrf.mxu0  ;;  %v858_v49 = vpop.f32.mrf.mxu1 }
 0x207   :  { %3024 = vpow2.f32 %v2769_v63  ;;  %v2770_v4 = vmul.f32 -1.442695, %v862_v2 }
 0x208   :  { %v818_v3 = vpop.f32.mrf.mxu0  ;;  %v859_v55 = vpop.f32.mrf.mxu1 }
 0x209   :  { %3026 = vpow2.f32 %v2770_v4 }
 0x20a   :  { %3028 = vpow2.f32 %v2771_v59 }
 0x214   :  { %v3025_v46 = vpop.eup %3024 }
 0x215   :  { %v874_v54 = vadd.f32 1.0, %v3025_v46 }
 0x216   :  { %v3027_v50 = vpop.eup %3026 }
 0x217   :  { %3030 = vrcp.f32 %v874_v54  ;;  %v875_v49 = vadd.f32 1.0, %v3027_v50  ;;  %v3029_v60 = vpop.eup %3028 }
 0x218   :  { %3032 = vtanh.f32 %v864_v62  ;;  %v876_v52 = vadd.f32 1.0, %v3029_v60  ;;  %v2772_v62 = vld [vmem:[%s5317_s0 + $0x8] sm:$0xff] }
 0x219   :  { %3034 = vrcp.f32 %v875_v49 }
 0x21a   :  { %3036 = vrcp.f32 %v876_v52 }
 0x222   :  { %v925_v3 = vpop.f32.mrf.mxu0  ;;  %v966_v4 = vpop.f32.mrf.mxu1 }
 0x224   :  { %v3031_v63 = vpop.eup %3030  ;;  %v927_v61 = vpop.f32.mrf.mxu0 }
 0x225   :  { %v968_v2 = vpop.f32.mrf.mxu1  ;;  %v3033_v58 = vpop.eup %3032  ;;  %v977_v47 = vcombine.low %v925_v3, %v927_v61 }
 0x226   :  { %v978_v51 = vcombine.low %v966_v4, %v968_v2  ;;  %v3035_v55 = vpop.eup %3034  ;;  %v929_v53 = vpop.f32.mrf.mxu0  ;;  %v885_v0 = vmul.f32 %v3033_v58, %v3031_v63 }
 0x227   :  { %v970_v1 = vpop.f32.mrf.mxu1  ;;  %v884_v46 = vmul.f32 0.0, %v3035_v55  ;;  %v985_v54 = vrot.slane %v977_v47, %v3912_v57  ;;  %v3037_v60 = vpop.eup %3036 }
 0x228   :  { %v992_v59 = vrot.slane %v978_v51, %v3912_v57  ;;  %v930_v50 = vpop.f32.mrf.mxu0 }
 0x229   :  { %v971_v49 = vpop.f32.mrf.mxu1  ;;  %v4044_v45 = vadd.f32 %v885_v0, %v884_v46 }
 0x22a   :  { %v993_v3 = vcombine.low %v985_v54, %v992_v59 }
 0x22b   :  { %3038 = vtanh.f32 %v4044_v45 }
 0x22c   :  { %v995_v4 = vadd.f32 %v2772_v62, %v993_v3  ;;  %v4054_v3 = vld [vmem:[%s5318_s1 + $0xe0] ss:$16 sps:$4 sm:$0xff]  }
 0x22e   :  { %v2773_v53 = vmul.f32 -1.442695, %v995_v4  ;;  %v1003_v51 = vrot.slane %v995_v4, 6  ;;  %v5760_v4 = vld [vmem:[#allocation53_spill] sm:$0xff] }
 0x230   :  { %3040 = vpow2.f32 %v2773_v53  ;;  %v5761_v53 = vld [vmem:[#allocation54_spill] sm:$0xff] }
 0x238   :  { %v3039_v63 = vpop.eup %3038 }
 0x239   :  { %v888_v61 = vmul.f32 %v3039_v63, %v3037_v60  ;;  %v5762_v60 = vld [vmem:[#allocation55_spill] sm:$0xff]  ;;  %v5763_v63 = vld [vmem:[#allocation56_spill] sm:$0xff] }
 0x23b   :  { %v1017_v2 = vpack.c.bf16 %v888_v61, %v888_v61  ;;  %v5764_v61 = vld [vmem:[#allocation57_spill] sm:$0xff] }
 0x23d   :  { %v3041_v58 = vpop.eup %3040  ;;  %1050 = vmatprep.mubr.bf16.mxu0 %v1017_v2  ;;  %1091 = vmatprep.mubr.bf16.mxu1 %v1017_v2  ;;  %v5765_v2 = vld [vmem:[#allocation58_spill] sm:$0xff] }
 0x23e   :  { %v999_v47 = vadd.f32 1.0, %v3041_v58  ;;  %v5766_v58 = vld [vmem:[#allocation59_spill] sm:$0xff] }
 0x240   :  { %3042 = vrcp.f32 %v999_v47  ;;  %v5767_v47 = vld [vmem:[#allocation60_spill] sm:$0xff] }
 0x241   :  { %3044 = vtanh.f32 %v1003_v51  ;;  %v5768_v51 = vld [vmem:[#allocation61_spill] sm:$0xff] }
 0x24d   :  { %v3043_v0 = vpop.eup %3042 }
 0x24e   :  { %v1007_v55 = vrot.slane %v3043_v0, 2  ;;  %v3045_v1 = vpop.eup %3044  ;;  %v1013_v59 = vrot.slane %v3043_v0, 4 }
 0x24f   :  { %v1010_v52 = vmul.f32 %v3045_v1, %v3043_v0  ;;  %v5769_v0 = vld [vmem:[#allocation62_spill] sm:$0xff]  ;;  %v5771_v1 = vld [vmem:[#allocation64_spill] sm:$0xff] }
 0x250   :  { %v1009_v46 = vmul.f32 %v1007_v55, %v3919_v56  ;;  %v4060_v56 = vld [vmem:[%s5318_s1 + $0xe8] ss:$16 sps:$4 sm:$0xff]  }
 0x251   :  { %v5770_v55 = vld [vmem:[#allocation63_spill] sm:$0xff] }
 0x252   :  { %v4048_v54 = vadd.f32 %v1010_v52, %v1009_v46  ;;  %v4160_v52 = vld [vmem:[%s5318_s1 + $0xe4] ss:$16 sps:$4 sm:$0xff]   ;;  %v4166_v46 = vld [vmem:[%s5318_s1 + $0xec] ss:$16 sps:$4 sm:$0xff]  }
 0x254   :  { %3046 = vtanh.f32 %v4048_v54 }
 0x261   :  { %v3047_v62 = vpop.eup %3046 }
 0x262   :  { %v1015_v50 = vmul.f32 %v3047_v62, %v1013_v59 }
 0x264   :  { %v1016_v49 = vpack.c.bf16 %v1015_v50, %v1015_v50  ;;  %v5774_v50 = vld [vmem:[#allocation11_spill] sm:$0xff] }
 0x266   :  { %1051 = vmatmul.mubr.bf16.vlgmr.msra.gmra.mxu0 %v1016_v49  ;;  %1092 = vmatmul.mubr.bf16.vlgmr.msra.gmra.mxu1 %v1016_v49 }
 0x267   :  { %1131 = vmatpush1.bf16.msra.mxu0 %v4054_v3  ;;  %1172 = vmatpush1.bf16.msra.mxu1 %v4060_v56 }
 0x268   :  { %1132 = vmatprep.subr.bf16.mxu0 %v3546_v5  ;;  %1173 = vmatprep.subr.bf16.mxu1 %v3553_v6  ;;  %v5720_v5 = vld [vmem:[#allocation13_spill] sm:$0xff]  ;;  %v5721_v6 = vld [vmem:[#allocation14_spill] sm:$0xff] }
 0x269   :  { %1162 = vmatprep.mubr.bf16.mxu0 %v5663_v48  ;;  %1203 = vmatprep.mubr.bf16.mxu1 %v5663_v48  ;;  %5772 = vst [vmem:[#allocation13_spill] sm:$0xff] %v4160_v52  ;;  %5773 = vst [vmem:[#allocation14_spill] sm:$0xff] %v4166_v46 }
 0x26b   :  { %1133 = vmatpush1.bf16.msra.mxu0 %v3558_v7  ;;  %1174 = vmatpush1.bf16.msra.mxu1 %v3564_v8  ;;  %v5722_v7 = vld [vmem:[#allocation15_spill] sm:$0xff]  ;;  %v5723_v8 = vld [vmem:[#allocation16_spill] sm:$0xff] }
 0x26c   :  { %1134 = vmatprep.subr.bf16.mxu0 %v3570_v9  ;;  %1175 = vmatprep.subr.bf16.mxu1 %v3575_v10  ;;  %v5724_v9 = vld [vmem:[#allocation17_spill] sm:$0xff]  ;;  %v5725_v10 = vld [vmem:[#allocation18_spill] sm:$0xff] }
 0x26f   :  { %1135 = vmatpush1.bf16.msra.mxu0 %v3580_v11  ;;  %1176 = vmatpush1.bf16.msra.mxu1 %v3585_v12  ;;  %v5726_v11 = vld [vmem:[#allocation19_spill] sm:$0xff]  ;;  %v5727_v12 = vld [vmem:[#allocation20_spill] sm:$0xff] }
 0x270   :  { %1136 = vmatprep.subr.bf16.mxu0 %v3592_v13  ;;  %1177 = vmatprep.subr.bf16.mxu1 %v3599_v14  ;;  %v5728_v13 = vld [vmem:[#allocation21_spill] sm:$0xff]  ;;  %v5729_v14 = vld [vmem:[#allocation22_spill] sm:$0xff] }
 0x273   :  { %1137 = vmatpush1.bf16.msra.mxu0 %v3604_v15  ;;  %1178 = vmatpush1.bf16.msra.mxu1 %v3611_v16  ;;  %v5730_v15 = vld [vmem:[#allocation23_spill] sm:$0xff]  ;;  %v5731_v16 = vld [vmem:[#allocation24_spill] sm:$0xff] }
 0x274   :  { %1138 = vmatprep.subr.bf16.mxu0 %v3616_v17  ;;  %1179 = vmatprep.subr.bf16.mxu1 %v3623_v18  ;;  %v5732_v17 = vld [vmem:[#allocation25_spill] sm:$0xff]  ;;  %v5733_v18 = vld [vmem:[#allocation26_spill] sm:$0xff] }
 0x277   :  { %1139 = vmatpush1.bf16.msra.mxu0 %v3628_v19  ;;  %1180 = vmatpush1.bf16.msra.mxu1 %v3633_v20  ;;  %v5734_v19 = vld [vmem:[#allocation27_spill] sm:$0xff]  ;;  %v5735_v20 = vld [vmem:[#allocation28_spill] sm:$0xff] }
 0x278   :  { %1140 = vmatprep.subr.bf16.mxu0 %v3640_v21  ;;  %1181 = vmatprep.subr.bf16.mxu1 %v3647_v22  ;;  %v5736_v21 = vld [vmem:[#allocation29_spill] sm:$0xff]  ;;  %v5737_v22 = vld [vmem:[#allocation30_spill] sm:$0xff] }
 0x27b   :  { %1141 = vmatpush1.bf16.msra.mxu0 %v3652_v23  ;;  %1182 = vmatpush1.bf16.msra.mxu1 %v3659_v24  ;;  %v5738_v23 = vld [vmem:[#allocation31_spill] sm:$0xff]  ;;  %v5739_v24 = vld [vmem:[#allocation32_spill] sm:$0xff] }
 0x27c   :  { %1142 = vmatprep.subr.bf16.mxu0 %v3664_v25  ;;  %1183 = vmatprep.subr.bf16.mxu1 %v3671_v26  ;;  %v5740_v25 = vld [vmem:[#allocation33_spill] sm:$0xff]  ;;  %v5741_v26 = vld [vmem:[#allocation34_spill] sm:$0xff] }
 0x27f   :  { %1143 = vmatpush1.bf16.msra.mxu0 %v3676_v27  ;;  %1184 = vmatpush1.bf16.msra.mxu1 %v3681_v28  ;;  %v5742_v27 = vld [vmem:[#allocation35_spill] sm:$0xff]  ;;  %v5743_v28 = vld [vmem:[#allocation36_spill] sm:$0xff] }
 0x280   :  { %1144 = vmatprep.subr.bf16.mxu0 %v3686_v29  ;;  %1185 = vmatprep.subr.bf16.mxu1 %v3691_v30  ;;  %v5744_v29 = vld [vmem:[#allocation37_spill] sm:$0xff]  ;;  %v5745_v30 = vld [vmem:[#allocation38_spill] sm:$0xff] }
 0x283   :  { %1145 = vmatpush1.bf16.msra.mxu0 %v3700_v31  ;;  %1186 = vmatpush1.bf16.msra.mxu1 %v3705_v32  ;;  %v5746_v31 = vld [vmem:[#allocation39_spill] sm:$0xff]  ;;  %v5747_v32 = vld [vmem:[#allocation40_spill] sm:$0xff] }
 0x284   :  { %1257 = vmatprep.subr.bf16.mxu0 %v3715_v33  ;;  %1298 = vmatprep.subr.bf16.mxu1 %v3717_v34  ;;  %v5748_v33 = vld [vmem:[#allocation41_spill] sm:$0xff]  ;;  %v5749_v34 = vld [vmem:[#allocation42_spill] sm:$0xff] }
 0x286   :  { %1163 = vmatmul.mubr.bf16.vlgmr.msra.gmra.mxu0 %v1016_v49  ;;  %1204 = vmatmul.mubr.bf16.vlgmr.msra.gmra.mxu1 %v1016_v49 }
 0x287   :  { %1258 = vmatpush1.bf16.msra.mxu0 %v3719_v35  ;;  %1299 = vmatpush1.bf16.msra.mxu1 %v3721_v36  ;;  %v5750_v35 = vld [vmem:[#allocation43_spill] sm:$0xff]  ;;  %v5751_v36 = vld [vmem:[#allocation44_spill] sm:$0xff] }
 0x288   :  { %1259 = vmatprep.subr.bf16.mxu0 %v3727_v37  ;;  %1300 = vmatprep.subr.bf16.mxu1 %v3729_v38  ;;  %v5752_v37 = vld [vmem:[#allocation45_spill] sm:$0xff]  ;;  %v5753_v38 = vld [vmem:[#allocation46_spill] sm:$0xff] }
 0x28b   :  { %1260 = vmatpush1.bf16.msra.mxu0 %v3731_v39  ;;  %1301 = vmatpush1.bf16.msra.mxu1 %v3733_v40  ;;  %v5754_v39 = vld [vmem:[#allocation47_spill] sm:$0xff]  ;;  %v5755_v40 = vld [vmem:[#allocation48_spill] sm:$0xff] }
 0x28c   :  { %1261 = vmatprep.subr.bf16.mxu0 %v3739_v41  ;;  %1302 = vmatprep.subr.bf16.mxu1 %v3741_v42  ;;  %v5756_v41 = vld [vmem:[#allocation49_spill] sm:$0xff]  ;;  %v5757_v42 = vld [vmem:[#allocation50_spill] sm:$0xff] }
 0x28f   :  { %1262 = vmatpush1.bf16.msra.mxu0 %v3743_v43  ;;  %1303 = vmatpush1.bf16.msra.mxu1 %v3745_v44  ;;  %v5758_v43 = vld [vmem:[#allocation51_spill] sm:$0xff]  ;;  %v5759_v44 = vld [vmem:[#allocation52_spill] sm:$0xff] }
 0x290   :  { %1263 = vmatprep.subr.bf16.mxu0 %v5720_v5  ;;  %1304 = vmatprep.subr.bf16.mxu1 %v5721_v6 }
 0x293   :  { %1264 = vmatpush1.bf16.msra.mxu0 %v5722_v7  ;;  %1305 = vmatpush1.bf16.msra.mxu1 %v5723_v8  ;;  %v5775_v8 = vld [vmem:[#allocation12_spill] sm:$0xff] }
 0x294   :  { %1265 = vmatprep.subr.bf16.mxu0 %v5724_v9  ;;  %1306 = vmatprep.subr.bf16.mxu1 %v5725_v10 }
 0x297   :  { %1266 = vmatpush1.bf16.msra.mxu0 %v5726_v11  ;;  %1307 = vmatpush1.bf16.msra.mxu1 %v5727_v12 }
 0x298   :  { %1267 = vmatprep.subr.bf16.mxu0 %v5728_v13  ;;  %1308 = vmatprep.subr.bf16.mxu1 %v5729_v14 }
 0x29b   :  { %1268 = vmatpush1.bf16.msra.mxu0 %v5730_v15  ;;  %1309 = vmatpush1.bf16.msra.mxu1 %v5731_v16  ;;  %v5776_v15 = vld [vmem:[#allocation65_spill] sm:$0xff] }
 0x29c   :  { %1269 = vmatprep.subr.bf16.mxu0 %v5732_v17  ;;  %1310 = vmatprep.subr.bf16.mxu1 %v5733_v18 }
 0x29f   :  { %1270 = vmatpush1.bf16.msra.mxu0 %v5734_v19  ;;  %1311 = vmatpush1.bf16.msra.mxu1 %v5735_v20  ;;  %v5777_v19 = vld [vmem:[#allocation66_spill] sm:$0xff] }
 0x2a0   :  { %1271 = vmatprep.subr.bf16.mxu0 %v5736_v21  ;;  %1312 = vmatprep.subr.bf16.mxu1 %v5737_v22 }
 0x2a3   :  { %1272 = vmatpush1.bf16.msra.mxu0 %v5738_v23  ;;  %1313 = vmatpush1.bf16.msra.mxu1 %v5739_v24 }
 0x2a4   :  { %1273 = vmatprep.subr.bf16.mxu0 %v5740_v25  ;;  %1314 = vmatprep.subr.bf16.mxu1 %v5741_v26 }
 0x2a7   :  { %1274 = vmatpush2.bf16.msra.mxu0 %v5742_v27  ;;  %1315 = vmatpush2.bf16.msra.mxu1 %v5743_v28 }
 0x2a8   :  { %1275 = vmatprep.subr.bf16.mxu0 %v5744_v29  ;;  %1316 = vmatprep.subr.bf16.mxu1 %v5745_v30 }
 0x2ab   :  { %1276 = vmatpush2.bf16.msra.mxu0 %v5746_v31  ;;  %1317 = vmatpush2.bf16.msra.mxu1 %v5747_v32 }
 0x2ac   :  { %1277 = vmatprep.subr.bf16.mxu0 %v5748_v33  ;;  %1318 = vmatprep.subr.bf16.mxu1 %v5749_v34 }
 0x2af   :  { %1278 = vmatpush2.bf16.msra.mxu0 %v5750_v35  ;;  %1319 = vmatpush2.bf16.msra.mxu1 %v5751_v36 }
 0x2b0   :  { %1279 = vmatprep.subr.bf16.mxu0 %v5752_v37  ;;  %1320 = vmatprep.subr.bf16.mxu1 %v5753_v38 }
 0x2b3   :  { %1280 = vmatpush2.bf16.msra.mxu0 %v5754_v39  ;;  %1321 = vmatpush2.bf16.msra.mxu1 %v5755_v40 }
 0x2b4   :  { %1281 = vmatprep.subr.bf16.mxu0 %v5756_v41  ;;  %1322 = vmatprep.subr.bf16.mxu1 %v5757_v42  ;;  %v2777_v41 = vld [vmem:[%s5317_s0 + $0x10] sm:$0xff] }
 0x2b7   :  { %1282 = vmatpush2.bf16.msra.mxu0 %v5758_v43  ;;  %1323 = vmatpush2.bf16.msra.mxu1 %v5759_v44 }
 0x2b8   :  { %1283 = vmatprep.subr.bf16.mxu0 %v5760_v4  ;;  %1324 = vmatprep.subr.bf16.mxu1 %v5761_v53 }
 0x2bb   :  { %1284 = vmatpush2.bf16.msra.mxu0 %v5762_v60  ;;  %1325 = vmatpush2.bf16.msra.mxu1 %v5763_v63 }
 0x2bc   :  { %1285 = vmatprep.subr.bf16.mxu0 %v5764_v61  ;;  %1326 = vmatprep.subr.bf16.mxu1 %v5765_v2 }
 0x2bf   :  { %1286 = vmatpush2.bf16.msra.mxu0 %v5766_v58  ;;  %1327 = vmatpush2.bf16.msra.mxu1 %v5767_v47 }
 0x2c0   :  { %1287 = vmatprep.subr.bf16.mxu0 %v5768_v51  ;;  %1328 = vmatprep.subr.bf16.mxu1 %v5769_v0 }
 0x2c3   :  { %1288 = vmatpush2.bf16.msra.mxu0 %v5770_v55  ;;  %1329 = vmatpush2.bf16.msra.mxu1 %v5771_v1 }
 0x2c4   :  { %1369 = vmatprep.subr.bf16.mxu0 %v4160_v52  ;;  %1410 = vmatprep.subr.bf16.mxu1 %v4166_v46 }
 0x326   :  { %v1052_v59 = vpop.f32.mrf.mxu0  ;;  %v1093_v62 = vpop.f32.mrf.mxu1 }
 0x327   :  { %v1100_v49 = vadd.f32 %v1052_v59, %v5774_v50  ;;  %v1102_v16 = vadd.f32 %v1093_v62, %v5776_v15 }
 0x328   :  { %v1054_v5 = vpop.f32.mrf.mxu0  ;;  %v1095_v6 = vpop.f32.mrf.mxu1 }
 0x329   :  { %v2774_v7 = vmul.f32 -1.442695, %v1100_v49  ;;  %v1101_v9 = vadd.f32 %v1054_v5, %v5775_v8  ;;  %v2776_v17 = vmul.f32 -1.442695, %v1102_v16  ;;  %v1103_v20 = vadd.f32 %v1095_v6, %v5777_v19 }
 0x32a   :  { %v1056_v10 = vpop.f32.mrf.mxu0  ;;  %v1097_v11 = vpop.f32.mrf.mxu1 }
 0x32b   :  { %3048 = vpow2.f32 %v2774_v7  ;;  %v2775_v12 = vmul.f32 -1.442695, %v1101_v9 }
 0x32c   :  { %v1057_v13 = vpop.f32.mrf.mxu0  ;;  %v1098_v14 = vpop.f32.mrf.mxu1 }
 0x32d   :  { %3050 = vpow2.f32 %v2775_v12 }
 0x32e   :  { %3052 = vpow2.f32 %v2776_v17  ;;  %v4201_v17 = vld [vmem:[%s5318_s1 + $0xcc] ss:$16 sps:$4 sm:$0xff]  }
 0x338   :  { %v3049_v18 = vpop.eup %3048 }
 0x339   :  { %v1113_v21 = vadd.f32 1.0, %v3049_v18  ;;  %v4209_v18 = vld [vmem:[%s5318_s1 + $0xc0] ss:$16 sps:$4 sm:$0xff]  }
 0x33a   :  { %v3051_v22 = vpop.eup %3050 }
 0x33b   :  { %3054 = vrcp.f32 %v1113_v21  ;;  %v1114_v23 = vadd.f32 1.0, %v3051_v22  ;;  %v3053_v26 = vpop.eup %3052  ;;  %v4221_v21 = vld [vmem:[%s5318_s1 + $0xa4] ss:$16 sps:$4 sm:$0xff]   ;;  %v4227_v22 = vld [vmem:[%s5318_s1 + $0xac] ss:$16 sps:$4 sm:$0xff]  }
 0x33c   :  { %3056 = vtanh.f32 %v1103_v20  ;;  %v1115_v34 = vadd.f32 1.0, %v3053_v26  ;;  %v4215_v20 = vld [vmem:[%s5318_s1 + $0xc8] ss:$16 sps:$4 sm:$0xff]   ;;  %v4251_v26 = vld [vmem:[%s5318_s1 + $0x8c] ss:$16 sps:$4 sm:$0xff]  }
 0x33d   :  { %3058 = vrcp.f32 %v1114_v23  ;;  %v4233_v23 = vld [vmem:[%s5318_s1 + $0xa0] ss:$16 sps:$4 sm:$0xff]  }
 0x33e   :  { %3060 = vrcp.f32 %v1115_v34  ;;  %v4299_v34 = vld [vmem:[%s5318_s1 + $0x4c] ss:$16 sps:$4 sm:$0xff]  }
 0x346   :  { %v1164_v24 = vpop.f32.mrf.mxu0  ;;  %v1205_v25 = vpop.f32.mrf.mxu1 }
 0x348   :  { %v3055_v27 = vpop.eup %3054  ;;  %v1166_v28 = vpop.f32.mrf.mxu0 }
 0x349   :  { %v1207_v29 = vpop.f32.mrf.mxu1  ;;  %v3057_v30 = vpop.eup %3056  ;;  %v1216_v31 = vcombine.low %v1164_v24, %v1166_v28  ;;  %v4239_v24 = vld [vmem:[%s5318_s1 + $0xa8] ss:$16 sps:$4 sm:$0xff]  }
 0x34a   :  { %v1217_v32 = vcombine.low %v1205_v25, %v1207_v29  ;;  %v3059_v33 = vpop.eup %3058  ;;  %v1168_v35 = vpop.f32.mrf.mxu0  ;;  %v1124_v38 = vmul.f32 %v3057_v30, %v3055_v27  ;;  %v4245_v25 = vld [vmem:[%s5318_s1 + $0x84] ss:$16 sps:$4 sm:$0xff]   ;;  %v4257_v27 = vld [vmem:[%s5318_s1 + $0x80] ss:$16 sps:$4 sm:$0xff]   ;;  %v4263_v28 = vld [vmem:[%s5318_s1 + $0x88] ss:$16 sps:$4 sm:$0xff]  }
 0x34b   :  { %v1209_v36 = vpop.f32.mrf.mxu1  ;;  %v1123_v37 = vmul.f32 %v3059_v33, %v4044_v45  ;;  %v1224_v39 = vrot.slane %v1216_v31, %v3912_v57  ;;  %v3061_v45 = vpop.eup %3060  ;;  %v4269_v29 = vld [vmem:[%s5318_s1 + $0x64] ss:$16 sps:$4 sm:$0xff]   ;;  %v4275_v30 = vld [vmem:[%s5318_s1 + $0x6c] ss:$16 sps:$4 sm:$0xff]   ;;  %v4281_v31 = vld [vmem:[%s5318_s1 + $0x60] ss:$16 sps:$4 sm:$0xff]  }
 0x34c   :  { %v1231_v40 = vrot.slane %v1217_v32, %v3912_v57  ;;  %v1169_v42 = vpop.f32.mrf.mxu0  ;;  %v4287_v32 = vld [vmem:[%s5318_s1 + $0x68] ss:$16 sps:$4 sm:$0xff]   ;;  %v4293_v33 = vld [vmem:[%s5318_s1 + $0x44] ss:$16 sps:$4 sm:$0xff]   ;;  %v4305_v35 = vld [vmem:[%s5318_s1 + $0x40] ss:$16 sps:$4 sm:$0xff]  }
 0x34d   :  { %v1210_v43 = vpop.f32.mrf.mxu1  ;;  %v4179_v44 = vadd.f32 %v1124_v38, %v1123_v37  ;;  %v4311_v36 = vld [vmem:[%s5318_s1 + $0x48] ss:$16 sps:$4 sm:$0xff]   ;;  %v4317_v37 = vld [vmem:[%s5318_s1 + $0x24] ss:$16 sps:$4 sm:$0xff]   ;;  %v4323_v38 = vld [vmem:[%s5318_s1 + $0x2c] ss:$16 sps:$4 sm:$0xff]  }
 0x34e   :  { %v1232_v4 = vcombine.low %v1224_v39, %v1231_v40  ;;  %v4329_v39 = vld [vmem:[%s5318_s1 + $0x20] ss:$16 sps:$4 sm:$0xff]   ;;  %v4335_v40 = vld [vmem:[%s5318_s1 + $0x28] ss:$16 sps:$4 sm:$0xff]   ;;  %v4347_v42 = vld [vmem:[%s5318_s1 + $0xc] ss:$16 sps:$4 sm:$0xff]  }
 0x34f   :  { %3062 = vtanh.f32 %v4179_v44  ;;  %v4353_v43 = vld [vmem:[%s5318_s1] ss:$16 sps:$4 sm:$0xff]  }
 0x350   :  { %v1234_v53 = vadd.f32 %v2777_v41, %v1232_v4  ;;  %v4341_v41 = vld [vmem:[%s5318_s1 + $0x4] ss:$16 sps:$4 sm:$0xff]   ;;  %v4359_v4 = vld [vmem:[%s5318_s1 + $0x8] ss:$16 sps:$4 sm:$0xff]  }
 0x352   :  { %v2778_v60 = vmul.f32 -1.442695, %v1234_v53  ;;  %v1242_v49 = vrot.slane %v1234_v53, 6  ;;  %v4362_v53 = vld [vmem:[#allocation2 + $0xe4] ss:$16 sps:$4 sm:$0xff]  }
 0x354   :  { %3064 = vpow2.f32 %v2778_v60  ;;  %v4365_v60 = vld [vmem:[#allocation2 + $0xec] ss:$16 sps:$4 sm:$0xff]  }
 0x35c   :  { %v3063_v63 = vpop.eup %3062 }
 0x35d   :  { %v1127_v61 = vmul.f32 %v3063_v63, %v3061_v45  ;;  %v4370_v45 = vld [vmem:[#allocation2 + $0xe0] ss:$16 sps:$4 sm:$0xff]   ;;  %v4373_v63 = vld [vmem:[#allocation2 + $0xe8] ss:$16 sps:$4 sm:$0xff]  }
 0x35f   :  { %v1256_v2 = vpack.c.bf16 %v1127_v61, %v1127_v61  ;;  %v4376_v61 = vld [vmem:[#allocation2 + $0xc4] ss:$16 sps:$4 sm:$0xff]  }
 0x361   :  { %v3065_v59 = vpop.eup %3064  ;;  %1289 = vmatprep.mubr.bf16.mxu0 %v1256_v2  ;;  %1330 = vmatprep.mubr.bf16.mxu1 %v1256_v2  ;;  %v4379_v2 = vld [vmem:[#allocation2 + $0xcc] ss:$16 sps:$4 sm:$0xff]  }
 0x362   :  { %v1238_v62 = vadd.f32 1.0, %v3065_v59  ;;  %v4382_v59 = vld [vmem:[#allocation2 + $0xc0] ss:$16 sps:$4 sm:$0xff]  }
 0x364   :  { %3066 = vrcp.f32 %v1238_v62  ;;  %v4385_v62 = vld [vmem:[#allocation2 + $0xc8] ss:$16 sps:$4 sm:$0xff]  }
 0x365   :  { %3068 = vtanh.f32 %v1242_v49  ;;  %v4388_v49 = vld [vmem:[#allocation2 + $0xa4] ss:$16 sps:$4 sm:$0xff]  }
 0x371   :  { %v3067_v5 = vpop.eup %3066 }
 0x372   :  { %v1246_v6 = vrot.slane %v3067_v5, 2  ;;  %v3069_v7 = vpop.eup %3068  ;;  %v1252_v12 = vrot.slane %v3067_v5, 4 }
 0x373   :  { %v1249_v9 = vmul.f32 %v3069_v7, %v3067_v5  ;;  %v4391_v5 = vld [vmem:[#allocation2 + $0xac] ss:$16 sps:$4 sm:$0xff]   ;;  %v4397_v7 = vld [vmem:[#allocation2 + $0xa8] ss:$16 sps:$4 sm:$0xff]  }
 0x374   :  { %v1248_v10 = vmul.f32 %v1246_v6, %v4048_v54  ;;  %v4195_v54 = vld [vmem:[%s5318_s1 + $0xc4] ss:$16 sps:$4 sm:$0xff]   ;;  %5778 = vst [vmem:[#allocation15_spill] sm:$0xff] %v4391_v5  ;;  %v4394_v6 = vld [vmem:[#allocation2 + $0xa0] ss:$16 sps:$4 sm:$0xff]   ;;  %5780 = vst [vmem:[#allocation17_spill] sm:$0xff] %v4397_v7 }
 0x375   :  { %5779 = vst [vmem:[#allocation16_spill] sm:$0xff] %v4394_v6 }
 0x376   :  { %v4183_v11 = vadd.f32 %v1249_v9, %v1248_v10  ;;  %v4400_v9 = vld [vmem:[#allocation2 + $0x84] ss:$16 sps:$4 sm:$0xff]   ;;  %v4403_v10 = vld [vmem:[#allocation2 + $0x8c] ss:$16 sps:$4 sm:$0xff]  }
 0x377   :  { %5781 = vst [vmem:[#allocation18_spill] sm:$0xff] %v4400_v9  ;;  %5782 = vst [vmem:[#allocation19_spill] sm:$0xff] %v4403_v10 }
 0x378   :  { %3070 = vtanh.f32 %v4183_v11 }
 0x385   :  { %v3071_v13 = vpop.eup %3070 }
 0x386   :  { %v1254_v14 = vmul.f32 %v3071_v13, %v1252_v12  ;;  %v4406_v12 = vld [vmem:[#allocation2 + $0x80] ss:$16 sps:$4 sm:$0xff]   ;;  %v4409_v13 = vld [vmem:[#allocation2 + $0x88] ss:$16 sps:$4 sm:$0xff]  }
 0x387   :  { %5783 = vst [vmem:[#allocation20_spill] sm:$0xff] %v4406_v12  ;;  %5784 = vst [vmem:[#allocation21_spill] sm:$0xff] %v4409_v13 }
 0x388   :  { %v4186_v16 = vpack.c.bf16 %v1254_v14, %v1254_v14  ;;  %v4412_v14 = vld [vmem:[#allocation2 + $0x64] ss:$16 sps:$4 sm:$0xff]  }
 0x389   :  { %5785 = vst [vmem:[#allocation22_spill] sm:$0xff] %v4412_v14 }
 0x38a   :  { %1290 = vmatmul.mubr.bf16.vlgmr.msra.gmra.mxu0 %v4186_v16  ;;  %1331 = vmatmul.mubr.bf16.vlgmr.msra.gmra.mxu1 %v4186_v16 }
 0x38b   :  { %1370 = vmatpush1.bf16.msra.mxu0 %v4054_v3  ;;  %1411 = vmatpush1.bf16.msra.mxu1 %v4060_v56 }
 0x38c   :  { %1371 = vmatprep.subr.bf16.mxu0 %v4195_v54  ;;  %1412 = vmatprep.subr.bf16.mxu1 %v4201_v17 }
 0x38d   :  { %1401 = vmatprep.mubr.bf16.mxu0 %v5663_v48  ;;  %1442 = vmatprep.mubr.bf16.mxu1 %v5663_v48 }
 0x38f   :  { %1372 = vmatpush1.bf16.msra.mxu0 %v4209_v18  ;;  %1413 = vmatpush1.bf16.msra.mxu1 %v4215_v20 }
 0x390   :  { %1373 = vmatprep.subr.bf16.mxu0 %v4221_v21  ;;  %1414 = vmatprep.subr.bf16.mxu1 %v4227_v22 }
 0x393   :  { %1374 = vmatpush1.bf16.msra.mxu0 %v4233_v23  ;;  %1415 = vmatpush1.bf16.msra.mxu1 %v4239_v24 }
 0x394   :  { %1375 = vmatprep.subr.bf16.mxu0 %v4245_v25  ;;  %1416 = vmatprep.subr.bf16.mxu1 %v4251_v26 }
 0x397   :  { %1376 = vmatpush1.bf16.msra.mxu0 %v4257_v27  ;;  %1417 = vmatpush1.bf16.msra.mxu1 %v4263_v28 }
 0x398   :  { %1377 = vmatprep.subr.bf16.mxu0 %v4269_v29  ;;  %1418 = vmatprep.subr.bf16.mxu1 %v4275_v30 }
 0x39b   :  { %1378 = vmatpush1.bf16.msra.mxu0 %v4281_v31  ;;  %1419 = vmatpush1.bf16.msra.mxu1 %v4287_v32 }
 0x39c   :  { %1379 = vmatprep.subr.bf16.mxu0 %v4293_v33  ;;  %1420 = vmatprep.subr.bf16.mxu1 %v4299_v34 }
 0x39f   :  { %1380 = vmatpush1.bf16.msra.mxu0 %v4305_v35  ;;  %1421 = vmatpush1.bf16.msra.mxu1 %v4311_v36 }
 0x3a0   :  { %1381 = vmatprep.subr.bf16.mxu0 %v4317_v37  ;;  %1422 = vmatprep.subr.bf16.mxu1 %v4323_v38 }
 0x3a3   :  { %1382 = vmatpush1.bf16.msra.mxu0 %v4329_v39  ;;  %1423 = vmatpush1.bf16.msra.mxu1 %v4335_v40 }
 0x3a4   :  { %1383 = vmatprep.subr.bf16.mxu0 %v4341_v41  ;;  %1424 = vmatprep.subr.bf16.mxu1 %v4347_v42 }
 0x3a7   :  { %1384 = vmatpush1.bf16.msra.mxu0 %v4353_v43  ;;  %1425 = vmatpush1.bf16.msra.mxu1 %v4359_v4 }
 0x3a8   :  { %1496 = vmatprep.subr.bf16.mxu0 %v4362_v53  ;;  %1537 = vmatprep.subr.bf16.mxu1 %v4365_v60 }
 0x3aa   :  { %1402 = vmatmul.mubr.bf16.vlgmr.msra.gmra.mxu0 %v4186_v16  ;;  %1443 = vmatmul.mubr.bf16.vlgmr.msra.gmra.mxu1 %v4186_v16  ;;  %v4415_v16 = vld [vmem:[#allocation2 + $0x6c] ss:$16 sps:$4 sm:$0xff]  }
 0x3ab   :  { %1497 = vmatpush1.bf16.msra.mxu0 %v4370_v45  ;;  %1538 = vmatpush1.bf16.msra.mxu1 %v4373_v63  ;;  %5786 = vst [vmem:[#allocation23_spill] sm:$0xff] %v4415_v16 }
 0x3ac   :  { %1498 = vmatprep.subr.bf16.mxu0 %v4376_v61  ;;  %1539 = vmatprep.subr.bf16.mxu1 %v4379_v2 }
 0x3af   :  { %1499 = vmatpush1.bf16.msra.mxu0 %v4382_v59  ;;  %1540 = vmatpush1.bf16.msra.mxu1 %v4385_v62 }
 0x3b0   :  { %1500 = vmatprep.subr.bf16.mxu0 %v4388_v49  ;;  %1541 = vmatprep.subr.bf16.mxu1 %v4391_v5 }
 0x3b3   :  { %1501 = vmatpush1.bf16.msra.mxu0 %v4394_v6  ;;  %1542 = vmatpush1.bf16.msra.mxu1 %v4397_v7 }
 0x3b4   :  { %1502 = vmatprep.subr.bf16.mxu0 %v4400_v9  ;;  %1543 = vmatprep.subr.bf16.mxu1 %v4403_v10  ;;  %v4418_v9 = vld [vmem:[#allocation2 + $0x60] ss:$16 sps:$4 sm:$0xff]   ;;  %v4421_v10 = vld [vmem:[#allocation2 + $0x68] ss:$16 sps:$4 sm:$0xff]  }
 0x3b5   :  { %5787 = vst [vmem:[#allocation24_spill] sm:$0xff] %v4418_v9  ;;  %5788 = vst [vmem:[#allocation25_spill] sm:$0xff] %v4421_v10 }
 0x3b7   :  { %1503 = vmatpush1.bf16.msra.mxu0 %v4406_v12  ;;  %1544 = vmatpush1.bf16.msra.mxu1 %v4409_v13  ;;  %v4424_v12 = vld [vmem:[#allocation2 + $0x44] ss:$16 sps:$4 sm:$0xff]   ;;  %v4427_v13 = vld [vmem:[#allocation2 + $0x4c] ss:$16 sps:$4 sm:$0xff]  }
 0x3b8   :  { %1504 = vmatprep.subr.bf16.mxu0 %v4412_v14  ;;  %1545 = vmatprep.subr.bf16.mxu1 %v4415_v16  ;;  %5789 = vst [vmem:[#allocation26_spill] sm:$0xff] %v4424_v12  ;;  %5790 = vst [vmem:[#allocation27_spill] sm:$0xff] %v4427_v13  ;;  %v4430_v14 = vld [vmem:[#allocation2 + $0x40] ss:$16 sps:$4 sm:$0xff]   ;;  %v4433_v16 = vld [vmem:[#allocation2 + $0x48] ss:$16 sps:$4 sm:$0xff]  }
 0x3b9   :  { %5791 = vst [vmem:[#allocation28_spill] sm:$0xff] %v4430_v14  ;;  %5792 = vst [vmem:[#allocation29_spill] sm:$0xff] %v4433_v16 }
 0x3bb   :  { %1505 = vmatpush1.bf16.msra.mxu0 %v4418_v9  ;;  %1546 = vmatpush1.bf16.msra.mxu1 %v4421_v10  ;;  %v4436_v9 = vld [vmem:[#allocation2 + $0x24] ss:$16 sps:$4 sm:$0xff]   ;;  %v4439_v10 = vld [vmem:[#allocation2 + $0x2c] ss:$16 sps:$4 sm:$0xff]  }
 0x3bc   :  { %1506 = vmatprep.subr.bf16.mxu0 %v4424_v12  ;;  %1547 = vmatprep.subr.bf16.mxu1 %v4427_v13  ;;  %5793 = vst [vmem:[#allocation30_spill] sm:$0xff] %v4436_v9  ;;  %5794 = vst [vmem:[#allocation31_spill] sm:$0xff] %v4439_v10  ;;  %v4442_v12 = vld [vmem:[#allocation2 + $0x20] ss:$16 sps:$4 sm:$0xff]   ;;  %v4445_v13 = vld [vmem:[#allocation2 + $0x28] ss:$16 sps:$4 sm:$0xff]  }
 0x3bd   :  { %5795 = vst [vmem:[#allocation32_spill] sm:$0xff] %v4442_v12  ;;  %5796 = vst [vmem:[#allocation33_spill] sm:$0xff] %v4445_v13 }
 0x3bf   :  { %1507 = vmatpush1.bf16.msra.mxu0 %v4430_v14  ;;  %1548 = vmatpush1.bf16.msra.mxu1 %v4433_v16  ;;  %v4448_v14 = vld [vmem:[#allocation2 + $0x4] ss:$16 sps:$4 sm:$0xff]   ;;  %v4451_v16 = vld [vmem:[#allocation2 + $0xc] ss:$16 sps:$4 sm:$0xff]  }
 0x3c0   :  { %1508 = vmatprep.subr.bf16.mxu0 %v4436_v9  ;;  %1549 = vmatprep.subr.bf16.mxu1 %v4439_v10  ;;  %5797 = vst [vmem:[#allocation34_spill] sm:$0xff] %v4448_v14  ;;  %5798 = vst [vmem:[#allocation35_spill] sm:$0xff] %v4451_v16  ;;  %v4454_v9 = vld [vmem:[#allocation2] ss:$16 sps:$4 sm:$0xff]   ;;  %v4457_v10 = vld [vmem:[#allocation2 + $0x8] ss:$16 sps:$4 sm:$0xff]  }
 0x3c1   :  { %5799 = vst [vmem:[#allocation36_spill] sm:$0xff] %v4454_v9  ;;  %5800 = vst [vmem:[#allocation37_spill] sm:$0xff] %v4457_v10 }
 0x3c3   :  { %1509 = vmatpush1.bf16.msra.mxu0 %v4442_v12  ;;  %1550 = vmatpush1.bf16.msra.mxu1 %v4445_v13  ;;  %v4460_v12 = vld [vmem:[#allocation2 + $0x1e4] ss:$16 sps:$4 sm:$0xff]   ;;  %v4463_v13 = vld [vmem:[#allocation2 + $0x1ec] ss:$16 sps:$4 sm:$0xff]  }
 0x3c4   :  { %1510 = vmatprep.subr.bf16.mxu0 %v4448_v14  ;;  %1551 = vmatprep.subr.bf16.mxu1 %v4451_v16  ;;  %5801 = vst [vmem:[#allocation38_spill] sm:$0xff] %v4460_v12  ;;  %5802 = vst [vmem:[#allocation39_spill] sm:$0xff] %v4463_v13  ;;  %v4466_v14 = vld [vmem:[#allocation2 + $0x1e0] ss:$16 sps:$4 sm:$0xff]   ;;  %v4469_v16 = vld [vmem:[#allocation2 + $0x1e8] ss:$16 sps:$4 sm:$0xff]  }
 0x3c5   :  { %5803 = vst [vmem:[#allocation40_spill] sm:$0xff] %v4466_v14  ;;  %5804 = vst [vmem:[#allocation41_spill] sm:$0xff] %v4469_v16 }
 0x3c7   :  { %1511 = vmatpush1.bf16.msra.mxu0 %v4454_v9  ;;  %1552 = vmatpush1.bf16.msra.mxu1 %v4457_v10  ;;  %v4472_v9 = vld [vmem:[#allocation2 + $0x1c4] ss:$16 sps:$4 sm:$0xff]   ;;  %v4475_v10 = vld [vmem:[#allocation2 + $0x1cc] ss:$16 sps:$4 sm:$0xff]  }
 0x3c8   :  { %1512 = vmatprep.subr.bf16.mxu0 %v4460_v12  ;;  %1553 = vmatprep.subr.bf16.mxu1 %v4463_v13  ;;  %5805 = vst [vmem:[#allocation42_spill] sm:$0xff] %v4472_v9  ;;  %5806 = vst [vmem:[#allocation43_spill] sm:$0xff] %v4475_v10  ;;  %v4478_v12 = vld [vmem:[#allocation2 + $0x1c0] ss:$16 sps:$4 sm:$0xff]   ;;  %v4481_v13 = vld [vmem:[#allocation2 + $0x1c8] ss:$16 sps:$4 sm:$0xff]  }
 0x3c9   :  { %5807 = vst [vmem:[#allocation44_spill] sm:$0xff] %v4478_v12  ;;  %5808 = vst [vmem:[#allocation45_spill] sm:$0xff] %v4481_v13 }
 0x3cb   :  { %1513 = vmatpush2.bf16.msra.mxu0 %v4466_v14  ;;  %1554 = vmatpush2.bf16.msra.mxu1 %v4469_v16  ;;  %v4484_v14 = vld [vmem:[#allocation2 + $0x1a4] ss:$16 sps:$4 sm:$0xff]   ;;  %v4487_v16 = vld [vmem:[#allocation2 + $0x1ac] ss:$16 sps:$4 sm:$0xff]  }
 0x3cc   :  { %1514 = vmatprep.subr.bf16.mxu0 %v4472_v9  ;;  %1555 = vmatprep.subr.bf16.mxu1 %v4475_v10  ;;  %5809 = vst [vmem:[#allocation46_spill] sm:$0xff] %v4484_v14  ;;  %5810 = vst [vmem:[#allocation47_spill] sm:$0xff] %v4487_v16  ;;  %v4490_v9 = vld [vmem:[#allocation2 + $0x1a0] ss:$16 sps:$4 sm:$0xff]   ;;  %v4493_v10 = vld [vmem:[#allocation2 + $0x1a8] ss:$16 sps:$4 sm:$0xff]  }
 0x3cd   :  { %5811 = vst [vmem:[#allocation48_spill] sm:$0xff] %v4490_v9  ;;  %5812 = vst [vmem:[#allocation49_spill] sm:$0xff] %v4493_v10 }
 0x3cf   :  { %1515 = vmatpush2.bf16.msra.mxu0 %v4478_v12  ;;  %1556 = vmatpush2.bf16.msra.mxu1 %v4481_v13  ;;  %v4496_v12 = vld [vmem:[#allocation2 + $0x184] ss:$16 sps:$4 sm:$0xff]   ;;  %v4499_v13 = vld [vmem:[#allocation2 + $0x18c] ss:$16 sps:$4 sm:$0xff]  }
 0x3d0   :  { %1516 = vmatprep.subr.bf16.mxu0 %v4484_v14  ;;  %1557 = vmatprep.subr.bf16.mxu1 %v4487_v16  ;;  %5813 = vst [vmem:[#allocation50_spill] sm:$0xff] %v4496_v12  ;;  %5814 = vst [vmem:[#allocation51_spill] sm:$0xff] %v4499_v13  ;;  %v4502_v14 = vld [vmem:[#allocation2 + $0x180] ss:$16 sps:$4 sm:$0xff]   ;;  %v4505_v16 = vld [vmem:[#allocation2 + $0x188] ss:$16 sps:$4 sm:$0xff]  }
 0x3d1   :  { %5815 = vst [vmem:[#allocation52_spill] sm:$0xff] %v4502_v14  ;;  %5816 = vst [vmem:[#allocation53_spill] sm:$0xff] %v4505_v16 }
 0x3d3   :  { %1517 = vmatpush2.bf16.msra.mxu0 %v4490_v9  ;;  %1558 = vmatpush2.bf16.msra.mxu1 %v4493_v10  ;;  %v4508_v9 = vld [vmem:[#allocation2 + $0x164] ss:$16 sps:$4 sm:$0xff]   ;;  %v4511_v10 = vld [vmem:[#allocation2 + $0x16c] ss:$16 sps:$4 sm:$0xff]  }
 0x3d4   :  { %1518 = vmatprep.subr.bf16.mxu0 %v4496_v12  ;;  %1559 = vmatprep.subr.bf16.mxu1 %v4499_v13  ;;  %5817 = vst [vmem:[#allocation54_spill] sm:$0xff] %v4508_v9  ;;  %5818 = vst [vmem:[#allocation55_spill] sm:$0xff] %v4511_v10  ;;  %v4514_v12 = vld [vmem:[#allocation2 + $0x160] ss:$16 sps:$4 sm:$0xff]   ;;  %v4517_v13 = vld [vmem:[#allocation2 + $0x168] ss:$16 sps:$4 sm:$0xff]  }
 0x3d5   :  { %5819 = vst [vmem:[#allocation56_spill] sm:$0xff] %v4514_v12  ;;  %5820 = vst [vmem:[#allocation57_spill] sm:$0xff] %v4517_v13 }
 0x3d7   :  { %1519 = vmatpush2.bf16.msra.mxu0 %v4502_v14  ;;  %1560 = vmatpush2.bf16.msra.mxu1 %v4505_v16  ;;  %v4520_v14 = vld [vmem:[#allocation2 + $0x144] ss:$16 sps:$4 sm:$0xff]   ;;  %v4523_v16 = vld [vmem:[#allocation2 + $0x14c] ss:$16 sps:$4 sm:$0xff]  }
 0x3d8   :  { %1520 = vmatprep.subr.bf16.mxu0 %v4508_v9  ;;  %1561 = vmatprep.subr.bf16.mxu1 %v4511_v10  ;;  %5821 = vst [vmem:[#allocation58_spill] sm:$0xff] %v4520_v14  ;;  %5822 = vst [vmem:[#allocation59_spill] sm:$0xff] %v4523_v16  ;;  %v4526_v9 = vld [vmem:[#allocation2 + $0x140] ss:$16 sps:$4 sm:$0xff]   ;;  %v4529_v10 = vld [vmem:[#allocation2 + $0x148] ss:$16 sps:$4 sm:$0xff]  }
 0x3d9   :  { %5823 = vst [vmem:[#allocation60_spill] sm:$0xff] %v4526_v9  ;;  %5824 = vst [vmem:[#allocation61_spill] sm:$0xff] %v4529_v10 }
 0x3db   :  { %1521 = vmatpush2.bf16.msra.mxu0 %v4514_v12  ;;  %1562 = vmatpush2.bf16.msra.mxu1 %v4517_v13  ;;  %v4532_v12 = vld [vmem:[#allocation2 + $0x124] ss:$16 sps:$4 sm:$0xff]   ;;  %v4535_v13 = vld [vmem:[#allocation2 + $0x12c] ss:$16 sps:$4 sm:$0xff]  }
 0x3dc   :  { %1522 = vmatprep.subr.bf16.mxu0 %v4520_v14  ;;  %1563 = vmatprep.subr.bf16.mxu1 %v4523_v16  ;;  %5825 = vst [vmem:[#allocation62_spill] sm:$0xff] %v4532_v12  ;;  %5826 = vst [vmem:[#allocation63_spill] sm:$0xff] %v4535_v13 }
 0x3df   :  { %1523 = vmatpush2.bf16.msra.mxu0 %v4526_v9  ;;  %1564 = vmatpush2.bf16.msra.mxu1 %v4529_v10 }
 0x3e0   :  { %1524 = vmatprep.subr.bf16.mxu0 %v4532_v12  ;;  %1565 = vmatprep.subr.bf16.mxu1 %v4535_v13 }
 0x3e3   :  { %1525 = vmatpush2.bf16.msra.mxu0 %v5766_v58  ;;  %1566 = vmatpush2.bf16.msra.mxu1 %v5767_v47 }
 0x3e4   :  { %1526 = vmatprep.subr.bf16.mxu0 %v5768_v51  ;;  %1567 = vmatprep.subr.bf16.mxu1 %v5769_v0 }
 0x3e7   :  { %1527 = vmatpush2.bf16.msra.mxu0 %v5770_v55  ;;  %1568 = vmatpush2.bf16.msra.mxu1 %v5771_v1 }
 0x3e8   :  { %1608 = vmatprep.subr.bf16.mxu0 %v4160_v52  ;;  %1649 = vmatprep.subr.bf16.mxu1 %v4166_v46 }
 0x44a   :  { %v1291_v12 = vpop.f32.mrf.mxu0  ;;  %v1332_v10 = vpop.f32.mrf.mxu1 }
 0x44b   :  { %v1339_v13 = vadd.f32 %v1291_v12, %v5774_v50  ;;  %v1341_v1 = vadd.f32 %v1332_v10, %v5776_v15 }
 0x44c   :  { %v1293_v9 = vpop.f32.mrf.mxu0  ;;  %v1334_v58 = vpop.f32.mrf.mxu1 }
 0x44d   :  { %v2779_v16 = vmul.f32 -1.442695, %v1339_v13  ;;  %v1340_v47 = vadd.f32 %v1293_v9, %v5775_v8  ;;  %v2781_v52 = vmul.f32 -1.442695, %v1341_v1  ;;  %v1342_v6 = vadd.f32 %v1334_v58, %v5777_v19 }
 0x44e   :  { %v1295_v51 = vpop.f32.mrf.mxu0  ;;  %v1336_v14 = vpop.f32.mrf.mxu1 }
 0x44f   :  { %3072 = vpow2.f32 %v2779_v16  ;;  %v2780_v0 = vmul.f32 -1.442695, %v1340_v47 }
 0x450   :  { %v1296_v55 = vpop.f32.mrf.mxu0  ;;  %v1337_v7 = vpop.f32.mrf.mxu1 }
 0x451   :  { %3074 = vpow2.f32 %v2780_v0 }
 0x452   :  { %3076 = vpow2.f32 %v2781_v52 }
 0x45c   :  { %v3073_v46 = vpop.eup %3072 }
 0x45d   :  { %v1352_v5 = vadd.f32 1.0, %v3073_v46 }
 0x45e   :  { %v3075_v12 = vpop.eup %3074 }
 0x45f   :  { %3078 = vrcp.f32 %v1352_v5  ;;  %v1353_v13 = vadd.f32 1.0, %v3075_v12  ;;  %v3077_v16 = vpop.eup %3076  ;;  %v2782_v12 = vld [vmem:[%s5317_s0 + $0x18] sm:$0xff] }
 0x460   :  { %3080 = vtanh.f32 %v1342_v6  ;;  %v1354_v15 = vadd.f32 1.0, %v3077_v16 }
 0x461   :  { %3082 = vrcp.f32 %v1353_v13 }
 0x462   :  { %3084 = vrcp.f32 %v1354_v15 }
 0x46a   :  { %v1403_v9 = vpop.f32.mrf.mxu0  ;;  %v1444_v14 = vpop.f32.mrf.mxu1 }
 0x46c   :  { %v3079_v47 = vpop.eup %3078  ;;  %v1405_v51 = vpop.f32.mrf.mxu0 }
 0x46d   :  { %v1446_v7 = vpop.f32.mrf.mxu1  ;;  %v3081_v0 = vpop.eup %3080  ;;  %v1455_v55 = vcombine.low %v1403_v9, %v1405_v51 }
 0x46e   :  { %v1456_v10 = vcombine.low %v1444_v14, %v1446_v7  ;;  %v3083_v1 = vpop.eup %3082  ;;  %v1407_v8 = vpop.f32.mrf.mxu0  ;;  %v1363_v52 = vmul.f32 %v3081_v0, %v3079_v47 }
 0x46f   :  { %v1448_v58 = vpop.f32.mrf.mxu1  ;;  %v1362_v46 = vmul.f32 %v3083_v1, %v4179_v44  ;;  %v1463_v5 = vrot.slane %v1455_v55, %v3912_v57  ;;  %v3085_v44 = vpop.eup %3084 }
 0x470   :  { %v1470_v6 = vrot.slane %v1456_v10, %v3912_v57  ;;  %v1408_v13 = vpop.f32.mrf.mxu0 }
 0x471   :  { %v1449_v19 = vpop.f32.mrf.mxu1  ;;  %v4556_v50 = vadd.f32 %v1363_v52, %v1362_v46  ;;  %v5830_v13 = vld [vmem:[#allocation18_spill] sm:$0xff] }
 0x472   :  { %v1471_v9 = vcombine.low %v1463_v5, %v1470_v6 }
 0x473   :  { %3086 = vtanh.f32 %v4556_v50 }
 0x474   :  { %v1473_v14 = vadd.f32 %v2782_v12, %v1471_v9  ;;  %v5831_v9 = vld [vmem:[#allocation19_spill] sm:$0xff] }
 0x476   :  { %v2783_v8 = vmul.f32 -1.442695, %v1473_v14  ;;  %v1481_v55 = vrot.slane %v1473_v14, 6  ;;  %v5832_v14 = vld [vmem:[#allocation20_spill] sm:$0xff] }
 0x478   :  { %3088 = vpow2.f32 %v2783_v8  ;;  %v5833_v8 = vld [vmem:[#allocation21_spill] sm:$0xff] }
 0x480   :  { %v3087_v16 = vpop.eup %3086 }
 0x481   :  { %v1366_v47 = vmul.f32 %v3087_v16, %v3085_v44  ;;  %v5834_v44 = vld [vmem:[#allocation22_spill] sm:$0xff]  ;;  %v5835_v16 = vld [vmem:[#allocation23_spill] sm:$0xff] }
 0x483   :  { %v1495_v51 = vpack.c.bf16 %v1366_v47, %v1366_v47  ;;  %v5836_v47 = vld [vmem:[#allocation24_spill] sm:$0xff] }
 0x485   :  { %v3089_v7 = vpop.eup %3088  ;;  %1528 = vmatprep.mubr.bf16.mxu0 %v1495_v51  ;;  %1569 = vmatprep.mubr.bf16.mxu1 %v1495_v51  ;;  %v5837_v51 = vld [vmem:[#allocation25_spill] sm:$0xff] }
 0x486   :  { %v1477_v0 = vadd.f32 1.0, %v3089_v7  ;;  %v5838_v7 = vld [vmem:[#allocation26_spill] sm:$0xff] }
 0x488   :  { %3090 = vrcp.f32 %v1477_v0  ;;  %v5839_v0 = vld [vmem:[#allocation27_spill] sm:$0xff] }
 0x489   :  { %3092 = vtanh.f32 %v1481_v55  ;;  %v5840_v55 = vld [vmem:[#allocation28_spill] sm:$0xff] }
 0x495   :  { %v3091_v19 = vpop.eup %3090 }
 0x496   :  { %v1485_v10 = vrot.slane %v3091_v19, 2  ;;  %v3093_v1 = vpop.eup %3092  ;;  %v1491_v52 = vrot.slane %v3091_v19, 4 }
 0x497   :  { %v1488_v15 = vmul.f32 %v3093_v1, %v3091_v19  ;;  %v5841_v19 = vld [vmem:[#allocation29_spill] sm:$0xff]  ;;  %v5843_v1 = vld [vmem:[#allocation31_spill] sm:$0xff] }
 0x498   :  { %v1487_v58 = vmul.f32 %v1485_v10, %v4183_v11  ;;  %v5829_v11 = vld [vmem:[#allocation17_spill] sm:$0xff]  ;;  %v5842_v10 = vld [vmem:[#allocation30_spill] sm:$0xff] }
 0x49a   :  { %v4560_v46 = vadd.f32 %v1488_v15, %v1487_v58  ;;  %v5844_v15 = vld [vmem:[#allocation32_spill] sm:$0xff]  ;;  %v5845_v58 = vld [vmem:[#allocation33_spill] sm:$0xff] }
 0x49c   :  { %3094 = vtanh.f32 %v4560_v46 }
 0x4a9   :  { %v3095_v5 = vpop.eup %3094 }
 0x4aa   :  { %v1493_v6 = vmul.f32 %v3095_v5, %v1491_v52  ;;  %v5846_v52 = vld [vmem:[#allocation34_spill] sm:$0xff]  ;;  %v5847_v5 = vld [vmem:[#allocation35_spill] sm:$0xff] }
 0x4ac   :  { %v1494_v12 = vpack.c.bf16 %v1493_v6, %v1493_v6  ;;  %v5848_v6 = vld [vmem:[#allocation36_spill] sm:$0xff] }
 0x4ae   :  { %1529 = vmatmul.mubr.bf16.vlgmr.msra.gmra.mxu0 %v1494_v12  ;;  %1570 = vmatmul.mubr.bf16.vlgmr.msra.gmra.mxu1 %v1494_v12 }
 0x4af   :  { %1609 = vmatpush1.bf16.msra.mxu0 %v4054_v3  ;;  %1650 = vmatpush1.bf16.msra.mxu1 %v4060_v56  ;;  %v5827_v3 = vld [vmem:[#allocation15_spill] sm:$0xff]  ;;  %v5828_v56 = vld [vmem:[#allocation16_spill] sm:$0xff] }
 0x4b0   :  { %1610 = vmatprep.subr.bf16.mxu0 %v4195_v54  ;;  %1651 = vmatprep.subr.bf16.mxu1 %v4201_v17 }
 0x4b1   :  { %1640 = vmatprep.mubr.bf16.mxu0 %v5663_v48  ;;  %1681 = vmatprep.mubr.bf16.mxu1 %v5663_v48 }
 0x4b3   :  { %1611 = vmatpush1.bf16.msra.mxu0 %v4209_v18  ;;  %1652 = vmatpush1.bf16.msra.mxu1 %v4215_v20 }
 0x4b4   :  { %1612 = vmatprep.subr.bf16.mxu0 %v4221_v21  ;;  %1653 = vmatprep.subr.bf16.mxu1 %v4227_v22 }
 0x4b7   :  { %1613 = vmatpush1.bf16.msra.mxu0 %v4233_v23  ;;  %1654 = vmatpush1.bf16.msra.mxu1 %v4239_v24 }
 0x4b8   :  { %1614 = vmatprep.subr.bf16.mxu0 %v4245_v25  ;;  %1655 = vmatprep.subr.bf16.mxu1 %v4251_v26 }
 0x4bb   :  { %1615 = vmatpush1.bf16.msra.mxu0 %v4257_v27  ;;  %1656 = vmatpush1.bf16.msra.mxu1 %v4263_v28 }
 0x4bc   :  { %1616 = vmatprep.subr.bf16.mxu0 %v4269_v29  ;;  %1657 = vmatprep.subr.bf16.mxu1 %v4275_v30 }
 0x4bf   :  { %1617 = vmatpush1.bf16.msra.mxu0 %v4281_v31  ;;  %1658 = vmatpush1.bf16.msra.mxu1 %v4287_v32 }
 0x4c0   :  { %1618 = vmatprep.subr.bf16.mxu0 %v4293_v33  ;;  %1659 = vmatprep.subr.bf16.mxu1 %v4299_v34 }
 0x4c3   :  { %1619 = vmatpush1.bf16.msra.mxu0 %v4305_v35  ;;  %1660 = vmatpush1.bf16.msra.mxu1 %v4311_v36 }
 0x4c4   :  { %1620 = vmatprep.subr.bf16.mxu0 %v4317_v37  ;;  %1661 = vmatprep.subr.bf16.mxu1 %v4323_v38 }
 0x4c7   :  { %1621 = vmatpush1.bf16.msra.mxu0 %v4329_v39  ;;  %1662 = vmatpush1.bf16.msra.mxu1 %v4335_v40 }
 0x4c8   :  { %1622 = vmatprep.subr.bf16.mxu0 %v4341_v41  ;;  %1663 = vmatprep.subr.bf16.mxu1 %v4347_v42 }
 0x4cb   :  { %1623 = vmatpush1.bf16.msra.mxu0 %v4353_v43  ;;  %1664 = vmatpush1.bf16.msra.mxu1 %v4359_v4 }
 0x4cc   :  { %1735 = vmatprep.subr.bf16.mxu0 %v4362_v53  ;;  %1776 = vmatprep.subr.bf16.mxu1 %v4365_v60 }
 0x4ce   :  { %1641 = vmatmul.mubr.bf16.vlgmr.msra.gmra.mxu0 %v1494_v12  ;;  %1682 = vmatmul.mubr.bf16.vlgmr.msra.gmra.mxu1 %v1494_v12  ;;  %v5849_v12 = vld [vmem:[#allocation37_spill] sm:$0xff] }
 0x4cf   :  { %1736 = vmatpush1.bf16.msra.mxu0 %v4370_v45  ;;  %1777 = vmatpush1.bf16.msra.mxu1 %v4373_v63 }
 0x4d0   :  { %1737 = vmatprep.subr.bf16.mxu0 %v4376_v61  ;;  %1778 = vmatprep.subr.bf16.mxu1 %v4379_v2 }
 0x4d3   :  { %1738 = vmatpush1.bf16.msra.mxu0 %v4382_v59  ;;  %1779 = vmatpush1.bf16.msra.mxu1 %v4385_v62 }
 0x4d4   :  { %1739 = vmatprep.subr.bf16.mxu0 %v4388_v49  ;;  %1780 = vmatprep.subr.bf16.mxu1 %v5827_v3 }
 0x4d7   :  { %1740 = vmatpush1.bf16.msra.mxu0 %v5828_v56  ;;  %1781 = vmatpush1.bf16.msra.mxu1 %v5829_v11 }
 0x4d8   :  { %1741 = vmatprep.subr.bf16.mxu0 %v5830_v13  ;;  %1782 = vmatprep.subr.bf16.mxu1 %v5831_v9  ;;  %v5887_v9 = vld [vmem:[#allocation66_spill] sm:$0xff] }
 0x4db   :  { %1742 = vmatpush1.bf16.msra.mxu0 %v5832_v14  ;;  %1783 = vmatpush1.bf16.msra.mxu1 %v5833_v8 }
 0x4dc   :  { %1743 = vmatprep.subr.bf16.mxu0 %v5834_v44  ;;  %1784 = vmatprep.subr.bf16.mxu1 %v5835_v16 }
 0x4df   :  { %1744 = vmatpush1.bf16.msra.mxu0 %v5836_v47  ;;  %1785 = vmatpush1.bf16.msra.mxu1 %v5837_v51 }
 0x4e0   :  { %1745 = vmatprep.subr.bf16.mxu0 %v5838_v7  ;;  %1786 = vmatprep.subr.bf16.mxu1 %v5839_v0  ;;  %v5850_v0 = vld [vmem:[#allocation38_spill] sm:$0xff] }
 0x4e3   :  { %1746 = vmatpush1.bf16.msra.mxu0 %v5840_v55  ;;  %1787 = vmatpush1.bf16.msra.mxu1 %v5841_v19  ;;  %v5851_v55 = vld [vmem:[#allocation39_spill] sm:$0xff]  ;;  %v5852_v19 = vld [vmem:[#allocation40_spill] sm:$0xff] }
 0x4e4   :  { %1747 = vmatprep.subr.bf16.mxu0 %v5842_v10  ;;  %1788 = vmatprep.subr.bf16.mxu1 %v5843_v1  ;;  %v5853_v10 = vld [vmem:[#allocation41_spill] sm:$0xff]  ;;  %v5854_v1 = vld [vmem:[#allocation42_spill] sm:$0xff] }
 0x4e7   :  { %1748 = vmatpush1.bf16.msra.mxu0 %v5844_v15  ;;  %1789 = vmatpush1.bf16.msra.mxu1 %v5845_v58  ;;  %v5855_v15 = vld [vmem:[#allocation43_spill] sm:$0xff]  ;;  %v5856_v58 = vld [vmem:[#allocation44_spill] sm:$0xff] }
 0x4e8   :  { %1749 = vmatprep.subr.bf16.mxu0 %v5846_v52  ;;  %1790 = vmatprep.subr.bf16.mxu1 %v5847_v5  ;;  %v5857_v52 = vld [vmem:[#allocation45_spill] sm:$0xff]  ;;  %v5858_v5 = vld [vmem:[#allocation46_spill] sm:$0xff] }
 0x4eb   :  { %1750 = vmatpush1.bf16.msra.mxu0 %v5848_v6  ;;  %1791 = vmatpush1.bf16.msra.mxu1 %v5849_v12  ;;  %v5859_v6 = vld [vmem:[#allocation47_spill] sm:$0xff]  ;;  %v5860_v12 = vld [vmem:[#allocation48_spill] sm:$0xff] }
 0x4ec   :  { %1751 = vmatprep.subr.bf16.mxu0 %v5850_v0  ;;  %1792 = vmatprep.subr.bf16.mxu1 %v5851_v55  ;;  %v5861_v0 = vld [vmem:[#allocation49_spill] sm:$0xff]  ;;  %v5862_v55 = vld [vmem:[#allocation50_spill] sm:$0xff] }
 0x4ef   :  { %1752 = vmatpush2.bf16.msra.mxu0 %v5852_v19  ;;  %1793 = vmatpush2.bf16.msra.mxu1 %v5853_v10  ;;  %v5863_v19 = vld [vmem:[#allocation51_spill] sm:$0xff]  ;;  %v5864_v10 = vld [vmem:[#allocation52_spill] sm:$0xff] }
 0x4f0   :  { %1753 = vmatprep.subr.bf16.mxu0 %v5854_v1  ;;  %1794 = vmatprep.subr.bf16.mxu1 %v5855_v15  ;;  %v5865_v1 = vld [vmem:[#allocation53_spill] sm:$0xff]  ;;  %v5866_v15 = vld [vmem:[#allocation54_spill] sm:$0xff] }
 0x4f3   :  { %1754 = vmatpush2.bf16.msra.mxu0 %v5856_v58  ;;  %1795 = vmatpush2.bf16.msra.mxu1 %v5857_v52  ;;  %v5867_v58 = vld [vmem:[#allocation55_spill] sm:$0xff]  ;;  %v5868_v52 = vld [vmem:[#allocation56_spill] sm:$0xff] }
 0x4f4   :  { %1755 = vmatprep.subr.bf16.mxu0 %v5858_v5  ;;  %1796 = vmatprep.subr.bf16.mxu1 %v5859_v6  ;;  %v5869_v5 = vld [vmem:[#allocation57_spill] sm:$0xff]  ;;  %v5870_v6 = vld [vmem:[#allocation58_spill] sm:$0xff] }
 0x4f7   :  { %1756 = vmatpush2.bf16.msra.mxu0 %v5860_v12  ;;  %1797 = vmatpush2.bf16.msra.mxu1 %v5861_v0  ;;  %v5871_v12 = vld [vmem:[#allocation59_spill] sm:$0xff]  ;;  %v5872_v0 = vld [vmem:[#allocation60_spill] sm:$0xff] }
 0x4f8   :  { %1757 = vmatprep.subr.bf16.mxu0 %v5862_v55  ;;  %1798 = vmatprep.subr.bf16.mxu1 %v5863_v19  ;;  %v5873_v55 = vld [vmem:[#allocation61_spill] sm:$0xff]  ;;  %v5874_v19 = vld [vmem:[#allocation62_spill] sm:$0xff] }
 0x4fb   :  { %1758 = vmatpush2.bf16.msra.mxu0 %v5864_v10  ;;  %1799 = vmatpush2.bf16.msra.mxu1 %v5865_v1  ;;  %v5875_v10 = vld [vmem:[#allocation63_spill] sm:$0xff] }
 0x4fc   :  { %1759 = vmatprep.subr.bf16.mxu0 %v5866_v15  ;;  %1800 = vmatprep.subr.bf16.mxu1 %v5867_v58  ;;  %v4653_v1 = vld [vmem:[#allocation2 + $0x120] ss:$16 sps:$4 sm:$0xff]   ;;  %v4656_v58 = vld [vmem:[#allocation2 + $0x128] ss:$16 sps:$4 sm:$0xff]  }
 0x4fd   :  { %5876 = vst [vmem:[#allocation64_spill] sm:$0xff] %v4653_v1  ;;  %5877 = vst [vmem:[#allocation15_spill] sm:$0xff] %v4656_v58 }
 0x4ff   :  { %1760 = vmatpush2.bf16.msra.mxu0 %v5868_v52  ;;  %1801 = vmatpush2.bf16.msra.mxu1 %v5869_v5  ;;  %v4659_v5 = vld [vmem:[#allocation2 + $0x104] ss:$16 sps:$4 sm:$0xff]  }
 0x500   :  { %1761 = vmatprep.subr.bf16.mxu0 %v5870_v6  ;;  %1802 = vmatprep.subr.bf16.mxu1 %v5871_v12  ;;  %5878 = vst [vmem:[#allocation16_spill] sm:$0xff] %v4659_v5  ;;  %v4662_v12 = vld [vmem:[#allocation2 + $0x10c] ss:$16 sps:$4 sm:$0xff]   ;;  %v5884_v6 = vld [vmem:[#allocation11_spill] sm:$0xff] }
 0x501   :  { %5879 = vst [vmem:[#allocation67_spill] sm:$0xff] %v4662_v12 }
 0x503   :  { %1762 = vmatpush2.bf16.msra.mxu0 %v5872_v0  ;;  %1803 = vmatpush2.bf16.msra.mxu1 %v5873_v55  ;;  %v4665_v55 = vld [vmem:[#allocation2 + $0x100] ss:$16 sps:$4 sm:$0xff]  }
 0x504   :  { %1763 = vmatprep.subr.bf16.mxu0 %v5874_v19  ;;  %1804 = vmatprep.subr.bf16.mxu1 %v5875_v10  ;;  %5880 = vst [vmem:[#allocation68_spill] sm:$0xff] %v4665_v55  ;;  %v4668_v10 = vld [vmem:[#allocation2 + $0x108] ss:$16 sps:$4 sm:$0xff]  }
 0x505   :  { %5881 = vst [vmem:[#allocation69_spill] sm:$0xff] %v4668_v10  ;;  %v5883_v19 = vld [vmem:[#allocation14_spill] sm:$0xff] }
 0x507   :  { %1764 = vmatpush2.bf16.msra.mxu0 %v4653_v1  ;;  %1805 = vmatpush2.bf16.msra.mxu1 %v4656_v58  ;;  %v5882_v1 = vld [vmem:[#allocation13_spill] sm:$0xff] }
 0x508   :  { %1765 = vmatprep.subr.bf16.mxu0 %v4659_v5  ;;  %1806 = vmatprep.subr.bf16.mxu1 %v4662_v12  ;;  %v5885_v12 = vld [vmem:[#allocation12_spill] sm:$0xff] }
 0x50b   :  { %1766 = vmatpush2.bf16.msra.mxu0 %v4665_v55  ;;  %1807 = vmatpush2.bf16.msra.mxu1 %v4668_v10  ;;  %v5886_v10 = vld [vmem:[#allocation65_spill] sm:$0xff] }
 0x50c   :  { %1847 = vmatprep.subr.bf16.mxu0 %v5882_v1  ;;  %1888 = vmatprep.subr.bf16.mxu1 %v5883_v19 }
 0x56e   :  { %v1530_v58 = vpop.f32.mrf.mxu0  ;;  %v1571_v0 = vpop.f32.mrf.mxu1 }
 0x56f   :  { %v1578_v5 = vadd.f32 %v1530_v58, %v5884_v6  ;;  %v1580_v1 = vadd.f32 %v1571_v0, %v5886_v10 }
 0x570   :  { %v1532_v52 = vpop.f32.mrf.mxu0  ;;  %v1573_v15 = vpop.f32.mrf.mxu1 }
 0x571   :  { %v2784_v7 = vmul.f32 -1.442695, %v1578_v5  ;;  %v1579_v51 = vadd.f32 %v1532_v52, %v5885_v12  ;;  %v2786_v14 = vmul.f32 -1.442695, %v1580_v1  ;;  %v1581_v13 = vadd.f32 %v1573_v15, %v5887_v9 }
 0x572   :  { %v1534_v47 = vpop.f32.mrf.mxu0  ;;  %v1575_v16 = vpop.f32.mrf.mxu1 }
 0x573   :  { %3096 = vpow2.f32 %v2784_v7  ;;  %v2785_v55 = vmul.f32 -1.442695, %v1579_v51 }
 0x574   :  { %v1535_v44 = vpop.f32.mrf.mxu0  ;;  %v1576_v8 = vpop.f32.mrf.mxu1 }
 0x575   :  { %3098 = vpow2.f32 %v2785_v55 }
 0x576   :  { %3100 = vpow2.f32 %v2786_v14 }
 0x580   :  { %v3097_v19 = vpop.eup %3096 }
 0x581   :  { %v1591_v11 = vadd.f32 1.0, %v3097_v19 }
 0x582   :  { %v3099_v58 = vpop.eup %3098 }
 0x583   :  { %3102 = vrcp.f32 %v1591_v11  ;;  %v1592_v5 = vadd.f32 1.0, %v3099_v58  ;;  %v3101_v7 = vpop.eup %3100  ;;  %v2787_v58 = vld [vmem:[%s5317_s0 + $0x20] sm:$0xff] }
 0x584   :  { %3104 = vtanh.f32 %v1581_v13  ;;  %v1593_v10 = vadd.f32 1.0, %v3101_v7 }
 0x585   :  { %3106 = vrcp.f32 %v1592_v5 }
 0x586   :  { %3108 = vrcp.f32 %v1593_v10 }
 0x58e   :  { %v1642_v47 = vpop.f32.mrf.mxu0  ;;  %v1683_v16 = vpop.f32.mrf.mxu1 }
 0x590   :  { %v3103_v51 = vpop.eup %3102  ;;  %v1644_v44 = vpop.f32.mrf.mxu0 }
 0x591   :  { %v1685_v8 = vpop.f32.mrf.mxu1  ;;  %v3105_v55 = vpop.eup %3104  ;;  %v1694_v52 = vcombine.low %v1642_v47, %v1644_v44 }
 0x592   :  { %v1695_v0 = vcombine.low %v1683_v16, %v1685_v8  ;;  %v3107_v1 = vpop.eup %3106  ;;  %v1646_v12 = vpop.f32.mrf.mxu0  ;;  %v1602_v14 = vmul.f32 %v3105_v55, %v3103_v51 }
 0x593   :  { %v1687_v15 = vpop.f32.mrf.mxu1  ;;  %v1601_v19 = vmul.f32 %v3107_v1, %v4556_v50  ;;  %v1702_v11 = vrot.slane %v1694_v52, %v3912_v57  ;;  %v3109_v50 = vpop.eup %3108 }
 0x594   :  { %v1709_v13 = vrot.slane %v1695_v0, %v3912_v57  ;;  %v1647_v5 = vpop.f32.mrf.mxu0 }
 0x595   :  { %v1688_v9 = vpop.f32.mrf.mxu1  ;;  %v4683_v6 = vadd.f32 %v1602_v14, %v1601_v19  ;;  %v4693_v5 = vld [vmem:[%s5318_s1 + $0xe0] ss:$16 sps:$4 sm:$0xff]  }
 0x596   :  { %v1710_v47 = vcombine.low %v1702_v11, %v1709_v13 }
 0x597   :  { %3110 = vtanh.f32 %v4683_v6 }
 0x598   :  { %v1712_v16 = vadd.f32 %v2787_v58, %v1710_v47  ;;  %v5927_v47 = vld [vmem:[#allocation56_spill] sm:$0xff] }
 0x59a   :  { %v2788_v12 = vmul.f32 -1.442695, %v1712_v16  ;;  %v1720_v52 = vrot.slane %v1712_v16, 6  ;;  %v5928_v16 = vld [vmem:[#allocation57_spill] sm:$0xff] }
 0x59c   :  { %3112 = vpow2.f32 %v2788_v12  ;;  %v5929_v12 = vld [vmem:[#allocation58_spill] sm:$0xff] }
 0x5a4   :  { %v3111_v7 = vpop.eup %3110 }
 0x5a5   :  { %v1605_v51 = vmul.f32 %v3111_v7, %v3109_v50  ;;  %v5930_v50 = vld [vmem:[#allocation59_spill] sm:$0xff]  ;;  %v5931_v7 = vld [vmem:[#allocation60_spill] sm:$0xff] }
 0x5a7   :  { %v1734_v44 = vpack.c.bf16 %v1605_v51, %v1605_v51  ;;  %v5932_v51 = vld [vmem:[#allocation61_spill] sm:$0xff] }
 0x5a9   :  { %v3113_v8 = vpop.eup %3112  ;;  %1767 = vmatprep.mubr.bf16.mxu0 %v1734_v44  ;;  %1808 = vmatprep.mubr.bf16.mxu1 %v1734_v44  ;;  %v5933_v44 = vld [vmem:[#allocation62_spill] sm:$0xff] }
 0x5aa   :  { %v1716_v55 = vadd.f32 1.0, %v3113_v8  ;;  %v5934_v8 = vld [vmem:[#allocation63_spill] sm:$0xff] }
 0x5ac   :  { %3114 = vrcp.f32 %v1716_v55  ;;  %v5935_v55 = vld [vmem:[#allocation64_spill] sm:$0xff] }
 0x5ad   :  { %3116 = vtanh.f32 %v1720_v52  ;;  %v5936_v52 = vld [vmem:[#allocation15_spill] sm:$0xff] }
 0x5b9   :  { %v3115_v9 = vpop.eup %3114 }
 0x5ba   :  { %v1724_v0 = vrot.slane %v3115_v9, 2  ;;  %v3117_v1 = vpop.eup %3116  ;;  %v1730_v14 = vrot.slane %v3115_v9, 4 }
 0x5bb   :  { %v1727_v10 = vmul.f32 %v3117_v1, %v3115_v9  ;;  %v5937_v9 = vld [vmem:[#allocation16_spill] sm:$0xff] }
 0x5bc   :  { %v1726_v15 = vmul.f32 %v1724_v0, %v4560_v46  ;;  %v4699_v46 = vld [vmem:[%s5318_s1 + $0xe8] ss:$16 sps:$4 sm:$0xff]  }
 0x5bd   :  { %v5938_v0 = vld [vmem:[#allocation67_spill] sm:$0xff]  ;;  %v5939_v1 = vld [vmem:[#allocation68_spill] sm:$0xff] }
 0x5be   :  { %v4687_v19 = vadd.f32 %v1727_v10, %v1726_v15  ;;  %v5940_v10 = vld [vmem:[#allocation69_spill] sm:$0xff] }
 0x5bf   :  { %v4799_v15 = vld [vmem:[%s5318_s1 + $0xe4] ss:$16 sps:$4 sm:$0xff]  }
 0x5c0   :  { %3118 = vtanh.f32 %v4687_v19 }
 0x5cd   :  { %v3119_v11 = vpop.eup %3118 }
 0x5ce   :  { %v1732_v13 = vmul.f32 %v3119_v11, %v1730_v14  ;;  %v4805_v14 = vld [vmem:[%s5318_s1 + $0xec] ss:$16 sps:$4 sm:$0xff]  }
 0x5d0   :  { %v1733_v58 = vpack.c.bf16 %v1732_v13, %v1732_v13 }
 0x5d2   :  { %1768 = vmatmul.mubr.bf16.vlgmr.msra.gmra.mxu0 %v1733_v58  ;;  %1809 = vmatmul.mubr.bf16.vlgmr.msra.gmra.mxu1 %v1733_v58 }
 0x5d3   :  { %1848 = vmatpush1.bf16.msra.mxu0 %v4693_v5  ;;  %1889 = vmatpush1.bf16.msra.mxu1 %v4699_v46 }
 0x5d4   :  { %1849 = vmatprep.subr.bf16.mxu0 %v4195_v54  ;;  %1890 = vmatprep.subr.bf16.mxu1 %v4201_v17  ;;  %v5888_v54 = vld [vmem:[#allocation17_spill] sm:$0xff]  ;;  %v5889_v17 = vld [vmem:[#allocation18_spill] sm:$0xff] }
 0x5d5   :  { %1879 = vmatprep.mubr.bf16.mxu0 %v5663_v48  ;;  %1920 = vmatprep.mubr.bf16.mxu1 %v5663_v48 }
 0x5d7   :  { %1850 = vmatpush1.bf16.msra.mxu0 %v4209_v18  ;;  %1891 = vmatpush1.bf16.msra.mxu1 %v4215_v20  ;;  %v5890_v18 = vld [vmem:[#allocation19_spill] sm:$0xff]  ;;  %v5891_v20 = vld [vmem:[#allocation20_spill] sm:$0xff] }
 0x5d8   :  { %1851 = vmatprep.subr.bf16.mxu0 %v4221_v21  ;;  %1892 = vmatprep.subr.bf16.mxu1 %v4227_v22  ;;  %v5892_v21 = vld [vmem:[#allocation21_spill] sm:$0xff]  ;;  %v5893_v22 = vld [vmem:[#allocation22_spill] sm:$0xff] }
 0x5db   :  { %1852 = vmatpush1.bf16.msra.mxu0 %v4233_v23  ;;  %1893 = vmatpush1.bf16.msra.mxu1 %v4239_v24  ;;  %v5894_v23 = vld [vmem:[#allocation23_spill] sm:$0xff]  ;;  %v5895_v24 = vld [vmem:[#allocation24_spill] sm:$0xff] }
 0x5dc   :  { %1853 = vmatprep.subr.bf16.mxu0 %v4245_v25  ;;  %1894 = vmatprep.subr.bf16.mxu1 %v4251_v26  ;;  %v5896_v25 = vld [vmem:[#allocation25_spill] sm:$0xff]  ;;  %v5897_v26 = vld [vmem:[#allocation26_spill] sm:$0xff] }
 0x5df   :  { %1854 = vmatpush1.bf16.msra.mxu0 %v4257_v27  ;;  %1895 = vmatpush1.bf16.msra.mxu1 %v4263_v28  ;;  %v5898_v27 = vld [vmem:[#allocation27_spill] sm:$0xff]  ;;  %v5899_v28 = vld [vmem:[#allocation28_spill] sm:$0xff] }
 0x5e0   :  { %1855 = vmatprep.subr.bf16.mxu0 %v4269_v29  ;;  %1896 = vmatprep.subr.bf16.mxu1 %v4275_v30  ;;  %v5900_v29 = vld [vmem:[#allocation29_spill] sm:$0xff]  ;;  %v5901_v30 = vld [vmem:[#allocation30_spill] sm:$0xff] }
 0x5e3   :  { %1856 = vmatpush1.bf16.msra.mxu0 %v4281_v31  ;;  %1897 = vmatpush1.bf16.msra.mxu1 %v4287_v32  ;;  %v5902_v31 = vld [vmem:[#allocation31_spill] sm:$0xff]  ;;  %v5903_v32 = vld [vmem:[#allocation32_spill] sm:$0xff] }
 0x5e4   :  { %1857 = vmatprep.subr.bf16.mxu0 %v4293_v33  ;;  %1898 = vmatprep.subr.bf16.mxu1 %v4299_v34  ;;  %v5904_v33 = vld [vmem:[#allocation33_spill] sm:$0xff]  ;;  %v5905_v34 = vld [vmem:[#allocation34_spill] sm:$0xff] }
 0x5e7   :  { %1858 = vmatpush1.bf16.msra.mxu0 %v4305_v35  ;;  %1899 = vmatpush1.bf16.msra.mxu1 %v4311_v36  ;;  %v5906_v35 = vld [vmem:[#allocation35_spill] sm:$0xff]  ;;  %v5907_v36 = vld [vmem:[#allocation36_spill] sm:$0xff] }
 0x5e8   :  { %1859 = vmatprep.subr.bf16.mxu0 %v4317_v37  ;;  %1900 = vmatprep.subr.bf16.mxu1 %v4323_v38  ;;  %v5908_v37 = vld [vmem:[#allocation37_spill] sm:$0xff]  ;;  %v5909_v38 = vld [vmem:[#allocation38_spill] sm:$0xff] }
 0x5eb   :  { %1860 = vmatpush1.bf16.msra.mxu0 %v4329_v39  ;;  %1901 = vmatpush1.bf16.msra.mxu1 %v4335_v40  ;;  %v5910_v39 = vld [vmem:[#allocation39_spill] sm:$0xff]  ;;  %v5911_v40 = vld [vmem:[#allocation40_spill] sm:$0xff] }
 0x5ec   :  { %1861 = vmatprep.subr.bf16.mxu0 %v4341_v41  ;;  %1902 = vmatprep.subr.bf16.mxu1 %v4347_v42  ;;  %v5912_v41 = vld [vmem:[#allocation41_spill] sm:$0xff]  ;;  %v5913_v42 = vld [vmem:[#allocation42_spill] sm:$0xff] }
 0x5ef   :  { %1862 = vmatpush1.bf16.msra.mxu0 %v4353_v43  ;;  %1903 = vmatpush1.bf16.msra.mxu1 %v4359_v4  ;;  %v5914_v43 = vld [vmem:[#allocation43_spill] sm:$0xff]  ;;  %v5915_v4 = vld [vmem:[#allocation44_spill] sm:$0xff] }
 0x5f0   :  { %1974 = vmatprep.subr.bf16.mxu0 %v4362_v53  ;;  %2015 = vmatprep.subr.bf16.mxu1 %v4365_v60  ;;  %v5916_v53 = vld [vmem:[#allocation45_spill] sm:$0xff]  ;;  %v5917_v60 = vld [vmem:[#allocation46_spill] sm:$0xff] }
 0x5f2   :  { %1880 = vmatmul.mubr.bf16.vlgmr.msra.gmra.mxu0 %v1733_v58  ;;  %1921 = vmatmul.mubr.bf16.vlgmr.msra.gmra.mxu1 %v1733_v58  ;;  %v5941_v58 = vld [vmem:[#allocation11_spill] sm:$0xff] }
 0x5f3   :  { %1975 = vmatpush1.bf16.msra.mxu0 %v4370_v45  ;;  %2016 = vmatpush1.bf16.msra.mxu1 %v4373_v63  ;;  %v5918_v45 = vld [vmem:[#allocation47_spill] sm:$0xff]  ;;  %v5919_v63 = vld [vmem:[#allocation48_spill] sm:$0xff] }
 0x5f4   :  { %1976 = vmatprep.subr.bf16.mxu0 %v4376_v61  ;;  %2017 = vmatprep.subr.bf16.mxu1 %v4379_v2  ;;  %v5920_v61 = vld [vmem:[#allocation49_spill] sm:$0xff]  ;;  %v5921_v2 = vld [vmem:[#allocation50_spill] sm:$0xff] }
 0x5f7   :  { %1977 = vmatpush1.bf16.msra.mxu0 %v4382_v59  ;;  %2018 = vmatpush1.bf16.msra.mxu1 %v4385_v62  ;;  %v5922_v59 = vld [vmem:[#allocation51_spill] sm:$0xff]  ;;  %v5923_v62 = vld [vmem:[#allocation52_spill] sm:$0xff] }
 0x5f8   :  { %1978 = vmatprep.subr.bf16.mxu0 %v4388_v49  ;;  %2019 = vmatprep.subr.bf16.mxu1 %v5827_v3  ;;  %v5924_v49 = vld [vmem:[#allocation53_spill] sm:$0xff]  ;;  %v5925_v3 = vld [vmem:[#allocation54_spill] sm:$0xff] }
 0x5fb   :  { %1979 = vmatpush1.bf16.msra.mxu0 %v5828_v56  ;;  %2020 = vmatpush1.bf16.msra.mxu1 %v5888_v54  ;;  %v5926_v56 = vld [vmem:[#allocation55_spill] sm:$0xff] }
 0x5fc   :  { %1980 = vmatprep.subr.bf16.mxu0 %v5889_v17  ;;  %2021 = vmatprep.subr.bf16.mxu1 %v5890_v18 }
 0x5ff   :  { %1981 = vmatpush1.bf16.msra.mxu0 %v5891_v20  ;;  %2022 = vmatpush1.bf16.msra.mxu1 %v5892_v21  ;;  %v5942_v21 = vld [vmem:[#allocation12_spill] sm:$0xff] }
 0x600   :  { %1982 = vmatprep.subr.bf16.mxu0 %v5893_v22  ;;  %2023 = vmatprep.subr.bf16.mxu1 %v5894_v23 }
 0x603   :  { %1983 = vmatpush1.bf16.msra.mxu0 %v5895_v24  ;;  %2024 = vmatpush1.bf16.msra.mxu1 %v5896_v25 }
 0x604   :  { %1984 = vmatprep.subr.bf16.mxu0 %v5897_v26  ;;  %2025 = vmatprep.subr.bf16.mxu1 %v5898_v27 }
 0x607   :  { %1985 = vmatpush1.bf16.msra.mxu0 %v5899_v28  ;;  %2026 = vmatpush1.bf16.msra.mxu1 %v5900_v29  ;;  %v5943_v28 = vld [vmem:[#allocation65_spill] sm:$0xff] }
 0x608   :  { %1986 = vmatprep.subr.bf16.mxu0 %v5901_v30  ;;  %2027 = vmatprep.subr.bf16.mxu1 %v5902_v31 }
 0x60b   :  { %1987 = vmatpush1.bf16.msra.mxu0 %v5903_v32  ;;  %2028 = vmatpush1.bf16.msra.mxu1 %v5904_v33  ;;  %v5944_v32 = vld [vmem:[#allocation66_spill] sm:$0xff] }
 0x60c   :  { %1988 = vmatprep.subr.bf16.mxu0 %v5905_v34  ;;  %2029 = vmatprep.subr.bf16.mxu1 %v5906_v35 }
 0x60f   :  { %1989 = vmatpush1.bf16.msra.mxu0 %v5907_v36  ;;  %2030 = vmatpush1.bf16.msra.mxu1 %v5908_v37 }
 0x610   :  { %1990 = vmatprep.subr.bf16.mxu0 %v5909_v38  ;;  %2031 = vmatprep.subr.bf16.mxu1 %v5910_v39 }
 0x613   :  { %1991 = vmatpush2.bf16.msra.mxu0 %v5911_v40  ;;  %2032 = vmatpush2.bf16.msra.mxu1 %v5912_v41 }
 0x614   :  { %1992 = vmatprep.subr.bf16.mxu0 %v5913_v42  ;;  %2033 = vmatprep.subr.bf16.mxu1 %v5914_v43 }
 0x617   :  { %1993 = vmatpush2.bf16.msra.mxu0 %v5915_v4  ;;  %2034 = vmatpush2.bf16.msra.mxu1 %v5916_v53 }
 0x618   :  { %1994 = vmatprep.subr.bf16.mxu0 %v5917_v60  ;;  %2035 = vmatprep.subr.bf16.mxu1 %v5918_v45 }
 0x61b   :  { %1995 = vmatpush2.bf16.msra.mxu0 %v5919_v63  ;;  %2036 = vmatpush2.bf16.msra.mxu1 %v5920_v61 }
 0x61c   :  { %1996 = vmatprep.subr.bf16.mxu0 %v5921_v2  ;;  %2037 = vmatprep.subr.bf16.mxu1 %v5922_v59 }
 0x61f   :  { %1997 = vmatpush2.bf16.msra.mxu0 %v5923_v62  ;;  %2038 = vmatpush2.bf16.msra.mxu1 %v5924_v49 }
 0x620   :  { %1998 = vmatprep.subr.bf16.mxu0 %v5925_v3  ;;  %2039 = vmatprep.subr.bf16.mxu1 %v5926_v56  ;;  %v2792_v3 = vld [vmem:[%s5317_s0 + $0x28] sm:$0xff] }
 0x623   :  { %1999 = vmatpush2.bf16.msra.mxu0 %v5927_v47  ;;  %2040 = vmatpush2.bf16.msra.mxu1 %v5928_v16 }
 0x624   :  { %2000 = vmatprep.subr.bf16.mxu0 %v5929_v12  ;;  %2041 = vmatprep.subr.bf16.mxu1 %v5930_v50 }
 0x627   :  { %2001 = vmatpush2.bf16.msra.mxu0 %v5931_v7  ;;  %2042 = vmatpush2.bf16.msra.mxu1 %v5932_v51 }
 0x628   :  { %2002 = vmatprep.subr.bf16.mxu0 %v5933_v44  ;;  %2043 = vmatprep.subr.bf16.mxu1 %v5934_v8 }
 0x62b   :  { %2003 = vmatpush2.bf16.msra.mxu0 %v5935_v55  ;;  %2044 = vmatpush2.bf16.msra.mxu1 %v5936_v52 }
 0x62c   :  { %2004 = vmatprep.subr.bf16.mxu0 %v5937_v9  ;;  %2045 = vmatprep.subr.bf16.mxu1 %v5938_v0 }
 0x62f   :  { %2005 = vmatpush2.bf16.msra.mxu0 %v5939_v1  ;;  %2046 = vmatpush2.bf16.msra.mxu1 %v5940_v10 }
 0x630   :  { %2086 = vmatprep.subr.bf16.mxu0 %v4799_v15  ;;  %2127 = vmatprep.subr.bf16.mxu1 %v4805_v14 }
 0x692   :  { %v1769_v11 = vpop.f32.mrf.mxu0  ;;  %v1810_v13 = vpop.f32.mrf.mxu1 }
 0x693   :  { %v1817_v54 = vadd.f32 %v1769_v11, %v5941_v58  ;;  %v1819_v29 = vadd.f32 %v1810_v13, %v5943_v28 }
 0x694   :  { %v1771_v17 = vpop.f32.mrf.mxu0  ;;  %v1812_v18 = vpop.f32.mrf.mxu1 }
 0x695   :  { %v2789_v20 = vmul.f32 -1.442695, %v1817_v54  ;;  %v1818_v22 = vadd.f32 %v1771_v17, %v5942_v21  ;;  %v2791_v30 = vmul.f32 -1.442695, %v1819_v29  ;;  %v1820_v33 = vadd.f32 %v1812_v18, %v5944_v32 }
 0x696   :  { %v1773_v23 = vpop.f32.mrf.mxu0  ;;  %v1814_v24 = vpop.f32.mrf.mxu1 }
 0x697   :  { %3120 = vpow2.f32 %v2789_v20  ;;  %v2790_v25 = vmul.f32 -1.442695, %v1818_v22 }
 0x698   :  { %v1774_v26 = vpop.f32.mrf.mxu0  ;;  %v1815_v27 = vpop.f32.mrf.mxu1 }
 0x699   :  { %3122 = vpow2.f32 %v2790_v25 }
 0x69a   :  { %3124 = vpow2.f32 %v2791_v30  ;;  %v4840_v30 = vld [vmem:[%s5318_s1 + $0xcc] ss:$16 sps:$4 sm:$0xff]  }
 0x6a4   :  { %v3121_v31 = vpop.eup %3120 }
 0x6a5   :  { %v1830_v34 = vadd.f32 1.0, %v3121_v31  ;;  %v4848_v31 = vld [vmem:[%s5318_s1 + $0xc0] ss:$16 sps:$4 sm:$0xff]  }
 0x6a6   :  { %v3123_v35 = vpop.eup %3122 }
 0x6a7   :  { %3126 = vrcp.f32 %v1830_v34  ;;  %v1831_v36 = vadd.f32 1.0, %v3123_v35  ;;  %v3125_v39 = vpop.eup %3124  ;;  %v4860_v34 = vld [vmem:[%s5318_s1 + $0xa4] ss:$16 sps:$4 sm:$0xff]   ;;  %v4866_v35 = vld [vmem:[%s5318_s1 + $0xac] ss:$16 sps:$4 sm:$0xff]  }
 0x6a8   :  { %3128 = vtanh.f32 %v1820_v33  ;;  %v1832_v45 = vadd.f32 1.0, %v3125_v39  ;;  %v4854_v33 = vld [vmem:[%s5318_s1 + $0xc8] ss:$16 sps:$4 sm:$0xff]   ;;  %v4890_v39 = vld [vmem:[%s5318_s1 + $0x8c] ss:$16 sps:$4 sm:$0xff]  }
 0x6a9   :  { %3130 = vrcp.f32 %v1831_v36  ;;  %v4872_v36 = vld [vmem:[%s5318_s1 + $0xa0] ss:$16 sps:$4 sm:$0xff]  }
 0x6aa   :  { %3132 = vrcp.f32 %v1832_v45  ;;  %v4938_v45 = vld [vmem:[%s5318_s1 + $0x4c] ss:$16 sps:$4 sm:$0xff]  }
 0x6b2   :  { %v1881_v37 = vpop.f32.mrf.mxu0  ;;  %v1922_v38 = vpop.f32.mrf.mxu1 }
 0x6b4   :  { %v3127_v40 = vpop.eup %3126  ;;  %v1883_v41 = vpop.f32.mrf.mxu0 }
 0x6b5   :  { %v1924_v42 = vpop.f32.mrf.mxu1  ;;  %v3129_v43 = vpop.eup %3128  ;;  %v1933_v4 = vcombine.low %v1881_v37, %v1883_v41  ;;  %v4878_v37 = vld [vmem:[%s5318_s1 + $0xa8] ss:$16 sps:$4 sm:$0xff]  }
 0x6b6   :  { %v1934_v53 = vcombine.low %v1922_v38, %v1924_v42  ;;  %v3131_v60 = vpop.eup %3130  ;;  %v1885_v63 = vpop.f32.mrf.mxu0  ;;  %v1841_v59 = vmul.f32 %v3129_v43, %v3127_v40  ;;  %v4884_v38 = vld [vmem:[%s5318_s1 + $0x84] ss:$16 sps:$4 sm:$0xff]   ;;  %v4896_v40 = vld [vmem:[%s5318_s1 + $0x80] ss:$16 sps:$4 sm:$0xff]   ;;  %v4902_v41 = vld [vmem:[%s5318_s1 + $0x88] ss:$16 sps:$4 sm:$0xff]  }
 0x6b7   :  { %v1926_v61 = vpop.f32.mrf.mxu1  ;;  %v1840_v2 = vmul.f32 %v3131_v60, %v4683_v6  ;;  %v1941_v62 = vrot.slane %v1933_v4, %v3912_v57  ;;  %v3133_v6 = vpop.eup %3132  ;;  %v4908_v42 = vld [vmem:[%s5318_s1 + $0x64] ss:$16 sps:$4 sm:$0xff]   ;;  %v4914_v43 = vld [vmem:[%s5318_s1 + $0x6c] ss:$16 sps:$4 sm:$0xff]   ;;  %v4920_v4 = vld [vmem:[%s5318_s1 + $0x60] ss:$16 sps:$4 sm:$0xff]  }
 0x6b8   :  { %v1948_v49 = vrot.slane %v1934_v53, %v3912_v57  ;;  %v1886_v56 = vpop.f32.mrf.mxu0  ;;  %v4926_v53 = vld [vmem:[%s5318_s1 + $0x68] ss:$16 sps:$4 sm:$0xff]   ;;  %v4932_v60 = vld [vmem:[%s5318_s1 + $0x44] ss:$16 sps:$4 sm:$0xff]   ;;  %v4944_v63 = vld [vmem:[%s5318_s1 + $0x40] ss:$16 sps:$4 sm:$0xff]  }
 0x6b9   :  { %v1927_v47 = vpop.f32.mrf.mxu1  ;;  %v4818_v16 = vadd.f32 %v1841_v59, %v1840_v2  ;;  %v4950_v61 = vld [vmem:[%s5318_s1 + $0x48] ss:$16 sps:$4 sm:$0xff]   ;;  %v4956_v2 = vld [vmem:[%s5318_s1 + $0x24] ss:$16 sps:$4 sm:$0xff]   ;;  %v4962_v59 = vld [vmem:[%s5318_s1 + $0x2c] ss:$16 sps:$4 sm:$0xff]  }
 0x6ba   :  { %v1949_v12 = vcombine.low %v1941_v62, %v1948_v49  ;;  %v4968_v62 = vld [vmem:[%s5318_s1 + $0x20] ss:$16 sps:$4 sm:$0xff]   ;;  %v4974_v49 = vld [vmem:[%s5318_s1 + $0x28] ss:$16 sps:$4 sm:$0xff]   ;;  %v4986_v56 = vld [vmem:[%s5318_s1 + $0xc] ss:$16 sps:$4 sm:$0xff]  }
 0x6bb   :  { %3134 = vtanh.f32 %v4818_v16  ;;  %v4992_v47 = vld [vmem:[%s5318_s1] ss:$16 sps:$4 sm:$0xff]  }
 0x6bc   :  { %v1951_v50 = vadd.f32 %v2792_v3, %v1949_v12  ;;  %v4980_v3 = vld [vmem:[%s5318_s1 + $0x4] ss:$16 sps:$4 sm:$0xff]   ;;  %v4998_v12 = vld [vmem:[%s5318_s1 + $0x8] ss:$16 sps:$4 sm:$0xff]  }
 0x6be   :  { %v2793_v7 = vmul.f32 -1.442695, %v1951_v50  ;;  %v1959_v54 = vrot.slane %v1951_v50, 6  ;;  %v5001_v50 = vld [vmem:[#allocation2 + $0xe4] ss:$16 sps:$4 sm:$0xff]  }
 0x6c0   :  { %3136 = vpow2.f32 %v2793_v7  ;;  %v5004_v7 = vld [vmem:[#allocation2 + $0xec] ss:$16 sps:$4 sm:$0xff]  }
 0x6c8   :  { %v3135_v51 = vpop.eup %3134 }
 0x6c9   :  { %v1844_v44 = vmul.f32 %v3135_v51, %v3133_v6  ;;  %v5009_v6 = vld [vmem:[#allocation2 + $0xe0] ss:$16 sps:$4 sm:$0xff]   ;;  %v5012_v51 = vld [vmem:[#allocation2 + $0xe8] ss:$16 sps:$4 sm:$0xff]  }
 0x6cb   :  { %v1973_v8 = vpack.c.bf16 %v1844_v44, %v1844_v44  ;;  %v5015_v44 = vld [vmem:[#allocation2 + $0xc4] ss:$16 sps:$4 sm:$0xff]  }
 0x6cd   :  { %v3137_v11 = vpop.eup %3136  ;;  %2006 = vmatprep.mubr.bf16.mxu0 %v1973_v8  ;;  %2047 = vmatprep.mubr.bf16.mxu1 %v1973_v8  ;;  %v5018_v8 = vld [vmem:[#allocation2 + $0xcc] ss:$16 sps:$4 sm:$0xff]  }
 0x6ce   :  { %v1955_v13 = vadd.f32 1.0, %v3137_v11  ;;  %v5021_v11 = vld [vmem:[#allocation2 + $0xc0] ss:$16 sps:$4 sm:$0xff]  }
 0x6d0   :  { %3138 = vrcp.f32 %v1955_v13  ;;  %v5024_v13 = vld [vmem:[#allocation2 + $0xc8] ss:$16 sps:$4 sm:$0xff]  }
 0x6d1   :  { %3140 = vtanh.f32 %v1959_v54  ;;  %v5027_v54 = vld [vmem:[#allocation2 + $0xa4] ss:$16 sps:$4 sm:$0xff]  }
 0x6dd   :  { %v3139_v17 = vpop.eup %3138 }
 0x6de   :  { %v1963_v18 = vrot.slane %v3139_v17, 2  ;;  %v3141_v20 = vpop.eup %3140  ;;  %v1969_v25 = vrot.slane %v3139_v17, 4 }
 0x6df   :  { %v1966_v22 = vmul.f32 %v3141_v20, %v3139_v17  ;;  %v5030_v17 = vld [vmem:[#allocation2 + $0xac] ss:$16 sps:$4 sm:$0xff]   ;;  %v5036_v20 = vld [vmem:[#allocation2 + $0xa8] ss:$16 sps:$4 sm:$0xff]  }
 0x6e0   :  { %v1965_v23 = vmul.f32 %v1963_v18, %v4687_v19  ;;  %v4834_v19 = vld [vmem:[%s5318_s1 + $0xc4] ss:$16 sps:$4 sm:$0xff]   ;;  %5945 = vst [vmem:[#allocation13_spill] sm:$0xff] %v5030_v17  ;;  %v5033_v18 = vld [vmem:[#allocation2 + $0xa0] ss:$16 sps:$4 sm:$0xff]   ;;  %5947 = vst [vmem:[#allocation17_spill] sm:$0xff] %v5036_v20 }
 0x6e1   :  { %5946 = vst [vmem:[#allocation14_spill] sm:$0xff] %v5033_v18 }
 0x6e2   :  { %v4822_v24 = vadd.f32 %v1966_v22, %v1965_v23  ;;  %v5039_v22 = vld [vmem:[#allocation2 + $0x84] ss:$16 sps:$4 sm:$0xff]   ;;  %v5042_v23 = vld [vmem:[#allocation2 + $0x8c] ss:$16 sps:$4 sm:$0xff]  }
 0x6e3   :  { %5948 = vst [vmem:[#allocation18_spill] sm:$0xff] %v5039_v22  ;;  %5949 = vst [vmem:[#allocation19_spill] sm:$0xff] %v5042_v23 }
 0x6e4   :  { %3142 = vtanh.f32 %v4822_v24 }
 0x6f1   :  { %v3143_v26 = vpop.eup %3142 }
 0x6f2   :  { %v1971_v27 = vmul.f32 %v3143_v26, %v1969_v25  ;;  %v5045_v25 = vld [vmem:[#allocation2 + $0x80] ss:$16 sps:$4 sm:$0xff]   ;;  %v5048_v26 = vld [vmem:[#allocation2 + $0x88] ss:$16 sps:$4 sm:$0xff]  }
 0x6f3   :  { %5950 = vst [vmem:[#allocation20_spill] sm:$0xff] %v5045_v25  ;;  %5951 = vst [vmem:[#allocation21_spill] sm:$0xff] %v5048_v26 }
 0x6f4   :  { %v4825_v29 = vpack.c.bf16 %v1971_v27, %v1971_v27  ;;  %v5051_v27 = vld [vmem:[#allocation2 + $0x64] ss:$16 sps:$4 sm:$0xff]  }
 0x6f5   :  { %5952 = vst [vmem:[#allocation22_spill] sm:$0xff] %v5051_v27 }
 0x6f6   :  { %2007 = vmatmul.mubr.bf16.vlgmr.msra.gmra.mxu0 %v4825_v29  ;;  %2048 = vmatmul.mubr.bf16.vlgmr.msra.gmra.mxu1 %v4825_v29 }
 0x6f7   :  { %2087 = vmatpush1.bf16.msra.mxu0 %v4693_v5  ;;  %2128 = vmatpush1.bf16.msra.mxu1 %v4699_v46 }
 0x6f8   :  { %2088 = vmatprep.subr.bf16.mxu0 %v4834_v19  ;;  %2129 = vmatprep.subr.bf16.mxu1 %v4840_v30 }
 0x6f9   :  { %2118 = vmatprep.mubr.bf16.mxu0 %v5663_v48  ;;  %2159 = vmatprep.mubr.bf16.mxu1 %v5663_v48 }
 0x6fb   :  { %2089 = vmatpush1.bf16.msra.mxu0 %v4848_v31  ;;  %2130 = vmatpush1.bf16.msra.mxu1 %v4854_v33 }
 0x6fc   :  { %2090 = vmatprep.subr.bf16.mxu0 %v4860_v34  ;;  %2131 = vmatprep.subr.bf16.mxu1 %v4866_v35 }
 0x6ff   :  { %2091 = vmatpush1.bf16.msra.mxu0 %v4872_v36  ;;  %2132 = vmatpush1.bf16.msra.mxu1 %v4878_v37 }
 0x700   :  { %2092 = vmatprep.subr.bf16.mxu0 %v4884_v38  ;;  %2133 = vmatprep.subr.bf16.mxu1 %v4890_v39 }
 0x703   :  { %2093 = vmatpush1.bf16.msra.mxu0 %v4896_v40  ;;  %2134 = vmatpush1.bf16.msra.mxu1 %v4902_v41 }
 0x704   :  { %2094 = vmatprep.subr.bf16.mxu0 %v4908_v42  ;;  %2135 = vmatprep.subr.bf16.mxu1 %v4914_v43 }
 0x707   :  { %2095 = vmatpush1.bf16.msra.mxu0 %v4920_v4  ;;  %2136 = vmatpush1.bf16.msra.mxu1 %v4926_v53 }
 0x708   :  { %2096 = vmatprep.subr.bf16.mxu0 %v4932_v60  ;;  %2137 = vmatprep.subr.bf16.mxu1 %v4938_v45 }
 0x70b   :  { %2097 = vmatpush1.bf16.msra.mxu0 %v4944_v63  ;;  %2138 = vmatpush1.bf16.msra.mxu1 %v4950_v61 }
 0x70c   :  { %2098 = vmatprep.subr.bf16.mxu0 %v4956_v2  ;;  %2139 = vmatprep.subr.bf16.mxu1 %v4962_v59 }
 0x70f   :  { %2099 = vmatpush1.bf16.msra.mxu0 %v4968_v62  ;;  %2140 = vmatpush1.bf16.msra.mxu1 %v4974_v49 }
 0x710   :  { %2100 = vmatprep.subr.bf16.mxu0 %v4980_v3  ;;  %2141 = vmatprep.subr.bf16.mxu1 %v4986_v56 }
 0x713   :  { %2101 = vmatpush1.bf16.msra.mxu0 %v4992_v47  ;;  %2142 = vmatpush1.bf16.msra.mxu1 %v4998_v12 }
 0x714   :  { %2213 = vmatprep.subr.bf16.mxu0 %v5001_v50  ;;  %2254 = vmatprep.subr.bf16.mxu1 %v5004_v7 }
 0x716   :  { %2119 = vmatmul.mubr.bf16.vlgmr.msra.gmra.mxu0 %v4825_v29  ;;  %2160 = vmatmul.mubr.bf16.vlgmr.msra.gmra.mxu1 %v4825_v29  ;;  %v5054_v29 = vld [vmem:[#allocation2 + $0x6c] ss:$16 sps:$4 sm:$0xff]  }
 0x717   :  { %2214 = vmatpush1.bf16.msra.mxu0 %v5009_v6  ;;  %2255 = vmatpush1.bf16.msra.mxu1 %v5012_v51  ;;  %5953 = vst [vmem:[#allocation23_spill] sm:$0xff] %v5054_v29 }
 0x718   :  { %2215 = vmatprep.subr.bf16.mxu0 %v5015_v44  ;;  %2256 = vmatprep.subr.bf16.mxu1 %v5018_v8 }
 0x71b   :  { %2216 = vmatpush1.bf16.msra.mxu0 %v5021_v11  ;;  %2257 = vmatpush1.bf16.msra.mxu1 %v5024_v13 }
 0x71c   :  { %2217 = vmatprep.subr.bf16.mxu0 %v5027_v54  ;;  %2258 = vmatprep.subr.bf16.mxu1 %v5030_v17 }
 0x71f   :  { %2218 = vmatpush1.bf16.msra.mxu0 %v5033_v18  ;;  %2259 = vmatpush1.bf16.msra.mxu1 %v5036_v20 }
 0x720   :  { %2219 = vmatprep.subr.bf16.mxu0 %v5039_v22  ;;  %2260 = vmatprep.subr.bf16.mxu1 %v5042_v23  ;;  %v5057_v22 = vld [vmem:[#allocation2 + $0x60] ss:$16 sps:$4 sm:$0xff]   ;;  %v5060_v23 = vld [vmem:[#allocation2 + $0x68] ss:$16 sps:$4 sm:$0xff]  }
 0x721   :  { %5954 = vst [vmem:[#allocation24_spill] sm:$0xff] %v5057_v22  ;;  %5955 = vst [vmem:[#allocation25_spill] sm:$0xff] %v5060_v23 }
 0x723   :  { %2220 = vmatpush1.bf16.msra.mxu0 %v5045_v25  ;;  %2261 = vmatpush1.bf16.msra.mxu1 %v5048_v26  ;;  %v5063_v25 = vld [vmem:[#allocation2 + $0x44] ss:$16 sps:$4 sm:$0xff]   ;;  %v5066_v26 = vld [vmem:[#allocation2 + $0x4c] ss:$16 sps:$4 sm:$0xff]  }
 0x724   :  { %2221 = vmatprep.subr.bf16.mxu0 %v5051_v27  ;;  %2262 = vmatprep.subr.bf16.mxu1 %v5054_v29  ;;  %5956 = vst [vmem:[#allocation26_spill] sm:$0xff] %v5063_v25  ;;  %5957 = vst [vmem:[#allocation27_spill] sm:$0xff] %v5066_v26  ;;  %v5069_v27 = vld [vmem:[#allocation2 + $0x40] ss:$16 sps:$4 sm:$0xff]   ;;  %v5072_v29 = vld [vmem:[#allocation2 + $0x48] ss:$16 sps:$4 sm:$0xff]  }
 0x725   :  { %5958 = vst [vmem:[#allocation28_spill] sm:$0xff] %v5069_v27  ;;  %5959 = vst [vmem:[#allocation29_spill] sm:$0xff] %v5072_v29 }
 0x727   :  { %2222 = vmatpush1.bf16.msra.mxu0 %v5057_v22  ;;  %2263 = vmatpush1.bf16.msra.mxu1 %v5060_v23  ;;  %v5075_v22 = vld [vmem:[#allocation2 + $0x24] ss:$16 sps:$4 sm:$0xff]   ;;  %v5078_v23 = vld [vmem:[#allocation2 + $0x2c] ss:$16 sps:$4 sm:$0xff]  }
 0x728   :  { %2223 = vmatprep.subr.bf16.mxu0 %v5063_v25  ;;  %2264 = vmatprep.subr.bf16.mxu1 %v5066_v26  ;;  %5960 = vst [vmem:[#allocation30_spill] sm:$0xff] %v5075_v22  ;;  %5961 = vst [vmem:[#allocation31_spill] sm:$0xff] %v5078_v23  ;;  %v5081_v25 = vld [vmem:[#allocation2 + $0x20] ss:$16 sps:$4 sm:$0xff]   ;;  %v5084_v26 = vld [vmem:[#allocation2 + $0x28] ss:$16 sps:$4 sm:$0xff]  }
 0x729   :  { %5962 = vst [vmem:[#allocation32_spill] sm:$0xff] %v5081_v25  ;;  %5963 = vst [vmem:[#allocation33_spill] sm:$0xff] %v5084_v26 }
 0x72b   :  { %2224 = vmatpush1.bf16.msra.mxu0 %v5069_v27  ;;  %2265 = vmatpush1.bf16.msra.mxu1 %v5072_v29  ;;  %v5087_v27 = vld [vmem:[#allocation2 + $0x4] ss:$16 sps:$4 sm:$0xff]   ;;  %v5090_v29 = vld [vmem:[#allocation2 + $0xc] ss:$16 sps:$4 sm:$0xff]  }
 0x72c   :  { %2225 = vmatprep.subr.bf16.mxu0 %v5075_v22  ;;  %2266 = vmatprep.subr.bf16.mxu1 %v5078_v23  ;;  %5964 = vst [vmem:[#allocation34_spill] sm:$0xff] %v5087_v27  ;;  %5965 = vst [vmem:[#allocation35_spill] sm:$0xff] %v5090_v29  ;;  %v5093_v22 = vld [vmem:[#allocation2] ss:$16 sps:$4 sm:$0xff]   ;;  %v5096_v23 = vld [vmem:[#allocation2 + $0x8] ss:$16 sps:$4 sm:$0xff]  }
 0x72d   :  { %5966 = vst [vmem:[#allocation36_spill] sm:$0xff] %v5093_v22  ;;  %5967 = vst [vmem:[#allocation37_spill] sm:$0xff] %v5096_v23 }
 0x72f   :  { %2226 = vmatpush1.bf16.msra.mxu0 %v5081_v25  ;;  %2267 = vmatpush1.bf16.msra.mxu1 %v5084_v26  ;;  %v5099_v25 = vld [vmem:[#allocation2 + $0x1e4] ss:$16 sps:$4 sm:$0xff]   ;;  %v5102_v26 = vld [vmem:[#allocation2 + $0x1ec] ss:$16 sps:$4 sm:$0xff]  }
 0x730   :  { %2227 = vmatprep.subr.bf16.mxu0 %v5087_v27  ;;  %2268 = vmatprep.subr.bf16.mxu1 %v5090_v29  ;;  %5968 = vst [vmem:[#allocation38_spill] sm:$0xff] %v5099_v25  ;;  %5969 = vst [vmem:[#allocation39_spill] sm:$0xff] %v5102_v26  ;;  %v5105_v27 = vld [vmem:[#allocation2 + $0x1e0] ss:$16 sps:$4 sm:$0xff]   ;;  %v5108_v29 = vld [vmem:[#allocation2 + $0x1e8] ss:$16 sps:$4 sm:$0xff]  }
 0x731   :  { %5970 = vst [vmem:[#allocation40_spill] sm:$0xff] %v5105_v27  ;;  %5971 = vst [vmem:[#allocation41_spill] sm:$0xff] %v5108_v29 }
 0x733   :  { %2228 = vmatpush1.bf16.msra.mxu0 %v5093_v22  ;;  %2269 = vmatpush1.bf16.msra.mxu1 %v5096_v23  ;;  %v5111_v22 = vld [vmem:[#allocation2 + $0x1c4] ss:$16 sps:$4 sm:$0xff]   ;;  %v5114_v23 = vld [vmem:[#allocation2 + $0x1cc] ss:$16 sps:$4 sm:$0xff]  }
 0x734   :  { %2229 = vmatprep.subr.bf16.mxu0 %v5099_v25  ;;  %2270 = vmatprep.subr.bf16.mxu1 %v5102_v26  ;;  %5972 = vst [vmem:[#allocation42_spill] sm:$0xff] %v5111_v22  ;;  %5973 = vst [vmem:[#allocation43_spill] sm:$0xff] %v5114_v23  ;;  %v5117_v25 = vld [vmem:[#allocation2 + $0x1c0] ss:$16 sps:$4 sm:$0xff]   ;;  %v5120_v26 = vld [vmem:[#allocation2 + $0x1c8] ss:$16 sps:$4 sm:$0xff]  }
 0x735   :  { %5974 = vst [vmem:[#allocation44_spill] sm:$0xff] %v5117_v25  ;;  %5975 = vst [vmem:[#allocation45_spill] sm:$0xff] %v5120_v26 }
 0x737   :  { %2230 = vmatpush2.bf16.msra.mxu0 %v5105_v27  ;;  %2271 = vmatpush2.bf16.msra.mxu1 %v5108_v29  ;;  %v5123_v27 = vld [vmem:[#allocation2 + $0x1a4] ss:$16 sps:$4 sm:$0xff]   ;;  %v5126_v29 = vld [vmem:[#allocation2 + $0x1ac] ss:$16 sps:$4 sm:$0xff]  }
 0x738   :  { %2231 = vmatprep.subr.bf16.mxu0 %v5111_v22  ;;  %2272 = vmatprep.subr.bf16.mxu1 %v5114_v23  ;;  %5976 = vst [vmem:[#allocation46_spill] sm:$0xff] %v5123_v27  ;;  %5977 = vst [vmem:[#allocation47_spill] sm:$0xff] %v5126_v29  ;;  %v5129_v22 = vld [vmem:[#allocation2 + $0x1a0] ss:$16 sps:$4 sm:$0xff]   ;;  %v5132_v23 = vld [vmem:[#allocation2 + $0x1a8] ss:$16 sps:$4 sm:$0xff]  }
 0x739   :  { %5978 = vst [vmem:[#allocation48_spill] sm:$0xff] %v5129_v22  ;;  %5979 = vst [vmem:[#allocation49_spill] sm:$0xff] %v5132_v23 }
 0x73b   :  { %2232 = vmatpush2.bf16.msra.mxu0 %v5117_v25  ;;  %2273 = vmatpush2.bf16.msra.mxu1 %v5120_v26  ;;  %v5135_v25 = vld [vmem:[#allocation2 + $0x184] ss:$16 sps:$4 sm:$0xff]   ;;  %v5138_v26 = vld [vmem:[#allocation2 + $0x18c] ss:$16 sps:$4 sm:$0xff]  }
 0x73c   :  { %2233 = vmatprep.subr.bf16.mxu0 %v5123_v27  ;;  %2274 = vmatprep.subr.bf16.mxu1 %v5126_v29  ;;  %5980 = vst [vmem:[#allocation50_spill] sm:$0xff] %v5135_v25  ;;  %5981 = vst [vmem:[#allocation51_spill] sm:$0xff] %v5138_v26  ;;  %v5141_v27 = vld [vmem:[#allocation2 + $0x180] ss:$16 sps:$4 sm:$0xff]   ;;  %v5144_v29 = vld [vmem:[#allocation2 + $0x188] ss:$16 sps:$4 sm:$0xff]  }
 0x73d   :  { %5982 = vst [vmem:[#allocation52_spill] sm:$0xff] %v5141_v27  ;;  %5983 = vst [vmem:[#allocation53_spill] sm:$0xff] %v5144_v29 }
 0x73f   :  { %2234 = vmatpush2.bf16.msra.mxu0 %v5129_v22  ;;  %2275 = vmatpush2.bf16.msra.mxu1 %v5132_v23  ;;  %v5147_v22 = vld [vmem:[#allocation2 + $0x164] ss:$16 sps:$4 sm:$0xff]   ;;  %v5150_v23 = vld [vmem:[#allocation2 + $0x16c] ss:$16 sps:$4 sm:$0xff]  }
 0x740   :  { %2235 = vmatprep.subr.bf16.mxu0 %v5135_v25  ;;  %2276 = vmatprep.subr.bf16.mxu1 %v5138_v26  ;;  %5984 = vst [vmem:[#allocation54_spill] sm:$0xff] %v5147_v22  ;;  %5985 = vst [vmem:[#allocation55_spill] sm:$0xff] %v5150_v23  ;;  %v5153_v25 = vld [vmem:[#allocation2 + $0x160] ss:$16 sps:$4 sm:$0xff]   ;;  %v5156_v26 = vld [vmem:[#allocation2 + $0x168] ss:$16 sps:$4 sm:$0xff]  }
 0x741   :  { %5986 = vst [vmem:[#allocation56_spill] sm:$0xff] %v5153_v25  ;;  %5987 = vst [vmem:[#allocation57_spill] sm:$0xff] %v5156_v26 }
 0x743   :  { %2236 = vmatpush2.bf16.msra.mxu0 %v5141_v27  ;;  %2277 = vmatpush2.bf16.msra.mxu1 %v5144_v29  ;;  %v5159_v27 = vld [vmem:[#allocation2 + $0x144] ss:$16 sps:$4 sm:$0xff]   ;;  %v5162_v29 = vld [vmem:[#allocation2 + $0x14c] ss:$16 sps:$4 sm:$0xff]  }
 0x744   :  { %2237 = vmatprep.subr.bf16.mxu0 %v5147_v22  ;;  %2278 = vmatprep.subr.bf16.mxu1 %v5150_v23  ;;  %5988 = vst [vmem:[#allocation58_spill] sm:$0xff] %v5159_v27  ;;  %5989 = vst [vmem:[#allocation59_spill] sm:$0xff] %v5162_v29  ;;  %v5165_v22 = vld [vmem:[#allocation2 + $0x140] ss:$16 sps:$4 sm:$0xff]   ;;  %v5168_v23 = vld [vmem:[#allocation2 + $0x148] ss:$16 sps:$4 sm:$0xff]  }
 0x745   :  { %5990 = vst [vmem:[#allocation60_spill] sm:$0xff] %v5165_v22  ;;  %5991 = vst [vmem:[#allocation61_spill] sm:$0xff] %v5168_v23 }
 0x747   :  { %2238 = vmatpush2.bf16.msra.mxu0 %v5153_v25  ;;  %2279 = vmatpush2.bf16.msra.mxu1 %v5156_v26  ;;  %v5171_v25 = vld [vmem:[#allocation2 + $0x124] ss:$16 sps:$4 sm:$0xff]   ;;  %v5174_v26 = vld [vmem:[#allocation2 + $0x12c] ss:$16 sps:$4 sm:$0xff]  }
 0x748   :  { %2239 = vmatprep.subr.bf16.mxu0 %v5159_v27  ;;  %2280 = vmatprep.subr.bf16.mxu1 %v5162_v29  ;;  %5992 = vst [vmem:[#allocation62_spill] sm:$0xff] %v5171_v25  ;;  %5993 = vst [vmem:[#allocation63_spill] sm:$0xff] %v5174_v26 }
 0x74b   :  { %2240 = vmatpush2.bf16.msra.mxu0 %v5165_v22  ;;  %2281 = vmatpush2.bf16.msra.mxu1 %v5168_v23 }
 0x74c   :  { %2241 = vmatprep.subr.bf16.mxu0 %v5171_v25  ;;  %2282 = vmatprep.subr.bf16.mxu1 %v5174_v26 }
 0x74f   :  { %2242 = vmatpush2.bf16.msra.mxu0 %v5935_v55  ;;  %2283 = vmatpush2.bf16.msra.mxu1 %v5936_v52 }
 0x750   :  { %2243 = vmatprep.subr.bf16.mxu0 %v5937_v9  ;;  %2284 = vmatprep.subr.bf16.mxu1 %v5938_v0 }
 0x753   :  { %2244 = vmatpush2.bf16.msra.mxu0 %v5939_v1  ;;  %2285 = vmatpush2.bf16.msra.mxu1 %v5940_v10 }
 0x754   :  { %2325 = vmatprep.subr.bf16.mxu0 %v4799_v15  ;;  %2366 = vmatprep.subr.bf16.mxu1 %v4805_v14 }
 0x7b6   :  { %v2008_v25 = vpop.f32.mrf.mxu0  ;;  %v2049_v23 = vpop.f32.mrf.mxu1 }
 0x7b7   :  { %v2056_v26 = vadd.f32 %v2008_v25, %v5941_v58  ;;  %v2058_v10 = vadd.f32 %v2049_v23, %v5943_v28 }
 0x7b8   :  { %v2010_v22 = vpop.f32.mrf.mxu0  ;;  %v2051_v55 = vpop.f32.mrf.mxu1 }
 0x7b9   :  { %v2794_v29 = vmul.f32 -1.442695, %v2056_v26  ;;  %v2057_v52 = vadd.f32 %v2010_v22, %v5942_v21  ;;  %v2796_v15 = vmul.f32 -1.442695, %v2058_v10  ;;  %v2059_v18 = vadd.f32 %v2051_v55, %v5944_v32 }
 0x7ba   :  { %v2012_v9 = vpop.f32.mrf.mxu0  ;;  %v2053_v27 = vpop.f32.mrf.mxu1 }
 0x7bb   :  { %3144 = vpow2.f32 %v2794_v29  ;;  %v2795_v0 = vmul.f32 -1.442695, %v2057_v52 }
 0x7bc   :  { %v2013_v1 = vpop.f32.mrf.mxu0  ;;  %v2054_v20 = vpop.f32.mrf.mxu1 }
 0x7bd   :  { %3146 = vpow2.f32 %v2795_v0 }
 0x7be   :  { %3148 = vpow2.f32 %v2796_v15 }
 0x7c8   :  { %v3145_v14 = vpop.eup %3144 }
 0x7c9   :  { %v2069_v17 = vadd.f32 1.0, %v3145_v14 }
 0x7ca   :  { %v3147_v25 = vpop.eup %3146 }
 0x7cb   :  { %3150 = vrcp.f32 %v2069_v17  ;;  %v2070_v26 = vadd.f32 1.0, %v3147_v25  ;;  %v3149_v29 = vpop.eup %3148  ;;  %v2797_v25 = vld [vmem:[%s5317_s0 + $0x30] sm:$0xff] }
 0x7cc   :  { %3152 = vtanh.f32 %v2059_v18  ;;  %v2071_v28 = vadd.f32 1.0, %v3149_v29 }
 0x7cd   :  { %3154 = vrcp.f32 %v2070_v26 }
 0x7ce   :  { %3156 = vrcp.f32 %v2071_v28 }
 0x7d6   :  { %v2120_v22 = vpop.f32.mrf.mxu0  ;;  %v2161_v27 = vpop.f32.mrf.mxu1 }
 0x7d8   :  { %v3151_v52 = vpop.eup %3150  ;;  %v2122_v9 = vpop.f32.mrf.mxu0 }
 0x7d9   :  { %v2163_v20 = vpop.f32.mrf.mxu1  ;;  %v3153_v0 = vpop.eup %3152  ;;  %v2172_v1 = vcombine.low %v2120_v22, %v2122_v9 }
 0x7da   :  { %v2173_v23 = vcombine.low %v2161_v27, %v2163_v20  ;;  %v3155_v10 = vpop.eup %3154  ;;  %v2124_v21 = vpop.f32.mrf.mxu0  ;;  %v2080_v15 = vmul.f32 %v3153_v0, %v3151_v52 }
 0x7db   :  { %v2165_v55 = vpop.f32.mrf.mxu1  ;;  %v2079_v14 = vmul.f32 %v3155_v10, %v4818_v16  ;;  %v2180_v17 = vrot.slane %v2172_v1, %v3912_v57  ;;  %v3157_v16 = vpop.eup %3156 }
 0x7dc   :  { %v2187_v18 = vrot.slane %v2173_v23, %v3912_v57  ;;  %v2125_v26 = vpop.f32.mrf.mxu0 }
 0x7dd   :  { %v2166_v32 = vpop.f32.mrf.mxu1  ;;  %v5195_v58 = vadd.f32 %v2080_v15, %v2079_v14  ;;  %v6035_v26 = vld [vmem:[#allocation56_spill] sm:$0xff] }
 0x7de   :  { %v2188_v22 = vcombine.low %v2180_v17, %v2187_v18 }
 0x7df   :  { %3158 = vtanh.f32 %v5195_v58 }
 0x7e0   :  { %v2190_v27 = vadd.f32 %v2797_v25, %v2188_v22  ;;  %v6036_v22 = vld [vmem:[#allocation57_spill] sm:$0xff] }
 0x7e2   :  { %v2798_v21 = vmul.f32 -1.442695, %v2190_v27  ;;  %v2198_v1 = vrot.slane %v2190_v27, 6  ;;  %v6037_v27 = vld [vmem:[#allocation58_spill] sm:$0xff] }
 0x7e4   :  { %3160 = vpow2.f32 %v2798_v21  ;;  %v6038_v21 = vld [vmem:[#allocation59_spill] sm:$0xff] }
 0x7ec   :  { %v3159_v29 = vpop.eup %3158 }
 0x7ed   :  { %v2083_v52 = vmul.f32 %v3159_v29, %v3157_v16  ;;  %v6039_v16 = vld [vmem:[#allocation60_spill] sm:$0xff]  ;;  %v6040_v29 = vld [vmem:[#allocation61_spill] sm:$0xff] }
 0x7ef   :  { %v2212_v9 = vpack.c.bf16 %v2083_v52, %v2083_v52  ;;  %v6041_v52 = vld [vmem:[#allocation62_spill] sm:$0xff] }
 0x7f1   :  { %v3161_v20 = vpop.eup %3160  ;;  %2245 = vmatprep.mubr.bf16.mxu0 %v2212_v9  ;;  %2286 = vmatprep.mubr.bf16.mxu1 %v2212_v9  ;;  %v6042_v9 = vld [vmem:[#allocation63_spill] sm:$0xff] }
 0x7f2   :  { %v2194_v0 = vadd.f32 1.0, %v3161_v20  ;;  %v3394_v20 = vld [vmem:[#allocation2 + $0x120] ss:$16 sps:$4 sm:$0xff]  }
 0x7f4   :  { %3162 = vrcp.f32 %v2194_v0  ;;  %v3395_v0 = vld [vmem:[#allocation2 + $0x128] ss:$16 sps:$4 sm:$0xff]  }
 0x7f5   :  { %3164 = vtanh.f32 %v2198_v1  ;;  %v3396_v1 = vld [vmem:[#allocation2 + $0x104] ss:$16 sps:$4 sm:$0xff]  }
 0x801   :  { %v3163_v32 = vpop.eup %3162 }
 0x802   :  { %v2202_v23 = vrot.slane %v3163_v32, 2  ;;  %v3165_v10 = vpop.eup %3164  ;;  %v2208_v15 = vrot.slane %v3163_v32, 4 }
 0x803   :  { %v2205_v28 = vmul.f32 %v3165_v10, %v3163_v32  ;;  %v3397_v32 = vld [vmem:[#allocation2 + $0x10c] ss:$16 sps:$4 sm:$0xff]   ;;  %v3399_v10 = vld [vmem:[#allocation2 + $0x108] ss:$16 sps:$4 sm:$0xff]  }
 0x804   :  { %v2204_v55 = vmul.f32 %v2202_v23, %v4822_v24  ;;  %v5997_v24 = vld [vmem:[#allocation18_spill] sm:$0xff] }
 0x805   :  { %v3398_v23 = vld [vmem:[#allocation2 + $0x100] ss:$16 sps:$4 sm:$0xff]  }
 0x806   :  { %v5199_v14 = vadd.f32 %v2205_v28, %v2204_v55 }
 0x808   :  { %3166 = vtanh.f32 %v5199_v14 }
 0x815   :  { %v3167_v17 = vpop.eup %3166 }
 0x816   :  { %v2210_v18 = vmul.f32 %v3167_v17, %v2208_v15  ;;  %v6043_v15 = vld [vmem:[#allocation11_spill] sm:$0xff] }
 0x818   :  { %v2211_v25 = vpack.c.bf16 %v2210_v18, %v2210_v18 }
 0x81a   :  { %2246 = vmatmul.mubr.bf16.vlgmr.msra.gmra.mxu0 %v2211_v25  ;;  %2287 = vmatmul.mubr.bf16.vlgmr.msra.gmra.mxu1 %v2211_v25 }
 0x81b   :  { %2326 = vmatpush1.bf16.msra.mxu0 %v4693_v5  ;;  %2367 = vmatpush1.bf16.msra.mxu1 %v4699_v46  ;;  %v5995_v5 = vld [vmem:[#allocation14_spill] sm:$0xff]  ;;  %v5996_v46 = vld [vmem:[#allocation17_spill] sm:$0xff] }
 0x81c   :  { %2327 = vmatprep.subr.bf16.mxu0 %v4834_v19  ;;  %2368 = vmatprep.subr.bf16.mxu1 %v4840_v30  ;;  %v5998_v19 = vld [vmem:[#allocation19_spill] sm:$0xff]  ;;  %v5999_v30 = vld [vmem:[#allocation20_spill] sm:$0xff] }
 0x81d   :  { %2357 = vmatprep.mubr.bf16.mxu0 %v5663_v48  ;;  %2398 = vmatprep.mubr.bf16.mxu1 %v5663_v48  ;;  %v5994_v48 = vld [vmem:[#allocation13_spill] sm:$0xff] }
 0x81f   :  { %2328 = vmatpush1.bf16.msra.mxu0 %v4848_v31  ;;  %2369 = vmatpush1.bf16.msra.mxu1 %v4854_v33  ;;  %v6000_v31 = vld [vmem:[#allocation21_spill] sm:$0xff]  ;;  %v6001_v33 = vld [vmem:[#allocation22_spill] sm:$0xff] }
 0x820   :  { %2329 = vmatprep.subr.bf16.mxu0 %v4860_v34  ;;  %2370 = vmatprep.subr.bf16.mxu1 %v4866_v35  ;;  %v6002_v34 = vld [vmem:[#allocation23_spill] sm:$0xff]  ;;  %v6003_v35 = vld [vmem:[#allocation24_spill] sm:$0xff] }
 0x823   :  { %2330 = vmatpush1.bf16.msra.mxu0 %v4872_v36  ;;  %2371 = vmatpush1.bf16.msra.mxu1 %v4878_v37  ;;  %v6004_v36 = vld [vmem:[#allocation25_spill] sm:$0xff]  ;;  %v6005_v37 = vld [vmem:[#allocation26_spill] sm:$0xff] }
 0x824   :  { %2331 = vmatprep.subr.bf16.mxu0 %v4884_v38  ;;  %2372 = vmatprep.subr.bf16.mxu1 %v4890_v39  ;;  %v6006_v38 = vld [vmem:[#allocation27_spill] sm:$0xff]  ;;  %v6007_v39 = vld [vmem:[#allocation28_spill] sm:$0xff] }
 0x827   :  { %2332 = vmatpush1.bf16.msra.mxu0 %v4896_v40  ;;  %2373 = vmatpush1.bf16.msra.mxu1 %v4902_v41  ;;  %v6008_v40 = vld [vmem:[#allocation29_spill] sm:$0xff]  ;;  %v6009_v41 = vld [vmem:[#allocation30_spill] sm:$0xff] }
 0x828   :  { %2333 = vmatprep.subr.bf16.mxu0 %v4908_v42  ;;  %2374 = vmatprep.subr.bf16.mxu1 %v4914_v43  ;;  %v6010_v42 = vld [vmem:[#allocation31_spill] sm:$0xff]  ;;  %v6011_v43 = vld [vmem:[#allocation32_spill] sm:$0xff] }
 0x82b   :  { %2334 = vmatpush1.bf16.msra.mxu0 %v4920_v4  ;;  %2375 = vmatpush1.bf16.msra.mxu1 %v4926_v53  ;;  %v6012_v4 = vld [vmem:[#allocation33_spill] sm:$0xff]  ;;  %v6013_v53 = vld [vmem:[#allocation34_spill] sm:$0xff] }
 0x82c   :  { %2335 = vmatprep.subr.bf16.mxu0 %v4932_v60  ;;  %2376 = vmatprep.subr.bf16.mxu1 %v4938_v45  ;;  %v6014_v60 = vld [vmem:[#allocation35_spill] sm:$0xff]  ;;  %v6015_v45 = vld [vmem:[#allocation36_spill] sm:$0xff] }
 0x82f   :  { %2336 = vmatpush1.bf16.msra.mxu0 %v4944_v63  ;;  %2377 = vmatpush1.bf16.msra.mxu1 %v4950_v61  ;;  %v6016_v63 = vld [vmem:[#allocation37_spill] sm:$0xff]  ;;  %v6017_v61 = vld [vmem:[#allocation38_spill] sm:$0xff] }
 0x830   :  { %2337 = vmatprep.subr.bf16.mxu0 %v4956_v2  ;;  %2378 = vmatprep.subr.bf16.mxu1 %v4962_v59  ;;  %v6018_v2 = vld [vmem:[#allocation39_spill] sm:$0xff]  ;;  %v6019_v59 = vld [vmem:[#allocation40_spill] sm:$0xff] }
 0x833   :  { %2338 = vmatpush1.bf16.msra.mxu0 %v4968_v62  ;;  %2379 = vmatpush1.bf16.msra.mxu1 %v4974_v49  ;;  %v6020_v62 = vld [vmem:[#allocation41_spill] sm:$0xff]  ;;  %v6021_v49 = vld [vmem:[#allocation42_spill] sm:$0xff] }
 0x834   :  { %2339 = vmatprep.subr.bf16.mxu0 %v4980_v3  ;;  %2380 = vmatprep.subr.bf16.mxu1 %v4986_v56  ;;  %v6022_v3 = vld [vmem:[#allocation43_spill] sm:$0xff]  ;;  %v6023_v56 = vld [vmem:[#allocation44_spill] sm:$0xff] }
 0x837   :  { %2340 = vmatpush1.bf16.msra.mxu0 %v4992_v47  ;;  %2381 = vmatpush1.bf16.msra.mxu1 %v4998_v12  ;;  %v6024_v47 = vld [vmem:[#allocation45_spill] sm:$0xff]  ;;  %v6025_v12 = vld [vmem:[#allocation46_spill] sm:$0xff] }
 0x838   :  { %2452 = vmatprep.subr.bf16.mxu0 %v5001_v50  ;;  %2493 = vmatprep.subr.bf16.mxu1 %v5004_v7  ;;  %v6026_v50 = vld [vmem:[#allocation47_spill] sm:$0xff]  ;;  %v6027_v7 = vld [vmem:[#allocation48_spill] sm:$0xff] }
 0x83a   :  { %2358 = vmatmul.mubr.bf16.vlgmr.msra.gmra.mxu0 %v2211_v25  ;;  %2399 = vmatmul.mubr.bf16.vlgmr.msra.gmra.mxu1 %v2211_v25 }
 0x83b   :  { %2453 = vmatpush1.bf16.msra.mxu0 %v5009_v6  ;;  %2494 = vmatpush1.bf16.msra.mxu1 %v5012_v51  ;;  %v6028_v6 = vld [vmem:[#allocation49_spill] sm:$0xff]  ;;  %v6029_v51 = vld [vmem:[#allocation50_spill] sm:$0xff] }
 0x83c   :  { %2454 = vmatprep.subr.bf16.mxu0 %v5015_v44  ;;  %2495 = vmatprep.subr.bf16.mxu1 %v5018_v8  ;;  %v6030_v44 = vld [vmem:[#allocation51_spill] sm:$0xff]  ;;  %v6031_v8 = vld [vmem:[#allocation52_spill] sm:$0xff] }
 0x83f   :  { %2455 = vmatpush1.bf16.msra.mxu0 %v5021_v11  ;;  %2496 = vmatpush1.bf16.msra.mxu1 %v5024_v13  ;;  %v6032_v11 = vld [vmem:[#allocation53_spill] sm:$0xff]  ;;  %v6033_v13 = vld [vmem:[#allocation54_spill] sm:$0xff] }
 0x840   :  { %2456 = vmatprep.subr.bf16.mxu0 %v5027_v54  ;;  %2497 = vmatprep.subr.bf16.mxu1 %v5994_v48  ;;  %v6034_v54 = vld [vmem:[#allocation55_spill] sm:$0xff] }
 0x843   :  { %2457 = vmatpush1.bf16.msra.mxu0 %v5995_v5  ;;  %2498 = vmatpush1.bf16.msra.mxu1 %v5996_v46  ;;  %v6044_v5 = vld [vmem:[#allocation12_spill] sm:$0xff] }
 0x844   :  { %2458 = vmatprep.subr.bf16.mxu0 %v5997_v24  ;;  %2499 = vmatprep.subr.bf16.mxu1 %v5998_v19 }
 0x847   :  { %2459 = vmatpush1.bf16.msra.mxu0 %v5999_v30  ;;  %2500 = vmatpush1.bf16.msra.mxu1 %v6000_v31 }
 0x848   :  { %2460 = vmatprep.subr.bf16.mxu0 %v6001_v33  ;;  %2501 = vmatprep.subr.bf16.mxu1 %v6002_v34  ;;  %v6045_v34 = vld [vmem:[#allocation65_spill] sm:$0xff] }
 0x84b   :  { %2461 = vmatpush1.bf16.msra.mxu0 %v6003_v35  ;;  %2502 = vmatpush1.bf16.msra.mxu1 %v6004_v36 }
 0x84c   :  { %2462 = vmatprep.subr.bf16.mxu0 %v6005_v37  ;;  %2503 = vmatprep.subr.bf16.mxu1 %v6006_v38  ;;  %v6046_v38 = vld [vmem:[#allocation66_spill] sm:$0xff] }
 0x84f   :  { %2463 = vmatpush1.bf16.msra.mxu0 %v6007_v39  ;;  %2504 = vmatpush1.bf16.msra.mxu1 %v6008_v40 }
 0x850   :  { %2464 = vmatprep.subr.bf16.mxu0 %v6009_v41  ;;  %2505 = vmatprep.subr.bf16.mxu1 %v6010_v42 }
 0x853   :  { %2465 = vmatpush1.bf16.msra.mxu0 %v6011_v43  ;;  %2506 = vmatpush1.bf16.msra.mxu1 %v6012_v4 }
 0x854   :  { %2466 = vmatprep.subr.bf16.mxu0 %v6013_v53  ;;  %2507 = vmatprep.subr.bf16.mxu1 %v6014_v60 }
 0x857   :  { %2467 = vmatpush1.bf16.msra.mxu0 %v6015_v45  ;;  %2508 = vmatpush1.bf16.msra.mxu1 %v6016_v63 }
 0x858   :  { %2468 = vmatprep.subr.bf16.mxu0 %v6017_v61  ;;  %2509 = vmatprep.subr.bf16.mxu1 %v6018_v2 }
 0x85b   :  { %2469 = vmatpush2.bf16.msra.mxu0 %v6019_v59  ;;  %2510 = vmatpush2.bf16.msra.mxu1 %v6020_v62 }
 0x85c   :  { %2470 = vmatprep.subr.bf16.mxu0 %v6021_v49  ;;  %2511 = vmatprep.subr.bf16.mxu1 %v6022_v3 }
 0x85f   :  { %2471 = vmatpush2.bf16.msra.mxu0 %v6023_v56  ;;  %2512 = vmatpush2.bf16.msra.mxu1 %v6024_v47 }
 0x860   :  { %2472 = vmatprep.subr.bf16.mxu0 %v6025_v12  ;;  %2513 = vmatprep.subr.bf16.mxu1 %v6026_v50 }
 0x863   :  { %2473 = vmatpush2.bf16.msra.mxu0 %v6027_v7  ;;  %2514 = vmatpush2.bf16.msra.mxu1 %v6028_v6  ;;  %v2802_v6 = vld [vmem:[%s5317_s0 + $0x38] sm:$0xff] }
 0x864   :  { %2474 = vmatprep.subr.bf16.mxu0 %v6029_v51  ;;  %2515 = vmatprep.subr.bf16.mxu1 %v6030_v44 }
 0x867   :  { %2475 = vmatpush2.bf16.msra.mxu0 %v6031_v8  ;;  %2516 = vmatpush2.bf16.msra.mxu1 %v6032_v11 }
 0x868   :  { %2476 = vmatprep.subr.bf16.mxu0 %v6033_v13  ;;  %2517 = vmatprep.subr.bf16.mxu1 %v6034_v54 }
 0x86b   :  { %2477 = vmatpush2.bf16.msra.mxu0 %v6035_v26  ;;  %2518 = vmatpush2.bf16.msra.mxu1 %v6036_v22 }
 0x86c   :  { %2478 = vmatprep.subr.bf16.mxu0 %v6037_v27  ;;  %2519 = vmatprep.subr.bf16.mxu1 %v6038_v21 }
 0x86f   :  { %2479 = vmatpush2.bf16.msra.mxu0 %v6039_v16  ;;  %2520 = vmatpush2.bf16.msra.mxu1 %v6040_v29 }
 0x870   :  { %2480 = vmatprep.subr.bf16.mxu0 %v6041_v52  ;;  %2521 = vmatprep.subr.bf16.mxu1 %v6042_v9 }
 0x873   :  { %2481 = vmatpush2.bf16.msra.mxu0 %v3394_v20  ;;  %2522 = vmatpush2.bf16.msra.mxu1 %v3395_v0 }
 0x874   :  { %2482 = vmatprep.subr.bf16.mxu0 %v3396_v1  ;;  %2523 = vmatprep.subr.bf16.mxu1 %v3397_v32 }
 0x877   :  { %2483 = vmatpush2.bf16.msra.mxu0 %v3398_v23  ;;  %2524 = vmatpush2.bf16.msra.mxu1 %v3399_v10 }
 0x8da   :  { %v2247_v28 = vpop.f32.mrf.mxu0  ;;  %v2288_v55 = vpop.f32.mrf.mxu1 }
 0x8db   :  { %v2295_v17 = vadd.f32 %v2247_v28, %v6043_v15  ;;  %v2297_v35 = vadd.f32 %v2288_v55, %v6045_v34  ;;  %v3475_v55 = vmov 0.0  }
 0x8dc   :  { %v2249_v18 = vpop.f32.mrf.mxu0  ;;  %v2290_v25 = vpop.f32.mrf.mxu1  ;;  %2825 = vmatprep.subr.mxu0 %v3475_v55 }
 0x8dd   :  { %v2799_v48 = vmul.f32 -1.442695, %v2295_v17  ;;  %v2296_v46 = vadd.f32 %v2249_v18, %v6044_v5  ;;  %v2801_v36 = vmul.f32 -1.442695, %v2297_v35  ;;  %v2298_v39 = vadd.f32 %v2290_v25, %v6046_v38  ;;  %v2577_v17 = vld [vmem:[#allocation5 + $0x78] sm:$0xff]  ;;  %v2576_v18 = vld [vmem:[#allocation5 + $0x70] sm:$0xff] }
 0x8de   :  { %v2251_v24 = vpop.f32.mrf.mxu0  ;;  %v2292_v19 = vpop.f32.mrf.mxu1  ;;  %v2575_v25 = vld [vmem:[#allocation5 + $0x68] sm:$0xff]  ;;  %v2566_v35 = vld [vmem:[#allocation5 + $0x20] sm:$0xff] }
 0x8df   :  { %3168 = vpow2.f32 %v2799_v48  ;;  %v2800_v30 = vmul.f32 -1.442695, %v2296_v46  ;;  %v2573_v48 = vld [vmem:[#allocation5 + $0x58] sm:$0xff]  ;;  %v2572_v46 = vld [vmem:[#allocation5 + $0x50] sm:$0xff]  ;;  %v2571_v24 = vld [vmem:[#allocation5 + $0x48] sm:$0xff] }
 0x8e0   :  { %v2252_v31 = vpop.f32.mrf.mxu0  ;;  %v2293_v33 = vpop.f32.mrf.mxu1  ;;  %v2570_v19 = vld [vmem:[#allocation5 + $0x40] sm:$0xff] }
 0x8e1   :  { %3170 = vpow2.f32 %v2800_v30  ;;  %v2569_v30 = vld [vmem:[#allocation5 + $0x38] sm:$0xff]  ;;  %v2568_v31 = vld [vmem:[#allocation5 + $0x30] sm:$0xff]  ;;  %v2567_v33 = vld [vmem:[#allocation5 + $0x28] sm:$0xff] }
 0x8e2   :  { %3172 = vpow2.f32 %v2801_v36  ;;  %v2565_v36 = vld [vmem:[#allocation5 + $0x18] sm:$0xff] }
 0x8ec   :  { %v3169_v37 = vpop.eup %3168 }
 0x8ed   :  { %v2308_v40 = vadd.f32 1.0, %v3169_v37  ;;  %v2564_v37 = vld [vmem:[#allocation5 + $0x10] sm:$0xff] }
 0x8ee   :  { %v3171_v41 = vpop.eup %3170 }
 0x8ef   :  { %3174 = vrcp.f32 %v2308_v40  ;;  %v2309_v42 = vadd.f32 1.0, %v3171_v41  ;;  %v3173_v53 = vpop.eup %3172  ;;  %v2562_v40 = vld [vmem:[#allocation5] sm:$0xff] }
 0x8f0   :  { %3176 = vtanh.f32 %v2298_v39  ;;  %v2310_v49 = vadd.f32 1.0, %v3173_v53  ;;  %v2563_v39 = vld [vmem:[#allocation5 + $0x8] sm:$0xff] }
 0x8f1   :  { %3178 = vrcp.f32 %v2309_v42 }
 0x8f2   :  { %3180 = vrcp.f32 %v2310_v49 }
 0x8fa   :  { %v2359_v43 = vpop.f32.mrf.mxu0  ;;  %v2400_v4 = vpop.f32.mrf.mxu1 }
 0x8fc   :  { %v3175_v60 = vpop.eup %3174  ;;  %v2361_v45 = vpop.f32.mrf.mxu0 }
 0x8fd   :  { %v2402_v63 = vpop.f32.mrf.mxu1  ;;  %v3177_v61 = vpop.eup %3176  ;;  %v2411_v2 = vcombine.low %v2359_v43, %v2361_v45 }
 0x8fe   :  { %v2412_v59 = vcombine.low %v2400_v4, %v2402_v63  ;;  %v3179_v62 = vpop.eup %3178  ;;  %v2363_v3 = vpop.f32.mrf.mxu0  ;;  %v2319_v12 = vmul.f32 %v3177_v61, %v3175_v60 }
 0x8ff   :  { %v2404_v56 = vpop.f32.mrf.mxu1  ;;  %v2318_v47 = vmul.f32 %v3179_v62, %v5195_v58  ;;  %v2419_v50 = vrot.slane %v2411_v2, %v3912_v57  ;;  %v3181_v58 = vpop.eup %3180 }
 0x900   :  { %v2426_v7 = vrot.slane %v2412_v59, %v3912_v57  ;;  %v2364_v51 = vpop.f32.mrf.mxu0 }
 0x901   :  { %v2405_v44 = vpop.f32.mrf.mxu1  ;;  %v5302_v8 = vadd.f32 %v2319_v12, %v2318_v47 }
 0x902   :  { %v2427_v11 = vcombine.low %v2419_v50, %v2426_v7 }
 0x903   :  { %3182 = vtanh.f32 %v5302_v8 }
 0x904   :  { %v2429_v13 = vadd.f32 %v2802_v6, %v2427_v11 }
 0x906   :  { %v2803_v54 = vmul.f32 -1.442695, %v2429_v13  ;;  %v2437_v16 = vrot.slane %v2429_v13, 6 }
 0x908   :  { %3184 = vpow2.f32 %v2803_v54 }
 0x910   :  { %v3183_v26 = vpop.eup %3182 }
 0x911   :  { %v2322_v22 = vmul.f32 %v3183_v26, %v3181_v58  ;;  %v2807_v26 = vld [vmem:[%s5322_s5] ss:$0 sm:$0xff] }
 0x913   :  { %v2451_v27 = vpack.c.bf16 %v2322_v22, %v2322_v22 }
 0x915   :  { %v3185_v57 = vpop.eup %3184  ;;  %2484 = vmatprep.mubr.bf16.mxu0 %v2451_v27  ;;  %2525 = vmatprep.mubr.bf16.mxu1 %v2451_v27 }
 0x916   :  { %v2433_v21 = vadd.f32 1.0, %v3185_v57 }
 0x918   :  { %3186 = vrcp.f32 %v2433_v21 }
 0x919   :  { %3188 = vtanh.f32 %v2437_v16 }
 0x925   :  { %v3187_v29 = vpop.eup %3186 }
 0x926   :  { %v2441_v52 = vrot.slane %v3187_v29, 2  ;;  %v3189_v9 = vpop.eup %3188  ;;  %v2447_v32 = vrot.slane %v3187_v29, 4 }
 0x927   :  { %v2444_v20 = vmul.f32 %v3189_v9, %v3187_v29 }
 0x928   :  { %v2443_v0 = vmul.f32 %v2441_v52, %v5199_v14  ;;  %v2574_v14 = vld [vmem:[#allocation5 + $0x60] sm:$0xff] }
 0x92a   :  { %v2445_v1 = vadd.f32 %v2444_v20, %v2443_v0 }
 0x92c   :  { %3190 = vtanh.f32 %v2445_v1 }
 0x939   :  { %v3191_v23 = vpop.eup %3190 }
 0x93a   :  { %v2449_v10 = vmul.f32 %v3191_v23, %v2447_v32 }
 0x93c   :  { %v2450_v28 = vpack.c.bf16 %v2449_v10, %v2449_v10 }
 0x93e   :  { %2485 = vmatmul.mubr.bf16.vlgmr.msra.gmra.mxu0 %v2450_v28  ;;  %2526 = vmatmul.mubr.bf16.vlgmr.msra.gmra.mxu1 %v2450_v28 }
 0x93f   :  { %2826 = vmatpush3.msra.mxu0 %v2577_v17  ;;  %2857 = vmatprep.mubr.msk.f32.mxu0 %vm3476_vm0, %v3475_v55 }
 0x940   :  { %2827 = vmatprep.subr.mxu0 %v3475_v55 }
 0x941   :  { %2828 = vmatpush3.msra.mxu0 %v2576_v18 }
 0x942   :  { %2829 = vmatprep.subr.mxu0 %v3475_v55 }
 0x943   :  { %2830 = vmatpush3.msra.mxu0 %v2575_v25 }
 0x944   :  { %2831 = vmatprep.subr.mxu0 %v3475_v55 }
 0x945   :  { %2832 = vmatpush3.msra.mxu0 %v2574_v14 }
 0x946   :  { %2833 = vmatprep.subr.mxu0 %v3475_v55 }
 0x947   :  { %2834 = vmatpush3.msra.mxu0 %v2573_v48 }
 0x948   :  { %2835 = vmatprep.subr.mxu0 %v3475_v55 }
 0x949   :  { %2836 = vmatpush3.msra.mxu0 %v2572_v46 }
 0x94a   :  { %2837 = vmatprep.subr.mxu0 %v3475_v55 }
 0x94b   :  { %2838 = vmatpush3.msra.mxu0 %v2571_v24 }
 0x94c   :  { %2839 = vmatprep.subr.mxu0 %v3475_v55 }
 0x94d   :  { %2840 = vmatpush3.msra.mxu0 %v2570_v19 }
 0x94e   :  { %2841 = vmatprep.subr.mxu0 %v3475_v55 }
 0x94f   :  { %2842 = vmatpush3.msra.mxu0 %v2569_v30 }
 0x950   :  { %2843 = vmatprep.subr.mxu0 %v3475_v55 }
 0x951   :  { %2844 = vmatpush3.msra.mxu0 %v2568_v31 }
 0x952   :  { %2845 = vmatprep.subr.mxu0 %v3475_v55 }
 0x953   :  { %2846 = vmatpush3.msra.mxu0 %v2567_v33 }
 0x954   :  { %2847 = vmatprep.subr.mxu0 %v3475_v55 }
 0x955   :  { %2848 = vmatpush3.msra.mxu0 %v2566_v35 }
 0x956   :  { %2849 = vmatprep.subr.mxu0 %v3475_v55 }
 0x957   :  { %2850 = vmatpush3.msra.mxu0 %v2565_v36 }
 0x958   :  { %2851 = vmatprep.subr.mxu0 %v3475_v55 }
 0x959   :  { %2852 = vmatpush3.msra.mxu0 %v2564_v37 }
 0x95a   :  { %2853 = vmatprep.subr.mxu0 %v3475_v55 }
 0x95b   :  { %2854 = vmatpush3.msra.mxu0 %v2563_v39 }
 0x95c   :  { %2855 = vmatprep.subr.mxu0 %v3475_v55 }
 0x95d   :  { %2856 = vmatpush3.msra.mxu0 %v2562_v40 }
 0x9fe   :  { %v2486_v41 = vpop.f32.mrf.mxu0  ;;  %v2527_v42 = vpop.f32.mrf.mxu1 }
 0x9ff   :  { %v2534_v43 = vadd.f32 %v2486_v41, %v6043_v15  ;;  %v2536_v49 = vadd.f32 %v2527_v42, %v6045_v34 }
 0xa00   :  { %v2488_v4 = vpop.f32.mrf.mxu0  ;;  %v2529_v53 = vpop.f32.mrf.mxu1 }
 0xa01   :  { %v2804_v60 = vmul.f32 -1.442695, %v2534_v43  ;;  %v2535_v45 = vadd.f32 %v2488_v4, %v6044_v5  ;;  %v2806_v3 = vmul.f32 -1.442695, %v2536_v49  ;;  %v2537_v47 = vadd.f32 %v2529_v53, %v6046_v38 }
 0xa02   :  { %v2490_v63 = vpop.f32.mrf.mxu0  ;;  %v2531_v61 = vpop.f32.mrf.mxu1 }
 0xa03   :  { %3192 = vpow2.f32 %v2804_v60  ;;  %v2805_v2 = vmul.f32 -1.442695, %v2535_v45 }
 0xa04   :  { %v2491_v59 = vpop.f32.mrf.mxu0  ;;  %v2532_v62 = vpop.f32.mrf.mxu1 }
 0xa05   :  { %3194 = vpow2.f32 %v2805_v2 }
 0xa06   :  { %3196 = vpow2.f32 %v2806_v3 }
 0xa10   :  { %v3193_v56 = vpop.eup %3192 }
 0xa11   :  { %v2547_v12 = vadd.f32 1.0, %v3193_v56 }
 0xa12   :  { %v3195_v15 = vpop.eup %3194 }
 0xa13   :  { %3198 = vrcp.f32 %v2547_v12  ;;  %v2548_v50 = vadd.f32 1.0, %v3195_v15  ;;  %v3197_v5 = vpop.eup %3196 }
 0xa14   :  { %3200 = vtanh.f32 %v2537_v47  ;;  %v2549_v44 = vadd.f32 1.0, %v3197_v5 }
 0xa15   :  { %3202 = vrcp.f32 %v2548_v50 }
 0xa16   :  { %3204 = vrcp.f32 %v2549_v44 }
 0xa20   :  { %v3199_v7 = vpop.eup %3198 }
 0xa21   :  { %v3201_v6 = vpop.eup %3200 }
 0xa22   :  { %v3203_v51 = vpop.eup %3202  ;;  %v2558_v13 = vmul.f32 %v3201_v6, %v3199_v7 }
 0xa23   :  { %v2557_v11 = vmul.f32 %v3203_v51, %v5302_v8  ;;  %v3205_v54 = vpop.eup %3204 }
 0xa25   :  { %v2559_v34 = vadd.f32 %v2558_v13, %v2557_v11 }
 0xa27   :  { %3206 = vtanh.f32 %v2559_v34 }
 0xa34   :  { %v3207_v38 = vpop.eup %3206 }
 0xa35   :  { %v2561_v58 = vmul.f32 %v3207_v38, %v3205_v54 }
 0xa37   :  { %2858 = vmatmul.mubr.f32.vlgmr.msra.gmra.mxu0 %v2561_v58 }
 0xaf7   :  { %v2651_v22 = vpop.f32.mrf.mxu0 }
 0xaf8   :  { %v2652_v27 = vadd.f32 %v2807_v26, %v2651_v22 }
 0xaf9   :  { %v2859_v57 = vpop.f32.mrf.mxu0 }
 0xafa   :  { %2655 = vst [vmem:[#allocation7] sm:$0x3] %v2652_v27 }
 0xafb   :  { %3451 = shalt.err (!%p3448_p0)
}
 0xafc   :  { %2665 = dma.vmem_to_hbm [thread:$0]  %s2663_s8, 32, %s5323_s6, [#allocation4]  }
 0xafd   :  { %3464 = dma.done.wait [#allocation4], 32  }
 0xafe   :  { %3465 = vsyncadd [#allocation4], 4294967264 }
 0xaff   :  { %2669 = vsyncpa [#allocation3], 1 }
 0xb00   :  { %2670 = vsyncpa [#allocation6], 1 }
 0xb01   :  { %2671 = vsyncpa [#allocation4], 1 }

</bundles_post_ra>
